<compile_context>
chip_gen: v7x
topology: tpu7x:2x2x1
jax: 0.10.0
libtpu: 0.0.40
codegen_flags: <defaults>
</compile_context>

<pallas_src>
import functools

import jax
import jax.numpy as jnp
from jax import lax
from jax.experimental import pallas as pl
from jax.experimental.pallas import tpu as pltpu

_NEG = -1e30  # finite "-inf" for padded logit columns (so 0 * pad never makes NaN)


def _round_up(x, m):
    return ((x + m - 1) // m) * m


def _lm_loss_kernel(ids_ref,             # SMEM  [B, S]    int32 (scalar prefetch)
                    y_ref,               # VMEM  [B, 1]    int32
                    emb_ref,             # VMEM  [Vp, Ep]  f32
                    w_ref,               # VMEM  [Ep, TO]  f32  (current O tile)
                    b_ref,               # VMEM  [1, TO]   f32  (current O tile)
                    loss_ref,            # SMEM  [1, 1]    f32
                    pooled_ref,          # VMEM scratch [B, Ep] f32
                    m_ref, l_ref, c_ref  # VMEM scratch [B, 1]  f32
                    ):
    j = pl.program_id(0)
    n_tiles = pl.num_programs(0)
    B, S = ids_ref.shape
    TO = w_ref.shape[1]

    # ---- one-time init: gather + tree-sum embedding rows (mean pool) + LSE accs.
    @pl.when(j == 0)
    def _init():
        inv_s = 1.0 / S
        for bi in range(B):                      # B, S are small & static -> unrolled
            rows = [emb_ref[pl.ds(ids_ref[bi, si], 1), :] for si in range(S)]
            while len(rows) > 1:                 # tree-add: log2(S)-deep, not S-deep
                nxt = [rows[i] + rows[i + 1] for i in range(0, len(rows) - 1, 2)]
                if len(rows) % 2:
                    nxt.append(rows[-1])
                rows = nxt
            pooled_ref[pl.ds(bi, 1), :] = rows[0] * inv_s   # scale on [1,Ep]
        m_ref[...] = jnp.full((B, 1), _NEG, jnp.float32)
        l_ref[...] = jnp.zeros((B, 1), jnp.float32)
        c_ref[...] = jnp.zeros((B, 1), jnp.float32)

    # ---- fc on this O tile (K = Ep = 16, unpadded). Padded bias cols are -1e30.
    logits = jnp.dot(pooled_ref[...], w_ref[...],
                     preferred_element_type=jnp.float32) + b_ref[...]     # [B, TO]

    # ---- online log-sum-exp accumulation over O tiles.
    m_prev = m_ref[...]
    m_new = jnp.maximum(m_prev, jnp.max(logits, axis=-1, keepdims=True))
    alpha = jnp.exp(m_prev - m_new)
    l_ref[...] = l_ref[...] * alpha + jnp.sum(jnp.exp(logits - m_new),
                                              axis=-1, keepdims=True)
    m_ref[...] = m_new

    # ---- accumulate the label logit (one-hot pick restricted to this tile).
    # Loop-invariant iota; shift the labels by the tile offset instead.
    col = lax.broadcasted_iota(jnp.int32, (B, TO), 1)
    local_y = y_ref[...] - j * TO
    onehot = (col == local_y).astype(jnp.float32)
    c_ref[...] = c_ref[...] + jnp.sum(logits * onehot, axis=-1, keepdims=True)

    # ---- finalize: mean cross-entropy loss -> SMEM scalar output.
    @pl.when(j == n_tiles - 1)
    def _finalize():
        per_ex = m_ref[...] + jnp.log(l_ref[...]) - c_ref[...]            # [B, 1]
        loss_ref[0, 0] = jnp.sum(per_ex) * (1.0 / B)


def prepare_lm_params(emb, w, b, *, block_o=None):
    """One-time (model-init) padding of the parameters.

    Only the small, necessary pads remain: V -> multiple of 8 (sublanes),
    O -> multiple of block_o (lane-dense 128 tiles).  E is left unpadded
    (rounded to 8 only if needed), so the per-call weight stream is minimal.
    Padded bias columns get -1e30 so they contribute exp(.) = 0 to the LSE.
    """
    V, E = emb.shape
    O = w.shape[1]

    if block_o is None:
        block_o = _round_up(O, 128)            # whole O in one tile by default
    assert block_o % 128 == 0

    E_pad = _round_up(E, 8)
    V_pad = _round_up(V, 8)
    n_tiles = -(-O // block_o)
    O_pad = n_tiles * block_o                  # O_pad - O < block_o always holds

    emb_p = jnp.pad(emb.astype(jnp.float32), ((0, V_pad - V), (0, E_pad - E)))
    w_p = jnp.pad(w.astype(jnp.float32), ((0, E_pad - E), (0, O_pad - O)))
    b_p = jnp.pad(b.astype(jnp.float32).reshape(1, O), ((0, 0), (0, O_pad - O)),
                  constant_values=_NEG)
    return emb_p, w_p, b_p, block_o


def lm_loss(x_ids, y_labels, emb_p, w_p, b_p, *, block_o):
    """Forward pass of `lm` (returns the scalar mean CE loss).

    Takes pre-padded parameters from prepare_lm_params (padding is NOT in the
    per-call path).  `block_o` must match the one used for padding.
    """
    B, S = x_ids.shape
    V_pad, E_pad = emb_p.shape
    O_pad = w_p.shape[1]
    assert O_pad % block_o == 0
    n_tiles = O_pad // block_o

    y2d = y_labels.reshape(-1, 1).astype(jnp.int32)

    grid_spec = pltpu.PrefetchScalarGridSpec(
        num_scalar_prefetch=1,            # token ids -> SMEM, drive row gathers
        grid=(n_tiles,),                  # stream the fc/CE over output classes
        in_specs=[
            pl.BlockSpec((B, 1), lambda j, ids: (0, 0)),             # labels
            pl.BlockSpec((V_pad, E_pad), lambda j, ids: (0, 0)),     # embedding table
            pl.BlockSpec((E_pad, block_o), lambda j, ids: (0, j)),   # fc weight tile
            pl.BlockSpec((1, block_o), lambda j, ids: (0, j)),       # fc bias tile
        ],
        out_specs=pl.BlockSpec(memory_space=pltpu.MemorySpace.SMEM),
        scratch_shapes=[
            pltpu.VMEM((B, E_pad), jnp.float32),   # pooled embeddings
            pltpu.VMEM((B, 1), jnp.float32),       # running max
            pltpu.VMEM((B, 1), jnp.float32),       # running sum-exp
            pltpu.VMEM((B, 1), jnp.float32),       # label-logit accumulator
        ],
    )

    out = pl.pallas_call(
        _lm_loss_kernel,
        out_shape=jax.ShapeDtypeStruct((1, 1), jnp.float32),
        grid_spec=grid_spec,
        compiler_params=pltpu.CompilerParams(
            dimension_semantics=("arbitrary",),   # O axis is a reduction
            vmem_limit_bytes=32 * 1024 * 1024,    # huge headroom; <2 MB used
        ),
    )(x_ids.astype(jnp.int32), y2d, emb_p, w_p, b_p)
    return out[0, 0]


def lm_loss_ref(x_ids, y_labels, emb, w, b):
    """Pure-JAX reference mirroring the PyTorch forward exactly."""
    e = jnp.take(emb, x_ids, axis=0)              # [B, S, E]
    pooled = jnp.mean(e, axis=1)                  # [B, E]
    logits = pooled @ w + b                       # [B, O]
    logz = jax.nn.logsumexp(logits, axis=-1)
    correct = jnp.take_along_axis(logits, y_labels.reshape(-1, 1), axis=-1)[:, 0]
    return jnp.mean(logz - correct)


if __name__ == "__main__":
    # Shapes match the module defaults: vocab=100, embedding=16, output=10000.
    B, S = 8, 8
    VOCAB, EMBED, OUT = 100, 16, 10000

    key = jax.random.PRNGKey(0)
    k_emb, k_w, k_x, k_y = jax.random.split(key, 4)

    initrange = 1.0 / float(jnp.sqrt(jnp.float32(EMBED)))
    emb = jax.random.uniform(k_emb, (VOCAB, EMBED), jnp.float32,
                             minval=-initrange, maxval=initrange)
    # PyTorch fc.weight is [OUT, EMBED]; we store its transpose for x @ W.
    w = jax.random.uniform(k_w, (EMBED, OUT), jnp.float32,
                           minval=-initrange, maxval=initrange)
    b = jnp.zeros((OUT,), jnp.float32)

    x_ids = jax.random.randint(k_x, (B, S), 0, VOCAB, dtype=jnp.int32)
    y = jax.random.randint(k_y, (B,), 0, OUT, dtype=jnp.int32)

    # One-time parameter prep (padding hoisted out of the per-call path).
    emb_p, w_p, b_p, block_o = prepare_lm_params(emb, w, b)

    loss_fn = jax.jit(functools.partial(lm_loss, block_o=block_o))
    loss = jax.block_until_ready(loss_fn(x_ids, y, emb_p, w_p, b_p))
    loss_r = jax.block_until_ready(lm_loss_ref(x_ids, y, emb, w, b))

    assert jnp.isfinite(loss), "loss is not finite"
    assert jnp.allclose(loss, loss_r, rtol=1e-4, atol=1e-4), (loss, loss_r)
    print("KERNEL_OK")
</pallas_src>

<mosaic_0001>
module attributes {stable_mosaic.version = 11 : i64} {
  func.func @_lm_loss_kernel(%arg0: i32, %arg1: memref<8x8xi32, #tpu.memory_space<smem>>, %arg2: memref<8x1xi32, #tpu.memory_space<vmem>>, %arg3: memref<104x16xf32, #tpu.memory_space<vmem>>, %arg4: memref<16x10112xf32, #tpu.memory_space<vmem>>, %arg5: memref<1x10112xf32, #tpu.memory_space<vmem>>, %arg6: memref<1x1xf32, #tpu.memory_space<smem>>, %arg7: memref<8x16xf32, #tpu.memory_space<vmem>>, %arg8: memref<8x1xf32, #tpu.memory_space<vmem>>, %arg9: memref<8x1xf32, #tpu.memory_space<vmem>>, %arg10: memref<8x1xf32, #tpu.memory_space<vmem>>) attributes {dimension_semantics = [#tpu.dimension_semantics<arbitrary>], iteration_bounds = array<i64: 1>, scalar_prefetch = 1 : i64, scratch_operands = 4 : i64, tpu.core_type = #tpu.core_type<tc>, window_params = [{pipeline_mode = #tpu.pipeline_mode<synchronous>, transform_indices = @transform_0, window_bounds = array<i64: 8, 1>}, {pipeline_mode = #tpu.pipeline_mode<synchronous>, transform_indices = @transform_1, window_bounds = array<i64: 104, 16>}, {transform_indices = @transform_2, window_bounds = array<i64: 16, 10112>}, {transform_indices = @transform_3, window_bounds = array<i64: 1, 10112>}, {transform_indices = @transform_4, window_bounds = array<i64: 1, 1>}]} {
    %c0_i32 = arith.constant 0 : i32
    %0 = arith.cmpi eq, %arg0, %c0_i32 : i32
    %1 = arith.extui %0 : i1 to i32
    %c0_i32_0 = arith.constant 0 : i32
    %2 = arith.cmpi ne, %1, %c0_i32_0 : i32
    scf.if %2 {
      %c0_25 = arith.constant 0 : index
      %c0_26 = arith.constant 0 : index
      %43 = memref.load %arg1[%c0_25, %c0_26] : memref<8x8xi32, #tpu.memory_space<smem>>
      %44 = arith.index_cast %43 : i32 to index
      %c0_27 = arith.constant 0 : index
      %45 = vector.load %arg3[%44, %c0_27] : memref<104x16xf32, #tpu.memory_space<vmem>>, vector<1x16xf32>
      %c0_28 = arith.constant 0 : index
      %c1 = arith.constant 1 : index
      %46 = memref.load %arg1[%c0_28, %c1] : memref<8x8xi32, #tpu.memory_space<smem>>
      %47 = arith.index_cast %46 : i32 to index
      %c0_29 = arith.constant 0 : index
      %48 = vector.load %arg3[%47, %c0_29] : memref<104x16xf32, #tpu.memory_space<vmem>>, vector<1x16xf32>
      %c0_30 = arith.constant 0 : index
      %c2 = arith.constant 2 : index
      %49 = memref.load %arg1[%c0_30, %c2] : memref<8x8xi32, #tpu.memory_space<smem>>
      %50 = arith.index_cast %49 : i32 to index
      %c0_31 = arith.constant 0 : index
      %51 = vector.load %arg3[%50, %c0_31] : memref<104x16xf32, #tpu.memory_space<vmem>>, vector<1x16xf32>
      %c0_32 = arith.constant 0 : index
      %c3 = arith.constant 3 : index
      %52 = memref.load %arg1[%c0_32, %c3] : memref<8x8xi32, #tpu.memory_space<smem>>
      %53 = arith.index_cast %52 : i32 to index
      %c0_33 = arith.constant 0 : index
      %54 = vector.load %arg3[%53, %c0_33] : memref<104x16xf32, #tpu.memory_space<vmem>>, vector<1x16xf32>
      %c0_34 = arith.constant 0 : index
      %c4 = arith.constant 4 : index
      %55 = memref.load %arg1[%c0_34, %c4] : memref<8x8xi32, #tpu.memory_space<smem>>
      %56 = arith.index_cast %55 : i32 to index
      %c0_35 = arith.constant 0 : index
      %57 = vector.load %arg3[%56, %c0_35] : memref<104x16xf32, #tpu.memory_space<vmem>>, vector<1x16xf32>
      %c0_36 = arith.constant 0 : index
      %c5 = arith.constant 5 : index
      %58 = memref.load %arg1[%c0_36, %c5] : memref<8x8xi32, #tpu.memory_space<smem>>
      %59 = arith.index_cast %58 : i32 to index
      %c0_37 = arith.constant 0 : index
      %60 = vector.load %arg3[%59, %c0_37] : memref<104x16xf32, #tpu.memory_space<vmem>>, vector<1x16xf32>
      %c0_38 = arith.constant 0 : index
      %c6 = arith.constant 6 : index
      %61 = memref.load %arg1[%c0_38, %c6] : memref<8x8xi32, #tpu.memory_space<smem>>
      %62 = arith.index_cast %61 : i32 to index
      %c0_39 = arith.constant 0 : index
      %63 = vector.load %arg3[%62, %c0_39] : memref<104x16xf32, #tpu.memory_space<vmem>>, vector<1x16xf32>
      %c0_40 = arith.constant 0 : index
      %c7 = arith.constant 7 : index
      %64 = memref.load %arg1[%c0_40, %c7] : memref<8x8xi32, #tpu.memory_space<smem>>
      %65 = arith.index_cast %64 : i32 to index
      %c0_41 = arith.constant 0 : index
      %66 = vector.load %arg3[%65, %c0_41] : memref<104x16xf32, #tpu.memory_space<vmem>>, vector<1x16xf32>
      %67 = arith.addf %45, %48 : vector<1x16xf32>
      %68 = arith.addf %51, %54 : vector<1x16xf32>
      %69 = arith.addf %57, %60 : vector<1x16xf32>
      %70 = arith.addf %63, %66 : vector<1x16xf32>
      %71 = arith.addf %67, %68 : vector<1x16xf32>
      %72 = arith.addf %69, %70 : vector<1x16xf32>
      %73 = arith.addf %71, %72 : vector<1x16xf32>
      %cst_42 = arith.constant 1.250000e-01 : f32
      %74 = vector.broadcast %cst_42 : f32 to vector<1x16xf32>
      %75 = arith.mulf %73, %74 : vector<1x16xf32>
      %c0_43 = arith.constant 0 : index
      %c0_44 = arith.constant 0 : index
      %76 = vector.load %arg7[%c0_43, %c0_44] : memref<8x16xf32, #tpu.memory_space<vmem>>, vector<1x16xf32>
      tpu.vector_store %arg7[%c0_43, %c0_44], %75 {strides = array<i32>} : memref<8x16xf32, #tpu.memory_space<vmem>>, vector<1x16xf32>,
      %c1_45 = arith.constant 1 : index
      %c0_46 = arith.constant 0 : index
      %77 = memref.load %arg1[%c1_45, %c0_46] : memref<8x8xi32, #tpu.memory_space<smem>>
      %78 = arith.index_cast %77 : i32 to index
      %c0_47 = arith.constant 0 : index
      %79 = vector.load %arg3[%78, %c0_47] : memref<104x16xf32, #tpu.memory_space<vmem>>, vector<1x16xf32>
      %c1_48 = arith.constant 1 : index
      %c1_49 = arith.constant 1 : index
      %80 = memref.load %arg1[%c1_48, %c1_49] : memref<8x8xi32, #tpu.memory_space<smem>>
      %81 = arith.index_cast %80 : i32 to index
      %c0_50 = arith.constant 0 : index
      %82 = vector.load %arg3[%81, %c0_50] : memref<104x16xf32, #tpu.memory_space<vmem>>, vector<1x16xf32>
      %c1_51 = arith.constant 1 : index
      %c2_52 = arith.constant 2 : index
      %83 = memref.load %arg1[%c1_51, %c2_52] : memref<8x8xi32, #tpu.memory_space<smem>>
      %84 = arith.index_cast %83 : i32 to index
      %c0_53 = arith.constant 0 : index
      %85 = vector.load %arg3[%84, %c0_53] : memref<104x16xf32, #tpu.memory_space<vmem>>, vector<1x16xf32>
      %c1_54 = arith.constant 1 : index
      %c3_55 = arith.constant 3 : index
      %86 = memref.load %arg1[%c1_54, %c3_55] : memref<8x8xi32, #tpu.memory_space<smem>>
      %87 = arith.index_cast %86 : i32 to index
      %c0_56 = arith.constant 0 : index
      %88 = vector.load %arg3[%87, %c0_56] : memref<104x16xf32, #tpu.memory_space<vmem>>, vector<1x16xf32>
      %c1_57 = arith.constant 1 : index
      %c4_58 = arith.constant 4 : index
      %89 = memref.load %arg1[%c1_57, %c4_58] : memref<8x8xi32, #tpu.memory_space<smem>>
      %90 = arith.index_cast %89 : i32 to index
      %c0_59 = arith.constant 0 : index
      %91 = vector.load %arg3[%90, %c0_59] : memref<104x16xf32, #tpu.memory_space<vmem>>, vector<1x16xf32>
      %c1_60 = arith.constant 1 : index
      %c5_61 = arith.constant 5 : index
      %92 = memref.load %arg1[%c1_60, %c5_61] : memref<8x8xi32, #tpu.memory_space<smem>>
      %93 = arith.index_cast %92 : i32 to index
      %c0_62 = arith.constant 0 : index
      %94 = vector.load %arg3[%93, %c0_62] : memref<104x16xf32, #tpu.memory_space<vmem>>, vector<1x16xf32>
      %c1_63 = arith.constant 1 : index
      %c6_64 = arith.constant 6 : index
      %95 = memref.load %arg1[%c1_63, %c6_64] : memref<8x8xi32, #tpu.memory_space<smem>>
      %96 = arith.index_cast %95 : i32 to index
      %c0_65 = arith.constant 0 : index
      %97 = vector.load %arg3[%96, %c0_65] : memref<104x16xf32, #tpu.memory_space<vmem>>, vector<1x16xf32>
      %c1_66 = arith.constant 1 : index
      %c7_67 = arith.constant 7 : index
      %98 = memref.load %arg1[%c1_66, %c7_67] : memref<8x8xi32, #tpu.memory_space<smem>>
      %99 = arith.index_cast %98 : i32 to index
      %c0_68 = arith.constant 0 : index
      %100 = vector.load %arg3[%99, %c0_68] : memref<104x16xf32, #tpu.memory_space<vmem>>, vector<1x16xf32>
      %101 = arith.addf %79, %82 : vector<1x16xf32>
      %102 = arith.addf %85, %88 : vector<1x16xf32>
      %103 = arith.addf %91, %94 : vector<1x16xf32>
      %104 = arith.addf %97, %100 : vector<1x16xf32>
      %105 = arith.addf %101, %102 : vector<1x16xf32>
      %106 = arith.addf %103, %104 : vector<1x16xf32>
      %107 = arith.addf %105, %106 : vector<1x16xf32>
      %cst_69 = arith.constant 1.250000e-01 : f32
      %108 = vector.broadcast %cst_69 : f32 to vector<1x16xf32>
      %109 = arith.mulf %107, %108 : vector<1x16xf32>
      %c1_70 = arith.constant 1 : index
      %c0_71 = arith.constant 0 : index
      %110 = vector.load %arg7[%c1_70, %c0_71] : memref<8x16xf32, #tpu.memory_space<vmem>>, vector<1x16xf32>
      tpu.vector_store %arg7[%c1_70, %c0_71], %109 {strides = array<i32>} : memref<8x16xf32, #tpu.memory_space<vmem>>, vector<1x16xf32>,
      %c2_72 = arith.constant 2 : index
      %c0_73 = arith.constant 0 : index
      %111 = memref.load %arg1[%c2_72, %c0_73] : memref<8x8xi32, #tpu.memory_space<smem>>
      %112 = arith.index_cast %111 : i32 to index
      %c0_74 = arith.constant 0 : index
      %113 = vector.load %arg3[%112, %c0_74] : memref<104x16xf32, #tpu.memory_space<vmem>>, vector<1x16xf32>
      %c2_75 = arith.constant 2 : index
      %c1_76 = arith.constant 1 : index
      %114 = memref.load %arg1[%c2_75, %c1_76] : memref<8x8xi32, #tpu.memory_space<smem>>
      %115 = arith.index_cast %114 : i32 to index
      %c0_77 = arith.constant 0 : index
      %116 = vector.load %arg3[%115, %c0_77] : memref<104x16xf32, #tpu.memory_space<vmem>>, vector<1x16xf32>
      %c2_78 = arith.constant 2 : index
      %c2_79 = arith.constant 2 : index
      %117 = memref.load %arg1[%c2_78, %c2_79] : memref<8x8xi32, #tpu.memory_space<smem>>
      %118 = arith.index_cast %117 : i32 to index
      %c0_80 = arith.constant 0 : index
      %119 = vector.load %arg3[%118, %c0_80] : memref<104x16xf32, #tpu.memory_space<vmem>>, vector<1x16xf32>
      %c2_81 = arith.constant 2 : index
      %c3_82 = arith.constant 3 : index
      %120 = memref.load %arg1[%c2_81, %c3_82] : memref<8x8xi32, #tpu.memory_space<smem>>
      %121 = arith.index_cast %120 : i32 to index
      %c0_83 = arith.constant 0 : index
      %122 = vector.load %arg3[%121, %c0_83] : memref<104x16xf32, #tpu.memory_space<vmem>>, vector<1x16xf32>
      %c2_84 = arith.constant 2 : index
      %c4_85 = arith.constant 4 : index
      %123 = memref.load %arg1[%c2_84, %c4_85] : memref<8x8xi32, #tpu.memory_space<smem>>
      %124 = arith.index_cast %123 : i32 to index
      %c0_86 = arith.constant 0 : index
      %125 = vector.load %arg3[%124, %c0_86] : memref<104x16xf32, #tpu.memory_space<vmem>>, vector<1x16xf32>
      %c2_87 = arith.constant 2 : index
      %c5_88 = arith.constant 5 : index
      %126 = memref.load %arg1[%c2_87, %c5_88] : memref<8x8xi32, #tpu.memory_space<smem>>
      %127 = arith.index_cast %126 : i32 to index
      %c0_89 = arith.constant 0 : index
      %128 = vector.load %arg3[%127, %c0_89] : memref<104x16xf32, #tpu.memory_space<vmem>>, vector<1x16xf32>
      %c2_90 = arith.constant 2 : index
      %c6_91 = arith.constant 6 : index
      %129 = memref.load %arg1[%c2_90, %c6_91] : memref<8x8xi32, #tpu.memory_space<smem>>
      %130 = arith.index_cast %129 : i32 to index
      %c0_92 = arith.constant 0 : index
      %131 = vector.load %arg3[%130, %c0_92] : memref<104x16xf32, #tpu.memory_space<vmem>>, vector<1x16xf32>
      %c2_93 = arith.constant 2 : index
      %c7_94 = arith.constant 7 : index
      %132 = memref.load %arg1[%c2_93, %c7_94] : memref<8x8xi32, #tpu.memory_space<smem>>
      %133 = arith.index_cast %132 : i32 to index
      %c0_95 = arith.constant 0 : index
      %134 = vector.load %arg3[%133, %c0_95] : memref<104x16xf32, #tpu.memory_space<vmem>>, vector<1x16xf32>
      %135 = arith.addf %113, %116 : vector<1x16xf32>
      %136 = arith.addf %119, %122 : vector<1x16xf32>
      %137 = arith.addf %125, %128 : vector<1x16xf32>
      %138 = arith.addf %131, %134 : vector<1x16xf32>
      %139 = arith.addf %135, %136 : vector<1x16xf32>
      %140 = arith.addf %137, %138 : vector<1x16xf32>
      %141 = arith.addf %139, %140 : vector<1x16xf32>
      %cst_96 = arith.constant 1.250000e-01 : f32
      %142 = vector.broadcast %cst_96 : f32 to vector<1x16xf32>
      %143 = arith.mulf %141, %142 : vector<1x16xf32>
      %c2_97 = arith.constant 2 : index
      %c0_98 = arith.constant 0 : index
      %144 = vector.load %arg7[%c2_97, %c0_98] : memref<8x16xf32, #tpu.memory_space<vmem>>, vector<1x16xf32>
      tpu.vector_store %arg7[%c2_97, %c0_98], %143 {strides = array<i32>} : memref<8x16xf32, #tpu.memory_space<vmem>>, vector<1x16xf32>,
      %c3_99 = arith.constant 3 : index
      %c0_100 = arith.constant 0 : index
      %145 = memref.load %arg1[%c3_99, %c0_100] : memref<8x8xi32, #tpu.memory_space<smem>>
      %146 = arith.index_cast %145 : i32 to index
      %c0_101 = arith.constant 0 : index
      %147 = vector.load %arg3[%146, %c0_101] : memref<104x16xf32, #tpu.memory_space<vmem>>, vector<1x16xf32>
      %c3_102 = arith.constant 3 : index
      %c1_103 = arith.constant 1 : index
      %148 = memref.load %arg1[%c3_102, %c1_103] : memref<8x8xi32, #tpu.memory_space<smem>>
      %149 = arith.index_cast %148 : i32 to index
      %c0_104 = arith.constant 0 : index
      %150 = vector.load %arg3[%149, %c0_104] : memref<104x16xf32, #tpu.memory_space<vmem>>, vector<1x16xf32>
      %c3_105 = arith.constant 3 : index
      %c2_106 = arith.constant 2 : index
      %151 = memref.load %arg1[%c3_105, %c2_106] : memref<8x8xi32, #tpu.memory_space<smem>>
      %152 = arith.index_cast %151 : i32 to index
      %c0_107 = arith.constant 0 : index
      %153 = vector.load %arg3[%152, %c0_107] : memref<104x16xf32, #tpu.memory_space<vmem>>, vector<1x16xf32>
      %c3_108 = arith.constant 3 : index
      %c3_109 = arith.constant 3 : index
      %154 = memref.load %arg1[%c3_108, %c3_109] : memref<8x8xi32, #tpu.memory_space<smem>>
      %155 = arith.index_cast %154 : i32 to index
      %c0_110 = arith.constant 0 : index
      %156 = vector.load %arg3[%155, %c0_110] : memref<104x16xf32, #tpu.memory_space<vmem>>, vector<1x16xf32>
      %c3_111 = arith.constant 3 : index
      %c4_112 = arith.constant 4 : index
      %157 = memref.load %arg1[%c3_111, %c4_112] : memref<8x8xi32, #tpu.memory_space<smem>>
      %158 = arith.index_cast %157 : i32 to index
      %c0_113 = arith.constant 0 : index
      %159 = vector.load %arg3[%158, %c0_113] : memref<104x16xf32, #tpu.memory_space<vmem>>, vector<1x16xf32>
      %c3_114 = arith.constant 3 : index
      %c5_115 = arith.constant 5 : index
      %160 = memref.load %arg1[%c3_114, %c5_115] : memref<8x8xi32, #tpu.memory_space<smem>>
      %161 = arith.index_cast %160 : i32 to index
      %c0_116 = arith.constant 0 : index
      %162 = vector.load %arg3[%161, %c0_116] : memref<104x16xf32, #tpu.memory_space<vmem>>, vector<1x16xf32>
      %c3_117 = arith.constant 3 : index
      %c6_118 = arith.constant 6 : index
      %163 = memref.load %arg1[%c3_117, %c6_118] : memref<8x8xi32, #tpu.memory_space<smem>>
      %164 = arith.index_cast %163 : i32 to index
      %c0_119 = arith.constant 0 : index
      %165 = vector.load %arg3[%164, %c0_119] : memref<104x16xf32, #tpu.memory_space<vmem>>, vector<1x16xf32>
      %c3_120 = arith.constant 3 : index
      %c7_121 = arith.constant 7 : index
      %166 = memref.load %arg1[%c3_120, %c7_121] : memref<8x8xi32, #tpu.memory_space<smem>>
      %167 = arith.index_cast %166 : i32 to index
      %c0_122 = arith.constant 0 : index
      %168 = vector.load %arg3[%167, %c0_122] : memref<104x16xf32, #tpu.memory_space<vmem>>, vector<1x16xf32>
      %169 = arith.addf %147, %150 : vector<1x16xf32>
      %170 = arith.addf %153, %156 : vector<1x16xf32>
      %171 = arith.addf %159, %162 : vector<1x16xf32>
      %172 = arith.addf %165, %168 : vector<1x16xf32>
      %173 = arith.addf %169, %170 : vector<1x16xf32>
      %174 = arith.addf %171, %172 : vector<1x16xf32>
      %175 = arith.addf %173, %174 : vector<1x16xf32>
      %cst_123 = arith.constant 1.250000e-01 : f32
      %176 = vector.broadcast %cst_123 : f32 to vector<1x16xf32>
      %177 = arith.mulf %175, %176 : vector<1x16xf32>
      %c3_124 = arith.constant 3 : index
      %c0_125 = arith.constant 0 : index
      %178 = vector.load %arg7[%c3_124, %c0_125] : memref<8x16xf32, #tpu.memory_space<vmem>>, vector<1x16xf32>
      tpu.vector_store %arg7[%c3_124, %c0_125], %177 {strides = array<i32>} : memref<8x16xf32, #tpu.memory_space<vmem>>, vector<1x16xf32>,
      %c4_126 = arith.constant 4 : index
      %c0_127 = arith.constant 0 : index
      %179 = memref.load %arg1[%c4_126, %c0_127] : memref<8x8xi32, #tpu.memory_space<smem>>
      %180 = arith.index_cast %179 : i32 to index
      %c0_128 = arith.constant 0 : index
      %181 = vector.load %arg3[%180, %c0_128] : memref<104x16xf32, #tpu.memory_space<vmem>>, vector<1x16xf32>
      %c4_129 = arith.constant 4 : index
      %c1_130 = arith.constant 1 : index
      %182 = memref.load %arg1[%c4_129, %c1_130] : memref<8x8xi32, #tpu.memory_space<smem>>
      %183 = arith.index_cast %182 : i32 to index
      %c0_131 = arith.constant 0 : index
      %184 = vector.load %arg3[%183, %c0_131] : memref<104x16xf32, #tpu.memory_space<vmem>>, vector<1x16xf32>
      %c4_132 = arith.constant 4 : index
      %c2_133 = arith.constant 2 : index
      %185 = memref.load %arg1[%c4_132, %c2_133] : memref<8x8xi32, #tpu.memory_space<smem>>
      %186 = arith.index_cast %185 : i32 to index
      %c0_134 = arith.constant 0 : index
      %187 = vector.load %arg3[%186, %c0_134] : memref<104x16xf32, #tpu.memory_space<vmem>>, vector<1x16xf32>
      %c4_135 = arith.constant 4 : index
      %c3_136 = arith.constant 3 : index
      %188 = memref.load %arg1[%c4_135, %c3_136] : memref<8x8xi32, #tpu.memory_space<smem>>
      %189 = arith.index_cast %188 : i32 to index
      %c0_137 = arith.constant 0 : index
      %190 = vector.load %arg3[%189, %c0_137] : memref<104x16xf32, #tpu.memory_space<vmem>>, vector<1x16xf32>
      %c4_138 = arith.constant 4 : index
      %c4_139 = arith.constant 4 : index
      %191 = memref.load %arg1[%c4_138, %c4_139] : memref<8x8xi32, #tpu.memory_space<smem>>
      %192 = arith.index_cast %191 : i32 to index
      %c0_140 = arith.constant 0 : index
      %193 = vector.load %arg3[%192, %c0_140] : memref<104x16xf32, #tpu.memory_space<vmem>>, vector<1x16xf32>
      %c4_141 = arith.constant 4 : index
      %c5_142 = arith.constant 5 : index
      %194 = memref.load %arg1[%c4_141, %c5_142] : memref<8x8xi32, #tpu.memory_space<smem>>
      %195 = arith.index_cast %194 : i32 to index
      %c0_143 = arith.constant 0 : index
      %196 = vector.load %arg3[%195, %c0_143] : memref<104x16xf32, #tpu.memory_space<vmem>>, vector<1x16xf32>
      %c4_144 = arith.constant 4 : index
      %c6_145 = arith.constant 6 : index
      %197 = memref.load %arg1[%c4_144, %c6_145] : memref<8x8xi32, #tpu.memory_space<smem>>
      %198 = arith.index_cast %197 : i32 to index
      %c0_146 = arith.constant 0 : index
      %199 = vector.load %arg3[%198, %c0_146] : memref<104x16xf32, #tpu.memory_space<vmem>>, vector<1x16xf32>
      %c4_147 = arith.constant 4 : index
      %c7_148 = arith.constant 7 : index
      %200 = memref.load %arg1[%c4_147, %c7_148] : memref<8x8xi32, #tpu.memory_space<smem>>
      %201 = arith.index_cast %200 : i32 to index
      %c0_149 = arith.constant 0 : index
      %202 = vector.load %arg3[%201, %c0_149] : memref<104x16xf32, #tpu.memory_space<vmem>>, vector<1x16xf32>
      %203 = arith.addf %181, %184 : vector<1x16xf32>
      %204 = arith.addf %187, %190 : vector<1x16xf32>
      %205 = arith.addf %193, %196 : vector<1x16xf32>
      %206 = arith.addf %199, %202 : vector<1x16xf32>
      %207 = arith.addf %203, %204 : vector<1x16xf32>
      %208 = arith.addf %205, %206 : vector<1x16xf32>
      %209 = arith.addf %207, %208 : vector<1x16xf32>
      %cst_150 = arith.constant 1.250000e-01 : f32
      %210 = vector.broadcast %cst_150 : f32 to vector<1x16xf32>
      %211 = arith.mulf %209, %210 : vector<1x16xf32>
      %c4_151 = arith.constant 4 : index
      %c0_152 = arith.constant 0 : index
      %212 = vector.load %arg7[%c4_151, %c0_152] : memref<8x16xf32, #tpu.memory_space<vmem>>, vector<1x16xf32>
      tpu.vector_store %arg7[%c4_151, %c0_152], %211 {strides = array<i32>} : memref<8x16xf32, #tpu.memory_space<vmem>>, vector<1x16xf32>,
      %c5_153 = arith.constant 5 : index
      %c0_154 = arith.constant 0 : index
      %213 = memref.load %arg1[%c5_153, %c0_154] : memref<8x8xi32, #tpu.memory_space<smem>>
      %214 = arith.index_cast %213 : i32 to index
      %c0_155 = arith.constant 0 : index
      %215 = vector.load %arg3[%214, %c0_155] : memref<104x16xf32, #tpu.memory_space<vmem>>, vector<1x16xf32>
      %c5_156 = arith.constant 5 : index
      %c1_157 = arith.constant 1 : index
      %216 = memref.load %arg1[%c5_156, %c1_157] : memref<8x8xi32, #tpu.memory_space<smem>>
      %217 = arith.index_cast %216 : i32 to index
      %c0_158 = arith.constant 0 : index
      %218 = vector.load %arg3[%217, %c0_158] : memref<104x16xf32, #tpu.memory_space<vmem>>, vector<1x16xf32>
      %c5_159 = arith.constant 5 : index
      %c2_160 = arith.constant 2 : index
      %219 = memref.load %arg1[%c5_159, %c2_160] : memref<8x8xi32, #tpu.memory_space<smem>>
      %220 = arith.index_cast %219 : i32 to index
      %c0_161 = arith.constant 0 : index
      %221 = vector.load %arg3[%220, %c0_161] : memref<104x16xf32, #tpu.memory_space<vmem>>, vector<1x16xf32>
      %c5_162 = arith.constant 5 : index
      %c3_163 = arith.constant 3 : index
      %222 = memref.load %arg1[%c5_162, %c3_163] : memref<8x8xi32, #tpu.memory_space<smem>>
      %223 = arith.index_cast %222 : i32 to index
      %c0_164 = arith.constant 0 : index
      %224 = vector.load %arg3[%223, %c0_164] : memref<104x16xf32, #tpu.memory_space<vmem>>, vector<1x16xf32>
      %c5_165 = arith.constant 5 : index
      %c4_166 = arith.constant 4 : index
      %225 = memref.load %arg1[%c5_165, %c4_166] : memref<8x8xi32, #tpu.memory_space<smem>>
      %226 = arith.index_cast %225 : i32 to index
      %c0_167 = arith.constant 0 : index
      %227 = vector.load %arg3[%226, %c0_167] : memref<104x16xf32, #tpu.memory_space<vmem>>, vector<1x16xf32>
      %c5_168 = arith.constant 5 : index
      %c5_169 = arith.constant 5 : index
      %228 = memref.load %arg1[%c5_168, %c5_169] : memref<8x8xi32, #tpu.memory_space<smem>>
      %229 = arith.index_cast %228 : i32 to index
      %c0_170 = arith.constant 0 : index
      %230 = vector.load %arg3[%229, %c0_170] : memref<104x16xf32, #tpu.memory_space<vmem>>, vector<1x16xf32>
      %c5_171 = arith.constant 5 : index
      %c6_172 = arith.constant 6 : index
      %231 = memref.load %arg1[%c5_171, %c6_172] : memref<8x8xi32, #tpu.memory_space<smem>>
      %232 = arith.index_cast %231 : i32 to index
      %c0_173 = arith.constant 0 : index
      %233 = vector.load %arg3[%232, %c0_173] : memref<104x16xf32, #tpu.memory_space<vmem>>, vector<1x16xf32>
      %c5_174 = arith.constant 5 : index
      %c7_175 = arith.constant 7 : index
      %234 = memref.load %arg1[%c5_174, %c7_175] : memref<8x8xi32, #tpu.memory_space<smem>>
      %235 = arith.index_cast %234 : i32 to index
      %c0_176 = arith.constant 0 : index
      %236 = vector.load %arg3[%235, %c0_176] : memref<104x16xf32, #tpu.memory_space<vmem>>, vector<1x16xf32>
      %237 = arith.addf %215, %218 : vector<1x16xf32>
      %238 = arith.addf %221, %224 : vector<1x16xf32>
      %239 = arith.addf %227, %230 : vector<1x16xf32>
      %240 = arith.addf %233, %236 : vector<1x16xf32>
      %241 = arith.addf %237, %238 : vector<1x16xf32>
      %242 = arith.addf %239, %240 : vector<1x16xf32>
      %243 = arith.addf %241, %242 : vector<1x16xf32>
      %cst_177 = arith.constant 1.250000e-01 : f32
      %244 = vector.broadcast %cst_177 : f32 to vector<1x16xf32>
      %245 = arith.mulf %243, %244 : vector<1x16xf32>
      %c5_178 = arith.constant 5 : index
      %c0_179 = arith.constant 0 : index
      %246 = vector.load %arg7[%c5_178, %c0_179] : memref<8x16xf32, #tpu.memory_space<vmem>>, vector<1x16xf32>
      tpu.vector_store %arg7[%c5_178, %c0_179], %245 {strides = array<i32>} : memref<8x16xf32, #tpu.memory_space<vmem>>, vector<1x16xf32>,
      %c6_180 = arith.constant 6 : index
      %c0_181 = arith.constant 0 : index
      %247 = memref.load %arg1[%c6_180, %c0_181] : memref<8x8xi32, #tpu.memory_space<smem>>
      %248 = arith.index_cast %247 : i32 to index
      %c0_182 = arith.constant 0 : index
      %249 = vector.load %arg3[%248, %c0_182] : memref<104x16xf32, #tpu.memory_space<vmem>>, vector<1x16xf32>
      %c6_183 = arith.constant 6 : index
      %c1_184 = arith.constant 1 : index
      %250 = memref.load %arg1[%c6_183, %c1_184] : memref<8x8xi32, #tpu.memory_space<smem>>
      %251 = arith.index_cast %250 : i32 to index
      %c0_185 = arith.constant 0 : index
      %252 = vector.load %arg3[%251, %c0_185] : memref<104x16xf32, #tpu.memory_space<vmem>>, vector<1x16xf32>
      %c6_186 = arith.constant 6 : index
      %c2_187 = arith.constant 2 : index
      %253 = memref.load %arg1[%c6_186, %c2_187] : memref<8x8xi32, #tpu.memory_space<smem>>
      %254 = arith.index_cast %253 : i32 to index
      %c0_188 = arith.constant 0 : index
      %255 = vector.load %arg3[%254, %c0_188] : memref<104x16xf32, #tpu.memory_space<vmem>>, vector<1x16xf32>
      %c6_189 = arith.constant 6 : index
      %c3_190 = arith.constant 3 : index
      %256 = memref.load %arg1[%c6_189, %c3_190] : memref<8x8xi32, #tpu.memory_space<smem>>
      %257 = arith.index_cast %256 : i32 to index
      %c0_191 = arith.constant 0 : index
      %258 = vector.load %arg3[%257, %c0_191] : memref<104x16xf32, #tpu.memory_space<vmem>>, vector<1x16xf32>
      %c6_192 = arith.constant 6 : index
      %c4_193 = arith.constant 4 : index
      %259 = memref.load %arg1[%c6_192, %c4_193] : memref<8x8xi32, #tpu.memory_space<smem>>
      %260 = arith.index_cast %259 : i32 to index
      %c0_194 = arith.constant 0 : index
      %261 = vector.load %arg3[%260, %c0_194] : memref<104x16xf32, #tpu.memory_space<vmem>>, vector<1x16xf32>
      %c6_195 = arith.constant 6 : index
      %c5_196 = arith.constant 5 : index
      %262 = memref.load %arg1[%c6_195, %c5_196] : memref<8x8xi32, #tpu.memory_space<smem>>
      %263 = arith.index_cast %262 : i32 to index
      %c0_197 = arith.constant 0 : index
      %264 = vector.load %arg3[%263, %c0_197] : memref<104x16xf32, #tpu.memory_space<vmem>>, vector<1x16xf32>
      %c6_198 = arith.constant 6 : index
      %c6_199 = arith.constant 6 : index
      %265 = memref.load %arg1[%c6_198, %c6_199] : memref<8x8xi32, #tpu.memory_space<smem>>
      %266 = arith.index_cast %265 : i32 to index
      %c0_200 = arith.constant 0 : index
      %267 = vector.load %arg3[%266, %c0_200] : memref<104x16xf32, #tpu.memory_space<vmem>>, vector<1x16xf32>
      %c6_201 = arith.constant 6 : index
      %c7_202 = arith.constant 7 : index
      %268 = memref.load %arg1[%c6_201, %c7_202] : memref<8x8xi32, #tpu.memory_space<smem>>
      %269 = arith.index_cast %268 : i32 to index
      %c0_203 = arith.constant 0 : index
      %270 = vector.load %arg3[%269, %c0_203] : memref<104x16xf32, #tpu.memory_space<vmem>>, vector<1x16xf32>
      %271 = arith.addf %249, %252 : vector<1x16xf32>
      %272 = arith.addf %255, %258 : vector<1x16xf32>
      %273 = arith.addf %261, %264 : vector<1x16xf32>
      %274 = arith.addf %267, %270 : vector<1x16xf32>
      %275 = arith.addf %271, %272 : vector<1x16xf32>
      %276 = arith.addf %273, %274 : vector<1x16xf32>
      %277 = arith.addf %275, %276 : vector<1x16xf32>
      %cst_204 = arith.constant 1.250000e-01 : f32
      %278 = vector.broadcast %cst_204 : f32 to vector<1x16xf32>
      %279 = arith.mulf %277, %278 : vector<1x16xf32>
      %c6_205 = arith.constant 6 : index
      %c0_206 = arith.constant 0 : index
      %280 = vector.load %arg7[%c6_205, %c0_206] : memref<8x16xf32, #tpu.memory_space<vmem>>, vector<1x16xf32>
      tpu.vector_store %arg7[%c6_205, %c0_206], %279 {strides = array<i32>} : memref<8x16xf32, #tpu.memory_space<vmem>>, vector<1x16xf32>,
      %c7_207 = arith.constant 7 : index
      %c0_208 = arith.constant 0 : index
      %281 = memref.load %arg1[%c7_207, %c0_208] : memref<8x8xi32, #tpu.memory_space<smem>>
      %282 = arith.index_cast %281 : i32 to index
      %c0_209 = arith.constant 0 : index
      %283 = vector.load %arg3[%282, %c0_209] : memref<104x16xf32, #tpu.memory_space<vmem>>, vector<1x16xf32>
      %c7_210 = arith.constant 7 : index
      %c1_211 = arith.constant 1 : index
      %284 = memref.load %arg1[%c7_210, %c1_211] : memref<8x8xi32, #tpu.memory_space<smem>>
      %285 = arith.index_cast %284 : i32 to index
      %c0_212 = arith.constant 0 : index
      %286 = vector.load %arg3[%285, %c0_212] : memref<104x16xf32, #tpu.memory_space<vmem>>, vector<1x16xf32>
      %c7_213 = arith.constant 7 : index
      %c2_214 = arith.constant 2 : index
      %287 = memref.load %arg1[%c7_213, %c2_214] : memref<8x8xi32, #tpu.memory_space<smem>>
      %288 = arith.index_cast %287 : i32 to index
      %c0_215 = arith.constant 0 : index
      %289 = vector.load %arg3[%288, %c0_215] : memref<104x16xf32, #tpu.memory_space<vmem>>, vector<1x16xf32>
      %c7_216 = arith.constant 7 : index
      %c3_217 = arith.constant 3 : index
      %290 = memref.load %arg1[%c7_216, %c3_217] : memref<8x8xi32, #tpu.memory_space<smem>>
      %291 = arith.index_cast %290 : i32 to index
      %c0_218 = arith.constant 0 : index
      %292 = vector.load %arg3[%291, %c0_218] : memref<104x16xf32, #tpu.memory_space<vmem>>, vector<1x16xf32>
      %c7_219 = arith.constant 7 : index
      %c4_220 = arith.constant 4 : index
      %293 = memref.load %arg1[%c7_219, %c4_220] : memref<8x8xi32, #tpu.memory_space<smem>>
      %294 = arith.index_cast %293 : i32 to index
      %c0_221 = arith.constant 0 : index
      %295 = vector.load %arg3[%294, %c0_221] : memref<104x16xf32, #tpu.memory_space<vmem>>, vector<1x16xf32>
      %c7_222 = arith.constant 7 : index
      %c5_223 = arith.constant 5 : index
      %296 = memref.load %arg1[%c7_222, %c5_223] : memref<8x8xi32, #tpu.memory_space<smem>>
      %297 = arith.index_cast %296 : i32 to index
      %c0_224 = arith.constant 0 : index
      %298 = vector.load %arg3[%297, %c0_224] : memref<104x16xf32, #tpu.memory_space<vmem>>, vector<1x16xf32>
      %c7_225 = arith.constant 7 : index
      %c6_226 = arith.constant 6 : index
      %299 = memref.load %arg1[%c7_225, %c6_226] : memref<8x8xi32, #tpu.memory_space<smem>>
      %300 = arith.index_cast %299 : i32 to index
      %c0_227 = arith.constant 0 : index
      %301 = vector.load %arg3[%300, %c0_227] : memref<104x16xf32, #tpu.memory_space<vmem>>, vector<1x16xf32>
      %c7_228 = arith.constant 7 : index
      %c7_229 = arith.constant 7 : index
      %302 = memref.load %arg1[%c7_228, %c7_229] : memref<8x8xi32, #tpu.memory_space<smem>>
      %303 = arith.index_cast %302 : i32 to index
      %c0_230 = arith.constant 0 : index
      %304 = vector.load %arg3[%303, %c0_230] : memref<104x16xf32, #tpu.memory_space<vmem>>, vector<1x16xf32>
      %305 = arith.addf %283, %286 : vector<1x16xf32>
      %306 = arith.addf %289, %292 : vector<1x16xf32>
      %307 = arith.addf %295, %298 : vector<1x16xf32>
      %308 = arith.addf %301, %304 : vector<1x16xf32>
      %309 = arith.addf %305, %306 : vector<1x16xf32>
      %310 = arith.addf %307, %308 : vector<1x16xf32>
      %311 = arith.addf %309, %310 : vector<1x16xf32>
      %cst_231 = arith.constant 1.250000e-01 : f32
      %312 = vector.broadcast %cst_231 : f32 to vector<1x16xf32>
      %313 = arith.mulf %311, %312 : vector<1x16xf32>
      %c7_232 = arith.constant 7 : index
      %c0_233 = arith.constant 0 : index
      %314 = vector.load %arg7[%c7_232, %c0_233] : memref<8x16xf32, #tpu.memory_space<vmem>>, vector<1x16xf32>
      tpu.vector_store %arg7[%c7_232, %c0_233], %313 {strides = array<i32>} : memref<8x16xf32, #tpu.memory_space<vmem>>, vector<1x16xf32>,
      %cst_234 = arith.constant -1.000000e+30 : f32
      %315 = vector.broadcast %cst_234 : f32 to vector<8x1xf32>
      %c0_235 = arith.constant 0 : index
      %c0_236 = arith.constant 0 : index
      %316 = vector.load %arg8[%c0_235, %c0_236] : memref<8x1xf32, #tpu.memory_space<vmem>>, vector<8x1xf32>
      tpu.vector_store %arg8[%c0_235, %c0_236], %315 {strides = array<i32>} : memref<8x1xf32, #tpu.memory_space<vmem>>, vector<8x1xf32>,
      %cst_237 = arith.constant 0.000000e+00 : f32
      %317 = vector.broadcast %cst_237 : f32 to vector<8x1xf32>
      %c0_238 = arith.constant 0 : index
      %c0_239 = arith.constant 0 : index
      %318 = vector.load %arg9[%c0_238, %c0_239] : memref<8x1xf32, #tpu.memory_space<vmem>>, vector<8x1xf32>
      tpu.vector_store %arg9[%c0_238, %c0_239], %317 {strides = array<i32>} : memref<8x1xf32, #tpu.memory_space<vmem>>, vector<8x1xf32>,
      %cst_240 = arith.constant 0.000000e+00 : f32
      %319 = vector.broadcast %cst_240 : f32 to vector<8x1xf32>
      %c0_241 = arith.constant 0 : index
      %c0_242 = arith.constant 0 : index
      %320 = vector.load %arg10[%c0_241, %c0_242] : memref<8x1xf32, #tpu.memory_space<vmem>>, vector<8x1xf32>
      tpu.vector_store %arg10[%c0_241, %c0_242], %319 {strides = array<i32>} : memref<8x1xf32, #tpu.memory_space<vmem>>, vector<8x1xf32>,
    } else {
    }
    %c0 = arith.constant 0 : index
    %c0_1 = arith.constant 0 : index
    %3 = vector.load %arg7[%c0, %c0_1] : memref<8x16xf32, #tpu.memory_space<vmem>>, vector<8x16xf32>
    %c0_2 = arith.constant 0 : index
    %c0_3 = arith.constant 0 : index
    %4 = vector.load %arg4[%c0_2, %c0_3] : memref<16x10112xf32, #tpu.memory_space<vmem>>, vector<16x10112xf32>
    %cst = arith.constant dense<0.000000e+00> : vector<8x10112xf32>
    %5 = tpu.matmul %3, %4, %cst {dimension_numbers = #tpu.dot_dimension_numbers<[1], [0], [0], [1], [0, 0, 1, 1], [], []>} : vector<8x16xf32>, vector<16x10112xf32>, vector<8x10112xf32> -> vector<8x10112xf32>
    %c0_4 = arith.constant 0 : index
    %c0_5 = arith.constant 0 : index
    %6 = vector.load %arg5[%c0_4, %c0_5] : memref<1x10112xf32, #tpu.memory_space<vmem>>, vector<1x10112xf32>
    %7 = vector.broadcast %6 : vector<1x10112xf32> to vector<8x10112xf32>
    %8 = arith.addf %5, %7 : vector<8x10112xf32>
    %c0_6 = arith.constant 0 : index
    %c0_7 = arith.constant 0 : index
    %9 = vector.load %arg8[%c0_6, %c0_7] : memref<8x1xf32, #tpu.memory_space<vmem>>, vector<8x1xf32>
    %cst_8 = arith.constant dense<0xFF800000> : vector<8xf32>
    %10 = vector.multi_reduction <maximumf>, %8, %cst_8 [1] : vector<8x10112xf32> to vector<8xf32>
    %11 = vector.shape_cast %10 : vector<8xf32> to vector<8x1xf32>
    %12 = arith.maximumf %9, %11 : vector<8x1xf32>
    %13 = arith.subf %9, %12 : vector<8x1xf32>
    %14 = math.exp %13 : vector<8x1xf32>
    %c0_9 = arith.constant 0 : index
    %c0_10 = arith.constant 0 : index
    %15 = vector.load %arg9[%c0_9, %c0_10] : memref<8x1xf32, #tpu.memory_space<vmem>>, vector<8x1xf32>
    %16 = arith.mulf %15, %14 : vector<8x1xf32>
    %17 = vector.broadcast %12 : vector<8x1xf32> to vector<8x10112xf32>
    %18 = arith.subf %8, %17 : vector<8x10112xf32>
    %19 = math.exp %18 : vector<8x10112xf32>
    %cst_11 = arith.constant dense<0.000000e+00> : vector<8xf32>
    %20 = vector.multi_reduction <add>, %19, %cst_11 [1] : vector<8x10112xf32> to vector<8xf32>
    %21 = vector.shape_cast %20 : vector<8xf32> to vector<8x1xf32>
    %22 = arith.addf %16, %21 : vector<8x1xf32>
    %c0_12 = arith.constant 0 : index
    %c0_13 = arith.constant 0 : index
    %23 = vector.load %arg9[%c0_12, %c0_13] : memref<8x1xf32, #tpu.memory_space<vmem>>, vector<8x1xf32>
    tpu.vector_store %arg9[%c0_12, %c0_13], %22 {strides = array<i32>} : memref<8x1xf32, #tpu.memory_space<vmem>>, vector<8x1xf32>,
    %c0_14 = arith.constant 0 : index
    %c0_15 = arith.constant 0 : index
    %24 = vector.load %arg8[%c0_14, %c0_15] : memref<8x1xf32, #tpu.memory_space<vmem>>, vector<8x1xf32>
    tpu.vector_store %arg8[%c0_14, %c0_15], %12 {strides = array<i32>} : memref<8x1xf32, #tpu.memory_space<vmem>>, vector<8x1xf32>,
    %25 = tpu.iota {dimensions = array<i32: 1>} : vector<8x10112xi32>
    %c0_16 = arith.constant 0 : index
    %c0_17 = arith.constant 0 : index
    %26 = vector.load %arg2[%c0_16, %c0_17] : memref<8x1xi32, #tpu.memory_space<vmem>>, vector<8x1xi32>
    %c10112_i32 = arith.constant 10112 : i32
    %27 = arith.muli %arg0, %c10112_i32 : i32
    %28 = vector.broadcast %27 : i32 to vector<8x1xi32>
    %29 = arith.subi %26, %28 : vector<8x1xi32>
    %30 = vector.broadcast %29 : vector<8x1xi32> to vector<8x10112xi32>
    %31 = arith.cmpi eq, %25, %30 : vector<8x10112xi32>
    %32 = arith.extui %31 : vector<8x10112xi1> to vector<8x10112xi32>
    %33 = arith.sitofp %32 : vector<8x10112xi32> to vector<8x10112xf32>
    %c0_18 = arith.constant 0 : index
    %c0_19 = arith.constant 0 : index
    %34 = vector.load %arg10[%c0_18, %c0_19] : memref<8x1xf32, #tpu.memory_space<vmem>>, vector<8x1xf32>
    %35 = arith.mulf %8, %33 : vector<8x10112xf32>
    %cst_20 = arith.constant dense<0.000000e+00> : vector<8xf32>
    %36 = vector.multi_reduction <add>, %35, %cst_20 [1] : vector<8x10112xf32> to vector<8xf32>
    %37 = vector.shape_cast %36 : vector<8xf32> to vector<8x1xf32>
    %38 = arith.addf %34, %37 : vector<8x1xf32>
    %c0_21 = arith.constant 0 : index
    %c0_22 = arith.constant 0 : index
    %39 = vector.load %arg10[%c0_21, %c0_22] : memref<8x1xf32, #tpu.memory_space<vmem>>, vector<8x1xf32>
    tpu.vector_store %arg10[%c0_21, %c0_22], %38 {strides = array<i32>} : memref<8x1xf32, #tpu.memory_space<vmem>>, vector<8x1xf32>,
    %c0_i32_23 = arith.constant 0 : i32
    %40 = arith.cmpi eq, %arg0, %c0_i32_23 : i32
    %41 = arith.extui %40 : i1 to i32
    %c0_i32_24 = arith.constant 0 : i32
    %42 = arith.cmpi ne, %41, %c0_i32_24 : i32
    scf.if %42 {
      %c0_25 = arith.constant 0 : index
      %c0_26 = arith.constant 0 : index
      %43 = vector.load %arg8[%c0_25, %c0_26] : memref<8x1xf32, #tpu.memory_space<vmem>>, vector<8x1xf32>
      %c0_27 = arith.constant 0 : index
      %c0_28 = arith.constant 0 : index
      %44 = vector.load %arg9[%c0_27, %c0_28] : memref<8x1xf32, #tpu.memory_space<vmem>>, vector<8x1xf32>
      %45 = math.log %44 : vector<8x1xf32>
      %46 = arith.addf %43, %45 : vector<8x1xf32>
      %c0_29 = arith.constant 0 : index
      %c0_30 = arith.constant 0 : index
      %47 = vector.load %arg10[%c0_29, %c0_30] : memref<8x1xf32, #tpu.memory_space<vmem>>, vector<8x1xf32>
      %48 = arith.subf %46, %47 : vector<8x1xf32>
      %49 = vector.shape_cast %48 : vector<8x1xf32> to vector<1x8x1xf32>
      %cst_31 = arith.constant dense<0.000000e+00> : vector<1xf32>
      %50 = vector.multi_reduction <add>, %49, %cst_31 [1, 2] : vector<1x8x1xf32> to vector<1xf32>
      %51 = vector.shape_cast %50 : vector<1xf32> to vector<1x1x1xf32>
      %52 = vector.extract %51[0, 0, 0] : f32 from vector<1x1x1xf32>
      %cst_32 = arith.constant 1.250000e-01 : f32
      %53 = arith.mulf %52, %cst_32 : f32
      %c0_33 = arith.constant 0 : index
      %c0_34 = arith.constant 0 : index
      %54 = memref.load %arg6[%c0_33, %c0_34] : memref<1x1xf32, #tpu.memory_space<smem>>
      memref.store %53, %arg6[%c0_33, %c0_34] : memref<1x1xf32, #tpu.memory_space<smem>>
    } else {
    }
    return
  }
  func.func @transform_0(%arg0: i32, %arg1: memref<8x8xi32, #tpu.memory_space<smem>>) -> (i32, i32) {
    %c0_i32 = arith.constant 0 : i32
    %c0_i32_0 = arith.constant 0 : i32
    %c0_i32_1 = arith.constant 0 : i32
    return %c0_i32, %c0_i32_0 : i32, i32
  }
  func.func @transform_1(%arg0: i32, %arg1: memref<8x8xi32, #tpu.memory_space<smem>>) -> (i32, i32) {
    %c0_i32 = arith.constant 0 : i32
    %c0_i32_0 = arith.constant 0 : i32
    %c0_i32_1 = arith.constant 0 : i32
    return %c0_i32, %c0_i32_0 : i32, i32
  }
  func.func @transform_2(%arg0: i32, %arg1: memref<8x8xi32, #tpu.memory_space<smem>>) -> (i32, i32) {
    %c0_i32 = arith.constant 0 : i32
    %c0_i32_0 = arith.constant 0 : i32
    return %c0_i32, %arg0 : i32, i32
  }
  func.func @transform_3(%arg0: i32, %arg1: memref<8x8xi32, #tpu.memory_space<smem>>) -> (i32, i32) {
    %c0_i32 = arith.constant 0 : i32
    %c0_i32_0 = arith.constant 0 : i32
    return %c0_i32, %arg0 : i32, i32
  }
  func.func @transform_4(%arg0: i32, %arg1: memref<8x8xi32, #tpu.memory_space<smem>>) -> (i32, i32) {
    %c0_i32 = arith.constant 0 : i32
    %c0_i32_0 = arith.constant 0 : i32
    %c0_i32_1 = arith.constant 0 : i32
    return %c0_i32, %c0_i32_0 : i32, i32
  }
}

</mosaic_0001>

<bundles_post_ra>
// kernel: lm_loss.1
= control target key start
LH: loop header
LB: loop body
LE: loop exit
PB: predicated region body
PF: predicated region fallthrough
CT: control target
= control target key end

     0   :  { %s7211_s0 = inlined_call_operand.vmem [shape: s32[8,8], index: 0, kind: input, shape index: {}]   ;;  %s7212_s1 = inlined_call_operand.vmem [shape: s32[8,1], index: 1, kind: input, shape index: {}]   ;;  %s7213_s2 = inlined_call_operand.vmem [shape: f32[104,16], index: 2, kind: input, shape index: {}]   ;;  %s7214_s3 = inlined_call_operand.hbm [shape: f32[16,10112], index: 3, kind: input, shape index: {}]   ;;  %s7215_s4 = inlined_call_operand.vmem [shape: f32[1,10112], index: 4, kind: input, shape index: {}]   ;;  %s7216_s5 = inlined_call_operand.hbm [shape: f32[1,1], index: 5, kind: output, shape index: {}]  }
   0x1   :  { %s10_s20 = sshll.u32 %s7211_s0, 4  ;;  %s11_s20 = int_to_ptr.vmem [resolvable:$true] %s10_s20 }
   0x2   :  { %s5256_s21 = scalar_lea.vmem %s11_s20, 128  ;;  %p5261_p1 = scmp.lt.s32.totalorder %s11_s20, %s11_s20 }
   0x3   :  { %p5257_p0 = scmp.ne.s32.totalorder %s11_s20, %s5256_s21  ;;  %p5262_p2 = scmp.lt.s32.totalorder %s5256_s21, %s5256_s21 }
   0x5   :  { %p5263_p3 = por %p5262_p2, %p5261_p1 }
   0x7   :  { %p5264_p4 = pnand %p5263_p3, %p5257_p0 }
   0x9   :  { %5267 = shalt.err (!%p5264_p4)  }
   0xa   :  { %s5306_s22 = smov [#allocation7]  }
   0xb   :  { %13 = dma.vmem_to_smem %s11_s20, 128, %s5306_s22, [#allocation6] }
   0xc   :  { %5300 = dma.done.wait [#allocation6], 128 }
   0xd   :  { %5301 = vsyncadd [#allocation6], 4294967168 }
   0xe   :  { %15 = sfence }
   0xf   :  { %16 = vsyncpa [#allocation9], 0 }
  0x10   :  { %17 = vsyncpa [#allocation10], 0  ;;  %s5307_s23 = smov [#allocation8]   ;;  %s5268_s26 = scalar_lea.hbm %s7214_s3, 20224 }
  0x11   :  { %s27_s24 = sshll.u32 %s5307_s23, 4  ;;  %p5269_p5 = scmp.ne.s32.totalorder %s7214_s3, %s5268_s26  ;;  %s28_s24 = int_to_ptr.vmem [resolvable:$true] %s27_s24 }
  0x12   :  { %p5272_p6 = scmp.lt.u32.totalorder %s5268_s26, %s7214_s3 }
  0x14   :  { %p5274_p7 = pnand %p5272_p6, %p5269_p5 }
  0x16   :  { %5277 = shalt.err (!%p5274_p7)
}
  0x17   :  { %s5278_s6 = scalar_lea.vmem %s28_s24, 20224  ;;  %p5283_p9 = scmp.lt.s32.totalorder %s28_s24, %s28_s24 }
  0x18   :  { %p5279_p8 = scmp.ne.s32.totalorder %s28_s24, %s5278_s6  ;;  %p5284_p10 = scmp.lt.s32.totalorder %s5278_s6, %s5278_s6 }
  0x1a   :  { %p5285_p11 = por %p5284_p10, %p5283_p9 }
  0x1c   :  { %p5286_p12 = pnand %p5285_p11, %p5279_p8 }
  0x1e   :  { %5289 = shalt.err (!%p5286_p12)
}
  0x1f   :  { %s5308_s7 = smov 10112   ;;  %s5309_s8 = smov 632  }
  0x20   :  { %33 = dma.hbm_to_vmem [thread:$0]  %s7214_s3, 20224, %s28_s24, [#allocation9], %s5308_s7, %s5308_s7, %s5309_s8  }
  0x21   :  { %5302 = dma.done.wait [#allocation9], 20224  }
  0x22   :  { %5303 = vsyncadd [#allocation9], 4294947072  ;;  %v7218_v0 = vmov 0.0   ;;  %s5363_s11 = sld [smem:[#allocation7]]  ;;  %s5365_s12 = sld [smem:[#allocation7 + $0x1]]  ;;  %v314_v1 = vld [vmem:[#allocation8 + $0x8] sm:$0xff] }
  0x23   :  { %954 = vmatprep.mubr.f32.mxu0 %v7218_v0  ;;  %1025 = vmatprep.mubr.f32.mxu1 %v7218_v0  ;;  %s5367_s13 = sld [smem:[#allocation7 + $0x2]]  ;;  %s5369_s14 = sld [smem:[#allocation7 + $0x3]]  ;;  %v393_v2 = vld [vmem:[#allocation8 + $0x280] sm:$0xff]  ;;  %v392_v5 = vld [vmem:[#allocation8 + $0x278] sm:$0xff]  ;;  %v395_v7 = vld [vmem:[#allocation8 + $0x290] sm:$0xff]  ;;  %vm75_vm0 = vcmask 122880  }
  0x24   :  { %s5371_s15 = sld [smem:[#allocation7 + $0x4]]  ;;  %s5373_s3 = sld [smem:[#allocation7 + $0x5]]  ;;  %v313_v3 = vld [vmem:[#allocation8] sm:$0xff]  ;;  %v4921_v4 = vpack.c.bf16 %v393_v2, %v314_v1  ;;  %v316_v6 = vld [vmem:[#allocation8 + $0x18] sm:$0xff]  ;;  %v315_v10 = vld [vmem:[#allocation8 + $0x10] sm:$0xff]  ;;  %vm886_vm1 = vcmask 130048  }
  0x25   :  { %s5375_s16 = sld [smem:[#allocation7 + $0x6]]  ;;  %s5377_s17 = sld [smem:[#allocation7 + $0x7]]  ;;  %v4923_v8 = vpack.c.bf16 %v392_v5, %v313_v3  ;;  %v4925_v9 = vpack.c.bf16 %v395_v7, %v316_v6  ;;  %v394_v11 = vld [vmem:[#allocation8 + $0x288] sm:$0xff]  ;;  %v397_v14 = vld [vmem:[#allocation8 + $0x2a0] sm:$0xff]  ;;  %v320_v34 = vld [vmem:[#allocation8 + $0x38] sm:$0xff]  ;;  %vm5313_vm2 = vmmov 0  }
  0x26   :  { %s5379_s18 = sld [smem:[#allocation7 + $0x80]]  ;;  %s5381_s19 = sld [smem:[#allocation7 + $0x81]]  ;;  %v318_v12 = vld [vmem:[#allocation8 + $0x28] sm:$0xff]  ;;  %4922 = vmatprep.subr.bf16.mxu0 %v4921_v4  ;;  %v4927_v13 = vpack.c.bf16 %v394_v11, %v315_v10  ;;  %v399_v35 = vld [vmem:[#allocation8 + $0x2b0] sm:$0xff]  ;;  %vm308_vm3 = vcmask 7168  }
  0x27   :  { %s5383_s20 = sld [smem:[#allocation7 + $0x82]]  ;;  %s5385_s21 = sld [smem:[#allocation7 + $0x83]]  ;;  %4924 = vmatpush1.bf16.msra.mxu0 %v4923_v8  ;;  %4926 = vmatprep.subr.bf16.mxu1 %v4925_v9  ;;  %v4929_v17 = vpack.c.bf16 %v397_v14, %v318_v12  ;;  %v4933_v37 = vpack.c.bf16 %v399_v35, %v320_v34 }
  0x28   :  { %s44_s24 = scalar_lea.vmem %s7213_s2, %s5363_s11  ;;  %s47_s26 = scalar_lea.vmem %s7213_s2, %s5365_s12  ;;  %4928 = vmatpush1.bf16.msra.mxu1 %v4927_v13 }
  0x29   :  { %s50_s29 = scalar_lea.vmem %s7213_s2, %s5367_s13  ;;  %s53_s7 = scalar_lea.vmem %s7213_s2, %s5369_s14  ;;  %v45_v15 = vld [vmem:[%s44_s24] sm:$0x1]  ;;  %4930 = vmatprep.subr.bf16.mxu0 %v4929_v17  ;;  %4934 = vmatprep.subr.bf16.mxu1 %v4933_v37 }
  0x2a   :  { %s56_s10 = scalar_lea.vmem %s7213_s2, %s5371_s15  ;;  %s59_s22 = scalar_lea.vmem %s7213_s2, %s5373_s3  ;;  %v48_v16 = vld [vmem:[%s47_s26] sm:$0x1] }
  0x2b   :  { %s62_s23 = scalar_lea.vmem %s7213_s2, %s5375_s16  ;;  %s65_s15 = scalar_lea.vmem %s7213_s2, %s5377_s17  ;;  %v51_v18 = vld [vmem:[%s50_s29] sm:$0x1]  ;;  %v67_v21 = vadd.f32 %v48_v16, %v45_v15  ;;  %v5311_v15 = vmov 0  }
  0x2c   :  { %v54_v19 = vld [vmem:[%s53_s7] sm:$0x1]  ;;  %s78_s26 = scalar_lea.vmem %s7213_s2, %s5379_s18  ;;  %s81_s16 = scalar_lea.vmem %s7213_s2, %s5381_s19  ;;  %5093 = vset.pattern.permute.xlu1 %v5311_v15  ;;  %5092 = vset.pattern.permute.xlu0 %v5311_v15 }
  0x2d   :  { %v57_v20 = vld [vmem:[%s56_s10] sm:$0x1]  ;;  %v68_v25 = vadd.f32 %v54_v19, %v51_v18  ;;  %s84_s29 = scalar_lea.vmem %s7213_s2, %s5383_s20  ;;  %s87_s8 = scalar_lea.vmem %s7213_s2, %s5385_s21 }
  0x2e   :  { %v60_v22 = vld [vmem:[%s59_s22] sm:$0x1]  ;;  %s4740_s18 = sld [smem:[#allocation7 + $0x84]]  ;;  %s4741_s19 = sld [smem:[#allocation7 + $0x85]] }
  0x2f   :  { %v63_v23 = vld [vmem:[%s62_s23] sm:$0x1]  ;;  %v69_v26 = vadd.f32 %v60_v22, %v57_v20  ;;  %v71_v28 = vadd.f32 %v68_v25, %v67_v21  ;;  %s4742_s9 = sld [smem:[#allocation7 + $0x86]]  ;;  %s4743_s10 = sld [smem:[#allocation7 + $0x87]] }
  0x30   :  { %v66_v24 = vld [vmem:[%s65_s15] sm:$0x1]  ;;  %s5435_s11 = sld [smem:[#allocation7 + $0x100]]  ;;  %s5437_s20 = sld [smem:[#allocation7 + $0x101]] }
  0x31   :  { %v70_v27 = vadd.f32 %v66_v24, %v63_v23  ;;  %v79_v29 = vld [vmem:[%s78_s26] sm:$0x1]  ;;  %s5439_s21 = sld [smem:[#allocation7 + $0x102]]  ;;  %s5441_s12 = sld [smem:[#allocation7 + $0x103]] }
  0x32   :  { %v82_v30 = vld [vmem:[%s81_s16] sm:$0x1]  ;;  %s5443_s22 = sld [smem:[#allocation7 + $0x104]]  ;;  %s5445_s13 = sld [smem:[#allocation7 + $0x105]] }
  0x33   :  { %v85_v31 = vld [vmem:[%s84_s29] sm:$0x1]  ;;  %v72_v32 = vadd.f32 %v70_v27, %v69_v26  ;;  %v101_v39 = vadd.f32 %v82_v30, %v79_v29  ;;  %s5447_s14 = sld [smem:[#allocation7 + $0x106]]  ;;  %s5449_s23 = sld [smem:[#allocation7 + $0x107]] }
  0x34   :  { %v88_v33 = vld [vmem:[%s87_s8] sm:$0x1]  ;;  %s90_s15 = scalar_lea.vmem %s7213_s2, %s4740_s18  ;;  %s93_s26 = scalar_lea.vmem %s7213_s2, %s4741_s19 }
  0x35   :  { %v73_v36 = vadd.f32 %v72_v32, %v71_v28  ;;  %v102_v40 = vadd.f32 %v88_v33, %v85_v31  ;;  %v91_v41 = vld [vmem:[%s90_s15] sm:$0x1]  ;;  %s96_s16 = scalar_lea.vmem %s7213_s2, %s4742_s9  ;;  %s99_s29 = scalar_lea.vmem %s7213_s2, %s4743_s10 }
  0x36   :  { %v94_v42 = vld [vmem:[%s93_s26] sm:$0x1]  ;;  %s111_s8 = scalar_lea.vmem %s7213_s2, %s5435_s11  ;;  %s114_s25 = scalar_lea.vmem %s7213_s2, %s5437_s20 }
  0x37   :  { %v74_v38 = vmul.f32 0.125, %v73_v36  ;;  %v97_v43 = vld [vmem:[%s96_s16] sm:$0x1]  ;;  %v103_v45 = vadd.f32 %v94_v42, %v91_v41  ;;  %v105_v47 = vadd.f32 %v102_v40, %v101_v39  ;;  %s117_s10 = scalar_lea.vmem %s7213_s2, %s5439_s21  ;;  %s120_s24 = scalar_lea.vmem %s7213_s2, %s5441_s12 }
  0x38   :  { %v100_v44 = vld [vmem:[%s99_s29] sm:$0x1]  ;;  %s123_s27 = scalar_lea.vmem %s7213_s2, %s5443_s22  ;;  %s126_s16 = scalar_lea.vmem %s7213_s2, %s5445_s13 }
  0x39   :  { %76 = vst.msk [vmem:[#allocation2] sm:$0x1] %vm75_vm0, %v74_v38  ;;  %v104_v46 = vadd.f32 %v100_v44, %v97_v43  ;;  %v112_v48 = vld [vmem:[%s111_s8] sm:$0x1]  ;;  %s129_s30 = scalar_lea.vmem %s7213_s2, %s5447_s14  ;;  %s132_s6 = scalar_lea.vmem %s7213_s2, %s5449_s23 }
  0x3a   :  { %v115_v49 = vld [vmem:[%s114_s25] sm:$0x1]  ;;  %s4752_s22 = sld [smem:[#allocation7 + $0x180]]  ;;  %s4753_s13 = sld [smem:[#allocation7 + $0x181]] }
  0x3b   :  { %v118_v50 = vld [vmem:[%s117_s10] sm:$0x1]  ;;  %v134_v52 = vadd.f32 %v115_v49, %v112_v48  ;;  %v106_v53 = vadd.f32 %v104_v46, %v103_v45  ;;  %s4754_s7 = sld [smem:[#allocation7 + $0x182]]  ;;  %s4755_s8 = sld [smem:[#allocation7 + $0x183]] }
  0x3c   :  { %v121_v51 = vld [vmem:[%s120_s24] sm:$0x1]  ;;  %s4756_s18 = sld [smem:[#allocation7 + $0x184]]  ;;  %s4757_s19 = sld [smem:[#allocation7 + $0x185]] }
  0x3d   :  { %v124_v54 = vld [vmem:[%s123_s27] sm:$0x1]  ;;  %v135_v56 = vadd.f32 %v121_v51, %v118_v50  ;;  %v107_v60 = vadd.f32 %v106_v53, %v105_v47  ;;  %s4758_s14 = sld [smem:[#allocation7 + $0x186]]  ;;  %s4759_s25 = sld [smem:[#allocation7 + $0x187]] }
  0x3e   :  { %v127_v55 = vld [vmem:[%s126_s16] sm:$0x1]  ;;  %s5496_s9 = sld [smem:[#allocation7 + $0x200]]  ;;  %s5499_s23 = sld [smem:[#allocation7 + $0x201]] }
  0x3f   :  { %v130_v57 = vld [vmem:[%s129_s30] sm:$0x1]  ;;  %v136_v59 = vadd.f32 %v127_v55, %v124_v54  ;;  %v138_v62 = vadd.f32 %v135_v56, %v134_v52  ;;  %v108_v63 = vmul.f32 0.125, %v107_v60  ;;  %s5501_s0 = sld [smem:[#allocation7 + $0x202]]  ;;  %s5506_s24 = sld [smem:[#allocation7 + $0x203]] }
  0x40   :  { %v133_v58 = vld [vmem:[%s132_s6] sm:$0x1]  ;;  %s144_s3 = scalar_lea.vmem %s7213_s2, %s4752_s22  ;;  %s147_s27 = scalar_lea.vmem %s7213_s2, %s4753_s13 }
  0x41   :  { %v137_v61 = vadd.f32 %v133_v58, %v130_v57  ;;  %109 = vst.msk [vmem:[#allocation2 + $0x1] sm:$0x1] %vm75_vm0, %v108_v63  ;;  %v145_v4 = vld [vmem:[%s144_s3] sm:$0x1]  ;;  %s150_s16 = scalar_lea.vmem %s7213_s2, %s4754_s7  ;;  %s153_s30 = scalar_lea.vmem %s7213_s2, %s4755_s8 }
  0x42   :  { %v148_v5 = vld [vmem:[%s147_s27] sm:$0x1]  ;;  %s156_s6 = scalar_lea.vmem %s7213_s2, %s4756_s18  ;;  %s159_s7 = scalar_lea.vmem %s7213_s2, %s4757_s19 }
  0x43   :  { %v139_v1 = vadd.f32 %v137_v61, %v136_v59  ;;  %v151_v6 = vld [vmem:[%s150_s16] sm:$0x1]  ;;  %s162_s3 = scalar_lea.vmem %s7213_s2, %s4758_s14  ;;  %v167_v9 = vadd.f32 %v148_v5, %v145_v4  ;;  %s165_s18 = scalar_lea.vmem %s7213_s2, %s4759_s25 }
  0x44   :  { %v154_v7 = vld [vmem:[%s153_s30] sm:$0x1]  ;;  %s177_s20 = scalar_lea.vmem %s7213_s2, %s5496_s9  ;;  %s180_s16 = scalar_lea.vmem %s7213_s2, %s5499_s23 }
  0x45   :  { %v140_v2 = vadd.f32 %v139_v1, %v138_v62  ;;  %v157_v8 = vld [vmem:[%s156_s6] sm:$0x1]  ;;  %v168_v12 = vadd.f32 %v154_v7, %v151_v6  ;;  %s183_s21 = scalar_lea.vmem %s7213_s2, %s5501_s0  ;;  %s186_s29 = scalar_lea.vmem %s7213_s2, %s5506_s24 }
  0x46   :  { %v160_v10 = vld [vmem:[%s159_s7] sm:$0x1]  ;;  %s4764_s9 = sld [smem:[#allocation7 + $0x204]]  ;;  %s4765_s12 = sld [smem:[#allocation7 + $0x205]] }
  0x47   :  { %v141_v3 = vmul.f32 0.125, %v140_v2  ;;  %v163_v11 = vld [vmem:[%s162_s3] sm:$0x1]  ;;  %v169_v14 = vadd.f32 %v160_v10, %v157_v8  ;;  %v171_v17 = vadd.f32 %v168_v12, %v167_v9  ;;  %s4766_s6 = sld [smem:[#allocation7 + $0x206]]  ;;  %s4767_s23 = sld [smem:[#allocation7 + $0x207]] }
  0x48   :  { %v166_v13 = vld [vmem:[%s165_s18] sm:$0x1]  ;;  %s4768_s22 = sld [smem:[#allocation7 + $0x280]]  ;;  %s4769_s0 = sld [smem:[#allocation7 + $0x281]] }
  0x49   :  { %142 = vst.msk [vmem:[#allocation2 + $0x2] sm:$0x1] %vm75_vm0, %v141_v3  ;;  %v170_v16 = vadd.f32 %v166_v13, %v163_v11  ;;  %v178_v18 = vld [vmem:[%s177_s20] sm:$0x1]  ;;  %s4770_s13 = sld [smem:[#allocation7 + $0x282]]  ;;  %s4771_s7 = sld [smem:[#allocation7 + $0x283]] }
  0x4a   :  { %v181_v19 = vld [vmem:[%s180_s16] sm:$0x1]  ;;  %s4772_s10 = sld [smem:[#allocation7 + $0x284]]  ;;  %s5546_s15 = sld [smem:[#allocation7 + $0x285]] }
  0x4b   :  { %v172_v20 = vadd.f32 %v170_v16, %v169_v14  ;;  %v184_v21 = vld [vmem:[%s183_s21] sm:$0x1]  ;;  %s5548_s3 = sld [smem:[#allocation7 + $0x286]]  ;;  %v200_v25 = vadd.f32 %v181_v19, %v178_v18  ;;  %s5553_s18 = sld [smem:[#allocation7 + $0x287]] }
  0x4c   :  { %v187_v22 = vld [vmem:[%s186_s29] sm:$0x1]  ;;  %s189_s11 = scalar_lea.vmem %s7213_s2, %s4764_s9  ;;  %s192_s20 = scalar_lea.vmem %s7213_s2, %s4765_s12 }
  0x4d   :  { %v173_v23 = vadd.f32 %v172_v20, %v171_v17  ;;  %v201_v26 = vadd.f32 %v187_v22, %v184_v21  ;;  %v190_v27 = vld [vmem:[%s189_s11] sm:$0x1]  ;;  %s195_s16 = scalar_lea.vmem %s7213_s2, %s4766_s6  ;;  %s198_s21 = scalar_lea.vmem %s7213_s2, %s4767_s23 }
  0x4e   :  { %v193_v28 = vld [vmem:[%s192_s20] sm:$0x1]  ;;  %s210_s29 = scalar_lea.vmem %s7213_s2, %s4768_s22  ;;  %s213_s6 = scalar_lea.vmem %s7213_s2, %s4769_s0 }
  0x4f   :  { %v174_v24 = vmul.f32 0.125, %v173_v23  ;;  %v196_v29 = vld [vmem:[%s195_s16] sm:$0x1]  ;;  %v202_v31 = vadd.f32 %v193_v28, %v190_v27  ;;  %s216_s11 = scalar_lea.vmem %s7213_s2, %s4770_s13  ;;  %v204_v34 = vadd.f32 %v201_v26, %v200_v25  ;;  %s219_s22 = scalar_lea.vmem %s7213_s2, %s4771_s7  ;;  %v396_v23 = vld [vmem:[#allocation8 + $0x298] sm:$0xff]  ;;  %v398_v25 = vld [vmem:[#allocation8 + $0x2a8] sm:$0xff] }
  0x50   :  { %v199_v30 = vld [vmem:[%s198_s21] sm:$0x1]  ;;  %s222_s19 = scalar_lea.vmem %s7213_s2, %s4772_s10  ;;  %s225_s16 = scalar_lea.vmem %s7213_s2, %s5546_s15  ;;  %v322_v26 = vld [vmem:[#allocation8 + $0x48] sm:$0xff]  ;;  %v324_v28 = vld [vmem:[#allocation8 + $0x58] sm:$0xff] }
  0x51   :  { %175 = vst.msk [vmem:[#allocation2 + $0x3] sm:$0x1] %vm75_vm0, %v174_v24  ;;  %v211_v32 = vld [vmem:[%s210_s29] sm:$0x1]  ;;  %v203_v33 = vadd.f32 %v199_v30, %v196_v29  ;;  %s228_s17 = scalar_lea.vmem %s7213_s2, %s5548_s3  ;;  %s231_s25 = scalar_lea.vmem %s7213_s2, %s5553_s18  ;;  %v319_v24 = vld [vmem:[#allocation8 + $0x30] sm:$0xff] }
  0x52   :  { %v214_v35 = vld [vmem:[%s213_s6] sm:$0x1]  ;;  %s4776_s10 = sld [smem:[#allocation7 + $0x300]]  ;;  %s4777_s30 = sld [smem:[#allocation7 + $0x301]]  ;;  %v403_v29 = vld [vmem:[#allocation8 + $0x2d0] sm:$0xff] }
  0x53   :  { %v217_v36 = vld [vmem:[%s216_s11] sm:$0x1]  ;;  %v233_v39 = vadd.f32 %v214_v35, %v211_v32  ;;  %v205_v40 = vadd.f32 %v203_v33, %v202_v31  ;;  %s4778_s29 = sld [smem:[#allocation7 + $0x302]]  ;;  %s4779_s15 = sld [smem:[#allocation7 + $0x303]]  ;;  %v4935_v31 = vpack.c.bf16 %v398_v25, %v319_v24  ;;  %v400_v33 = vld [vmem:[#allocation8 + $0x2b8] sm:$0xff]  ;;  %v402_v35 = vld [vmem:[#allocation8 + $0x2c8] sm:$0xff] }
  0x54   :  { %v220_v37 = vld [vmem:[%s219_s22] sm:$0x1]  ;;  %s4780_s9 = sld [smem:[#allocation7 + $0x304]]  ;;  %s4781_s3 = sld [smem:[#allocation7 + $0x305]]  ;;  %v342_v24 = vld [vmem:[#allocation8 + $0xe8] sm:$0xff] }
  0x55   :  { %v223_v38 = vld [vmem:[%s222_s19] sm:$0x1]  ;;  %v234_v43 = vadd.f32 %v220_v37, %v217_v36  ;;  %v206_v46 = vadd.f32 %v205_v40, %v204_v34  ;;  %s4782_s12 = sld [smem:[#allocation7 + $0x306]]  ;;  %s4783_s6 = sld [smem:[#allocation7 + $0x307]]  ;;  %v323_v34 = vld [vmem:[#allocation8 + $0x50] sm:$0xff] }
  0x56   :  { %v226_v41 = vld [vmem:[%s225_s16] sm:$0x1]  ;;  %s5592_s24 = sld [smem:[#allocation7 + $0x380]]  ;;  %s5594_s8 = sld [smem:[#allocation7 + $0x381]] }
  0x57   :  { %v229_v42 = vld [vmem:[%s228_s17] sm:$0x1]  ;;  %v235_v45 = vadd.f32 %v226_v41, %v223_v38  ;;  %v237_v48 = vadd.f32 %v234_v43, %v233_v39  ;;  %v207_v49 = vmul.f32 0.125, %v206_v46  ;;  %s5596_s18 = sld [smem:[#allocation7 + $0x382]]  ;;  %s5602_s22 = sld [smem:[#allocation7 + $0x383]]  ;;  %v4941_v38 = vpack.c.bf16 %v403_v29, %v324_v28  ;;  %v326_v39 = vld [vmem:[#allocation8 + $0x68] sm:$0xff] }
  0x58   :  { %v232_v44 = vld [vmem:[%s231_s25] sm:$0x1]  ;;  %s243_s26 = scalar_lea.vmem %s7213_s2, %s4776_s10  ;;  %s246_s19 = scalar_lea.vmem %s7213_s2, %s4777_s30  ;;  %v328_v41 = vld [vmem:[#allocation8 + $0x78] sm:$0xff] }
  0x59   :  { %v236_v47 = vadd.f32 %v232_v44, %v229_v42  ;;  %208 = vst.msk [vmem:[#allocation2 + $0x4] sm:$0x1] %vm75_vm0, %v207_v49  ;;  %v244_v52 = vld [vmem:[%s243_s26] sm:$0x1]  ;;  %s249_s16 = scalar_lea.vmem %s7213_s2, %s4778_s29  ;;  %s252_s17 = scalar_lea.vmem %s7213_s2, %s4779_s15  ;;  %v407_v42 = vld [vmem:[#allocation8 + $0x2f0] sm:$0xff]  ;;  %v4943_v44 = vpack.c.bf16 %v402_v35, %v323_v34  ;;  %v404_v46 = vld [vmem:[#allocation8 + $0x2d8] sm:$0xff] }
  0x5a   :  { %v247_v54 = vld [vmem:[%s246_s19] sm:$0x1]  ;;  %s255_s25 = scalar_lea.vmem %s7213_s2, %s4780_s9  ;;  %s258_s29 = scalar_lea.vmem %s7213_s2, %s4781_s3 }
  0x5b   :  { %v238_v50 = vadd.f32 %v236_v47, %v235_v45  ;;  %v250_v55 = vld [vmem:[%s249_s16] sm:$0x1]  ;;  %s261_s26 = scalar_lea.vmem %s7213_s2, %s4782_s12  ;;  %v266_v58 = vadd.f32 %v247_v54, %v244_v52  ;;  %s264_s9 = scalar_lea.vmem %s7213_s2, %s4783_s6  ;;  %v327_v47 = vld [vmem:[#allocation8 + $0x70] sm:$0xff] }
  0x5c   :  { %v253_v56 = vld [vmem:[%s252_s17] sm:$0x1]  ;;  %s276_s0 = scalar_lea.vmem %s7213_s2, %s5592_s24  ;;  %s279_s12 = scalar_lea.vmem %s7213_s2, %s5594_s8  ;;  %v411_v54 = vld [vmem:[#allocation8 + $0x310] sm:$0xff] }
  0x5d   :  { %v239_v51 = vadd.f32 %v238_v50, %v237_v48  ;;  %v256_v57 = vld [vmem:[%s255_s25] sm:$0x1]  ;;  %v267_v61 = vadd.f32 %v253_v56, %v250_v55  ;;  %s282_s13 = scalar_lea.vmem %s7213_s2, %s5596_s18  ;;  %s285_s6 = scalar_lea.vmem %s7213_s2, %s5602_s22  ;;  %v406_v48 = vld [vmem:[#allocation8 + $0x2e8] sm:$0xff]  ;;  %v4949_v50 = vpack.c.bf16 %v407_v42, %v328_v41 }
  0x5e   :  { %v259_v59 = vld [vmem:[%s258_s29] sm:$0x1]  ;;  %s4788_s7 = sld [smem:[#allocation7 + $0x384]]  ;;  %s4789_s25 = sld [smem:[#allocation7 + $0x385]]  ;;  %v4951_v56 = vpack.c.bf16 %v406_v48, %v327_v47 }
  0x5f   :  { %v240_v53 = vmul.f32 0.125, %v239_v51  ;;  %v262_v60 = vld [vmem:[%s261_s26] sm:$0x1]  ;;  %v268_v63 = vadd.f32 %v259_v59, %v256_v57  ;;  %v270_v2 = vadd.f32 %v267_v61, %v266_v58  ;;  %s4790_s10 = sld [smem:[#allocation7 + $0x386]]  ;;  %s4791_s24 = sld [smem:[#allocation7 + $0x387]]  ;;  %v330_v51 = vld [vmem:[#allocation8 + $0x88] sm:$0xff] }
  0x60   :  { %v265_v62 = vld [vmem:[%s264_s9] sm:$0x1]  ;;  %v408_v58 = vld [vmem:[#allocation8 + $0x2f8] sm:$0xff]  ;;  %v331_v59 = vld [vmem:[#allocation8 + $0x90] sm:$0xff] }
  0x61   :  { %241 = vst.msk [vmem:[#allocation2 + $0x5] sm:$0x1] %vm75_vm0, %v240_v53  ;;  %v269_v1 = vadd.f32 %v265_v62, %v262_v60  ;;  %v277_v4 = vld [vmem:[%s276_s0] sm:$0x1]  ;;  %v332_v53 = vld [vmem:[#allocation8 + $0x98] sm:$0xff]  ;;  %v410_v60 = vld [vmem:[#allocation8 + $0x308] sm:$0xff] }
  0x62   :  { %v280_v5 = vld [vmem:[%s279_s12] sm:$0x1]  ;;  %v4957_v62 = vpack.c.bf16 %v411_v54, %v332_v53 }
  0x63   :  { %v271_v3 = vadd.f32 %v269_v1, %v268_v63  ;;  %v283_v6 = vld [vmem:[%s282_s13] sm:$0x1]  ;;  %v299_v10 = vadd.f32 %v280_v5, %v277_v4  ;;  %v334_v63 = vld [vmem:[#allocation8 + $0xa8] sm:$0xff]  ;;  %v4959_v5 = vpack.c.bf16 %v410_v60, %v331_v59 }
  0x64   :  { %v286_v7 = vld [vmem:[%s285_s6] sm:$0x1]  ;;  %s288_s18 = scalar_lea.vmem %s7213_s2, %s4788_s7  ;;  %s291_s11 = scalar_lea.vmem %s7213_s2, %s4789_s25 }
  0x65   :  { %v272_v8 = vadd.f32 %v271_v3, %v270_v2  ;;  %v300_v11 = vadd.f32 %v286_v7, %v283_v6  ;;  %v289_v12 = vld [vmem:[%s288_s18] sm:$0x1]  ;;  %s294_s15 = scalar_lea.vmem %s7213_s2, %s4790_s10  ;;  %s297_s20 = scalar_lea.vmem %s7213_s2, %s4791_s24  ;;  %v336_v2 = vld [vmem:[#allocation8 + $0xb8] sm:$0xff]  ;;  %v415_v3 = vld [vmem:[#allocation8 + $0x330] sm:$0xff] }
  0x66   :  { %v292_v13 = vld [vmem:[%s291_s11] sm:$0x1]  ;;  %v412_v7 = vld [vmem:[#allocation8 + $0x318] sm:$0xff] }
  0x67   :  { %v273_v9 = vmul.f32 0.125, %v272_v8  ;;  %v295_v14 = vld [vmem:[%s294_s15] sm:$0x1]  ;;  %v301_v16 = vadd.f32 %v292_v13, %v289_v12  ;;  %v303_v18 = vadd.f32 %v300_v11, %v299_v10  ;;  %v335_v8 = vld [vmem:[#allocation8 + $0xb0] sm:$0xff]  ;;  %v4965_v11 = vpack.c.bf16 %v415_v3, %v336_v2  ;;  %v338_v12 = vld [vmem:[#allocation8 + $0xc8] sm:$0xff]  ;;  %s5290_s15 = scalar_lea.hbm %s7216_s5, 16 }
  0x68   :  { %v298_v15 = vld [vmem:[%s297_s20] sm:$0x1]  ;;  %p5291_p13 = scmp.ne.s32.totalorder %s7216_s5, %s5290_s15  ;;  %p5294_p0 = scmp.lt.u32.totalorder %s5290_s15, %s7216_s5 }
  0x69   :  { %274 = vst.msk [vmem:[#allocation2 + $0x6] sm:$0x1] %vm75_vm0, %v273_v9  ;;  %v302_v17 = vadd.f32 %v298_v15, %v295_v14  ;;  %v317_v22 = vld [vmem:[#allocation8 + $0x20] sm:$0xff]  ;;  %v414_v9 = vld [vmem:[#allocation8 + $0x328] sm:$0xff]  ;;  %v340_v14 = vld [vmem:[#allocation8 + $0xd8] sm:$0xff] }
  0x6a   :  { %v401_v27 = vld [vmem:[#allocation8 + $0x2c0] sm:$0xff]  ;;  %v4931_v30 = vpack.c.bf16 %v396_v23, %v317_v22  ;;  %v419_v15 = vld [vmem:[#allocation8 + $0x350] sm:$0xff]  ;;  %p5296_p1 = pnand %p5294_p0, %p5291_p13 }
  0x6b   :  { %v304_v19 = vadd.f32 %v302_v17, %v301_v16  ;;  %v321_v32 = vld [vmem:[#allocation8 + $0x40] sm:$0xff]  ;;  %v4937_v37 = vpack.c.bf16 %v401_v27, %v322_v26  ;;  %v4967_v17 = vpack.c.bf16 %v414_v9, %v335_v8  ;;  %v4973_v23 = vpack.c.bf16 %v419_v15, %v340_v14  ;;  %v344_v26 = vld [vmem:[#allocation8 + $0xf8] sm:$0xff]  ;;  %v423_v27 = vld [vmem:[#allocation8 + $0x370] sm:$0xff] }
  0x6c   :  { %v405_v40 = vld [vmem:[#allocation8 + $0x2e0] sm:$0xff]  ;;  %v4939_v43 = vpack.c.bf16 %v400_v33, %v321_v32  ;;  %v343_v32 = vld [vmem:[#allocation8 + $0xf0] sm:$0xff]  ;;  %v422_v33 = vld [vmem:[#allocation8 + $0x368] sm:$0xff]  ;;  %v4981_v35 = vpack.c.bf16 %v423_v27, %v344_v26 }
  0x6d   :  { %v305_v20 = vadd.f32 %v304_v19, %v303_v18  ;;  %v325_v45 = vld [vmem:[#allocation8 + $0x60] sm:$0xff]  ;;  %v4945_v49 = vpack.c.bf16 %v405_v40, %v326_v39  ;;  %v416_v19 = vld [vmem:[#allocation8 + $0x338] sm:$0xff]  ;;  %v427_v40 = vld [vmem:[#allocation8 + $0x390] sm:$0xff]  ;;  %v4983_v42 = vpack.c.bf16 %v422_v33, %v343_v32 }
  0x6e   :  { %v409_v52 = vld [vmem:[#allocation8 + $0x300] sm:$0xff]  ;;  %v4947_v55 = vpack.c.bf16 %v404_v46, %v325_v45  ;;  %v348_v39 = vld [vmem:[#allocation8 + $0x118] sm:$0xff]  ;;  %v347_v45 = vld [vmem:[#allocation8 + $0x110] sm:$0xff] }
  0x6f   :  { %v306_v21 = vmul.f32 0.125, %v305_v20  ;;  %v329_v57 = vld [vmem:[#allocation8 + $0x80] sm:$0xff]  ;;  %v4953_v61 = vpack.c.bf16 %v409_v52, %v330_v51  ;;  %v339_v20 = vld [vmem:[#allocation8 + $0xd0] sm:$0xff]  ;;  %v426_v46 = vld [vmem:[#allocation8 + $0x388] sm:$0xff]  ;;  %v4989_v48 = vpack.c.bf16 %v427_v40, %v348_v39 }
  0x70   :  { %v413_v1 = vld [vmem:[#allocation8 + $0x320] sm:$0xff]  ;;  %v4955_v4 = vpack.c.bf16 %v408_v58, %v329_v57  ;;  %v352_v51 = vld [vmem:[#allocation8 + $0x138] sm:$0xff]  ;;  %v431_v52 = vld [vmem:[#allocation8 + $0x3b0] sm:$0xff]  ;;  %v4991_v54 = vpack.c.bf16 %v426_v46, %v347_v45 }
  0x71   :  { %307 = vst.msk [vmem:[#allocation2 + $0x7] sm:$0x1] %vm75_vm0, %v306_v21  ;;  %v333_v6 = vld [vmem:[#allocation8 + $0xa0] sm:$0xff]  ;;  %v4961_v10 = vpack.c.bf16 %v413_v1, %v334_v63  ;;  %v418_v21 = vld [vmem:[#allocation8 + $0x348] sm:$0xff]  ;;  %v351_v57 = vld [vmem:[#allocation8 + $0x130] sm:$0xff]  ;;  %v4997_v60 = vpack.c.bf16 %v431_v52, %v352_v51 }
  0x72   :  { %v417_v13 = vld [vmem:[#allocation8 + $0x340] sm:$0xff]  ;;  %v4963_v16 = vpack.c.bf16 %v412_v7, %v333_v6  ;;  %v4975_v29 = vpack.c.bf16 %v418_v21, %v339_v20  ;;  %v430_v58 = vld [vmem:[#allocation8 + $0x3a8] sm:$0xff]  ;;  %v356_v63 = vld [vmem:[#allocation8 + $0x158] sm:$0xff] }
  0x73   :  { %v337_v18 = vld [vmem:[#allocation8 + $0xc0] sm:$0xff]  ;;  %v4969_v22 = vpack.c.bf16 %v417_v13, %v338_v12  ;;  %v435_v1 = vld [vmem:[#allocation8 + $0x3d0] sm:$0xff]  ;;  %v4999_v3 = vpack.c.bf16 %v430_v58, %v351_v57  ;;  %v434_v7 = vld [vmem:[#allocation8 + $0x3c8] sm:$0xff] }
  0x74   :  { %v421_v25 = vld [vmem:[#allocation8 + $0x360] sm:$0xff]  ;;  %v4971_v28 = vpack.c.bf16 %v416_v19, %v337_v18  ;;  %v355_v6 = vld [vmem:[#allocation8 + $0x150] sm:$0xff]  ;;  %v5005_v9 = vpack.c.bf16 %v435_v1, %v356_v63  ;;  %v360_v12 = vld [vmem:[#allocation8 + $0x178] sm:$0xff] }
  0x75   :  { %v4977_v34 = vpack.c.bf16 %v421_v25, %v342_v24  ;;  %v439_v13 = vld [vmem:[#allocation8 + $0x3f0] sm:$0xff]  ;;  %v5007_v15 = vpack.c.bf16 %v434_v7, %v355_v6  ;;  %v438_v19 = vld [vmem:[#allocation8 + $0x3e8] sm:$0xff]  ;;  %v364_v24 = vld [vmem:[#allocation8 + $0x198] sm:$0xff] }
  0x76   :  { %v359_v18 = vld [vmem:[#allocation8 + $0x170] sm:$0xff]  ;;  %v5013_v21 = vpack.c.bf16 %v439_v13, %v360_v12 }
  0x77   :  { %v443_v25 = vld [vmem:[#allocation8 + $0x410] sm:$0xff]  ;;  %v5015_v27 = vpack.c.bf16 %v438_v19, %v359_v18 }
  0x78   :  { %v5656_v36 = vld [vmem:[#allocation2] sm:$0xff]  ;;  %v5021_v33 = vpack.c.bf16 %v443_v25, %v364_v24 }
  0x79   :  { %4792 = vmatmul.mubr.msk.f32.vlgmr.msra.gmra.mrb[0].mxu0 %vm886_vm1, %v5656_v36  ;;  %4793 = vmatmul.mubr.msk.f32.vlgmr.msra.gmra.mrb[0].mxu1 %vm886_vm1, %v5656_v36 }
  0x7a   :  { %4932 = vmatpush1.bf16.msra.mxu0 %v4931_v30  ;;  %4936 = vmatpush1.bf16.msra.mxu1 %v4935_v31  ;;  %v341_v30 = vld [vmem:[#allocation8 + $0xe0] sm:$0xff]  ;;  %v420_v31 = vld [vmem:[#allocation8 + $0x358] sm:$0xff] }
  0x7b   :  { %1096 = vmatprep.mubr.f32.mxu0 %v7218_v0  ;;  %1167 = vmatprep.mubr.f32.mxu1 %v7218_v0  ;;  %v4979_v41 = vpack.c.bf16 %v420_v31, %v341_v30  ;;  %v363_v30 = vld [vmem:[#allocation8 + $0x190] sm:$0xff]  ;;  %v442_v31 = vld [vmem:[#allocation8 + $0x408] sm:$0xff] }
  0x7c   :  { %4938 = vmatprep.subr.bf16.mxu0 %v4937_v37  ;;  %4942 = vmatprep.subr.bf16.mxu1 %v4941_v38  ;;  %v346_v37 = vld [vmem:[#allocation8 + $0x108] sm:$0xff]  ;;  %v425_v38 = vld [vmem:[#allocation8 + $0x380] sm:$0xff]  ;;  %v5023_v40 = vpack.c.bf16 %v442_v31, %v363_v30 }
  0x7d   :  { %4794 = vmatmul.mubr.msk.f32.vlgmr.msra.gmra.mrb[2].mxu0 %vm886_vm1, %v5656_v36  ;;  %4795 = vmatmul.mubr.msk.f32.vlgmr.msra.gmra.mrb[2].mxu1 %vm886_vm1, %v5656_v36  ;;  %v4985_v47 = vpack.c.bf16 %v425_v38, %v346_v37  ;;  %v368_v37 = vld [vmem:[#allocation8 + $0x1b8] sm:$0xff]  ;;  %v447_v38 = vld [vmem:[#allocation8 + $0x430] sm:$0xff] }
  0x7e   :  { %4940 = vmatpush1.bf16.msra.mxu0 %v4939_v43  ;;  %4944 = vmatpush1.bf16.msra.mxu1 %v4943_v44  ;;  %v345_v43 = vld [vmem:[#allocation8 + $0x100] sm:$0xff]  ;;  %v424_v44 = vld [vmem:[#allocation8 + $0x378] sm:$0xff]  ;;  %v5029_v46 = vpack.c.bf16 %v447_v38, %v368_v37 }
  0x7f   :  { %1238 = vmatprep.mubr.f32.mxu0 %v7218_v0  ;;  %1309 = vmatprep.mubr.f32.mxu1 %v7218_v0  ;;  %v4987_v53 = vpack.c.bf16 %v424_v44, %v345_v43  ;;  %v367_v43 = vld [vmem:[#allocation8 + $0x1b0] sm:$0xff]  ;;  %v446_v44 = vld [vmem:[#allocation8 + $0x428] sm:$0xff] }
  0x80   :  { %4946 = vmatprep.subr.bf16.mxu0 %v4945_v49  ;;  %4950 = vmatprep.subr.bf16.mxu1 %v4949_v50  ;;  %v350_v49 = vld [vmem:[#allocation8 + $0x128] sm:$0xff]  ;;  %v429_v50 = vld [vmem:[#allocation8 + $0x3a0] sm:$0xff]  ;;  %v5031_v52 = vpack.c.bf16 %v446_v44, %v367_v43 }
  0x81   :  { %4796 = vmatmul.mubr.msk.f32.vlgmr.msra.gmra.mrb[4].mxu0 %vm886_vm1, %v5656_v36  ;;  %4797 = vmatmul.mubr.msk.f32.vlgmr.msra.gmra.mrb[4].mxu1 %vm886_vm1, %v5656_v36  ;;  %v4993_v59 = vpack.c.bf16 %v429_v50, %v350_v49  ;;  %v372_v49 = vld [vmem:[#allocation8 + $0x1d8] sm:$0xff]  ;;  %v451_v50 = vld [vmem:[#allocation8 + $0x450] sm:$0xff] }
  0x82   :  { %4948 = vmatpush1.bf16.msra.mxu0 %v4947_v55  ;;  %4952 = vmatpush1.bf16.msra.mxu1 %v4951_v56  ;;  %v349_v55 = vld [vmem:[#allocation8 + $0x120] sm:$0xff]  ;;  %v428_v56 = vld [vmem:[#allocation8 + $0x398] sm:$0xff]  ;;  %v5037_v58 = vpack.c.bf16 %v451_v50, %v372_v49 }
  0x83   :  { %1380 = vmatprep.mubr.f32.mxu0 %v7218_v0  ;;  %1451 = vmatprep.mubr.f32.mxu1 %v7218_v0  ;;  %v4995_v2 = vpack.c.bf16 %v428_v56, %v349_v55  ;;  %v371_v55 = vld [vmem:[#allocation8 + $0x1d0] sm:$0xff]  ;;  %v450_v56 = vld [vmem:[#allocation8 + $0x448] sm:$0xff]  ;;  %v389_v49 = vld [vmem:[#allocation8 + $0x260] sm:$0xff] }
  0x84   :  { %4954 = vmatprep.subr.bf16.mxu0 %v4953_v61  ;;  %4958 = vmatprep.subr.bf16.mxu1 %v4957_v62  ;;  %v354_v61 = vld [vmem:[#allocation8 + $0x148] sm:$0xff]  ;;  %v433_v62 = vld [vmem:[#allocation8 + $0x3c0] sm:$0xff]  ;;  %v5039_v1 = vpack.c.bf16 %v450_v56, %v371_v55  ;;  %v468_v50 = vld [vmem:[#allocation8 + $0x4d8] sm:$0xff]  ;;  %v5312_v56 = vmov 0.0|0.0  }
  0x85   :  { %4798 = vmatmul.mubr.msk.f32.vlgmr.msra.gmra.mrb[6].mxu0 %vm886_vm1, %v5656_v36  ;;  %4799 = vmatmul.mubr.msk.f32.vlgmr.msra.gmra.mrb[6].mxu1 %vm886_vm1, %v5656_v36  ;;  %v5001_v8 = vpack.c.bf16 %v433_v62, %v354_v61  ;;  %v376_v61 = vld [vmem:[#allocation8 + $0x1f8] sm:$0xff]  ;;  %v455_v62 = vld [vmem:[#allocation8 + $0x470] sm:$0xff] }
  0x86   :  { %4956 = vmatpush1.bf16.msra.mxu0 %v4955_v4  ;;  %4960 = vmatpush1.bf16.msra.mxu1 %v4959_v5  ;;  %v353_v4 = vld [vmem:[#allocation8 + $0x140] sm:$0xff]  ;;  %v432_v5 = vld [vmem:[#allocation8 + $0x3b8] sm:$0xff]  ;;  %v5045_v7 = vpack.c.bf16 %v455_v62, %v376_v61 }
  0x87   :  { %1522 = vmatprep.mubr.f32.mxu0 %v7218_v0  ;;  %1593 = vmatprep.mubr.f32.mxu1 %v7218_v0  ;;  %v5003_v14 = vpack.c.bf16 %v432_v5, %v353_v4  ;;  %v375_v4 = vld [vmem:[#allocation8 + $0x1f0] sm:$0xff]  ;;  %v454_v5 = vld [vmem:[#allocation8 + $0x468] sm:$0xff] }
  0x88   :  { %4962 = vmatprep.subr.bf16.mxu0 %v4961_v10  ;;  %4966 = vmatprep.subr.bf16.mxu1 %v4965_v11  ;;  %v358_v10 = vld [vmem:[#allocation8 + $0x168] sm:$0xff]  ;;  %v437_v11 = vld [vmem:[#allocation8 + $0x3e0] sm:$0xff]  ;;  %v5047_v13 = vpack.c.bf16 %v454_v5, %v375_v4 }
  0x89   :  { %4800 = vmatmul.mubr.msk.f32.vlgmr.msra.gmra.mrb[8].mxu0 %vm886_vm1, %v5656_v36  ;;  %4801 = vmatmul.mubr.msk.f32.vlgmr.msra.gmra.mrb[8].mxu1 %vm886_vm1, %v5656_v36  ;;  %v5009_v20 = vpack.c.bf16 %v437_v11, %v358_v10  ;;  %v380_v10 = vld [vmem:[#allocation8 + $0x218] sm:$0xff]  ;;  %v459_v11 = vld [vmem:[#allocation8 + $0x490] sm:$0xff] }
  0x8a   :  { %4964 = vmatpush1.bf16.msra.mxu0 %v4963_v16  ;;  %4968 = vmatpush1.bf16.msra.mxu1 %v4967_v17  ;;  %v357_v16 = vld [vmem:[#allocation8 + $0x160] sm:$0xff]  ;;  %v436_v17 = vld [vmem:[#allocation8 + $0x3d8] sm:$0xff]  ;;  %v5053_v19 = vpack.c.bf16 %v459_v11, %v380_v10 }
  0x8b   :  { %1664 = vmatprep.mubr.f32.mxu0 %v7218_v0  ;;  %1735 = vmatprep.mubr.f32.mxu1 %v7218_v0  ;;  %v5011_v26 = vpack.c.bf16 %v436_v17, %v357_v16  ;;  %v379_v16 = vld [vmem:[#allocation8 + $0x210] sm:$0xff]  ;;  %v458_v17 = vld [vmem:[#allocation8 + $0x488] sm:$0xff] }
  0x8c   :  { %4970 = vmatprep.subr.bf16.mxu0 %v4969_v22  ;;  %4974 = vmatprep.subr.bf16.mxu1 %v4973_v23  ;;  %v362_v22 = vld [vmem:[#allocation8 + $0x188] sm:$0xff]  ;;  %v441_v23 = vld [vmem:[#allocation8 + $0x400] sm:$0xff]  ;;  %v5055_v25 = vpack.c.bf16 %v458_v17, %v379_v16 }
  0x8d   :  { %4802 = vmatmul.mubr.msk.f32.vlgmr.msra.gmra.mrb[10].mxu0 %vm886_vm1, %v5656_v36  ;;  %4803 = vmatmul.mubr.msk.f32.vlgmr.msra.gmra.mrb[10].mxu1 %vm886_vm1, %v5656_v36  ;;  %v5017_v32 = vpack.c.bf16 %v441_v23, %v362_v22  ;;  %v384_v22 = vld [vmem:[#allocation8 + $0x238] sm:$0xff]  ;;  %v463_v23 = vld [vmem:[#allocation8 + $0x4b0] sm:$0xff] }
  0x8e   :  { %4972 = vmatpush1.bf16.msra.mxu0 %v4971_v28  ;;  %4976 = vmatpush1.bf16.msra.mxu1 %v4975_v29  ;;  %v361_v28 = vld [vmem:[#allocation8 + $0x180] sm:$0xff]  ;;  %v440_v29 = vld [vmem:[#allocation8 + $0x3f8] sm:$0xff]  ;;  %v5061_v31 = vpack.c.bf16 %v463_v23, %v384_v22  ;;  %v7217_v22 = vlaneseq }
  0x8f   :  { %1806 = vmatprep.mubr.f32.mxu0 %v7218_v0  ;;  %1877 = vmatprep.mubr.f32.mxu1 %v7218_v0  ;;  %v5019_v39 = vpack.c.bf16 %v440_v29, %v361_v28  ;;  %v383_v28 = vld [vmem:[#allocation8 + $0x230] sm:$0xff]  ;;  %v462_v29 = vld [vmem:[#allocation8 + $0x4a8] sm:$0xff] }
  0x90   :  { %4978 = vmatprep.subr.bf16.mxu0 %v4977_v34  ;;  %4982 = vmatprep.subr.bf16.mxu1 %v4981_v35  ;;  %v366_v34 = vld [vmem:[#allocation8 + $0x1a8] sm:$0xff]  ;;  %v445_v35 = vld [vmem:[#allocation8 + $0x420] sm:$0xff]  ;;  %v5063_v38 = vpack.c.bf16 %v462_v29, %v383_v28 }
  0x91   :  { %4804 = vmatmul.mubr.msk.f32.vlgmr.msra.gmra.mrb[12].mxu0 %vm886_vm1, %v5656_v36  ;;  %4805 = vmatmul.mubr.msk.f32.vlgmr.msra.gmra.mrb[12].mxu1 %vm886_vm1, %v5656_v36  ;;  %v5025_v45 = vpack.c.bf16 %v445_v35, %v366_v34  ;;  %v388_v34 = vld [vmem:[#allocation8 + $0x258] sm:$0xff]  ;;  %v467_v35 = vld [vmem:[#allocation8 + $0x4d0] sm:$0xff] }
  0x92   :  { %4980 = vmatpush1.bf16.msra.mxu0 %v4979_v41  ;;  %4984 = vmatpush1.bf16.msra.mxu1 %v4983_v42  ;;  %v365_v41 = vld [vmem:[#allocation8 + $0x1a0] sm:$0xff]  ;;  %v444_v42 = vld [vmem:[#allocation8 + $0x418] sm:$0xff]  ;;  %v5069_v44 = vpack.c.bf16 %v467_v35, %v388_v34 }
  0x93   :  { %1948 = vmatprep.mubr.f32.mxu0 %v7218_v0  ;;  %2019 = vmatprep.mubr.f32.mxu1 %v7218_v0  ;;  %v5027_v51 = vpack.c.bf16 %v444_v42, %v365_v41  ;;  %v387_v41 = vld [vmem:[#allocation8 + $0x250] sm:$0xff]  ;;  %v466_v42 = vld [vmem:[#allocation8 + $0x4c8] sm:$0xff] }
  0x94   :  { %4986 = vmatprep.subr.bf16.mxu0 %v4985_v47  ;;  %4990 = vmatprep.subr.bf16.mxu1 %v4989_v48  ;;  %v370_v47 = vld [vmem:[#allocation8 + $0x1c8] sm:$0xff]  ;;  %v449_v48 = vld [vmem:[#allocation8 + $0x440] sm:$0xff] }
  0x95   :  { %4806 = vmatmul.mubr.msk.f32.vlgmr.msra.gmra.mrb[14].mxu0 %vm886_vm1, %v5656_v36  ;;  %4807 = vmatmul.mubr.msk.f32.vlgmr.msra.gmra.mrb[14].mxu1 %vm886_vm1, %v5656_v36  ;;  %v5033_v57 = vpack.c.bf16 %v449_v48, %v370_v47  ;;  %v5071_v48 = vpack.c.bf16 %v466_v42, %v387_v41 }
  0x96   :  { %4988 = vmatpush1.bf16.msra.mxu0 %v4987_v53  ;;  %4992 = vmatpush1.bf16.msra.mxu1 %v4991_v54  ;;  %v369_v53 = vld [vmem:[#allocation8 + $0x1c0] sm:$0xff]  ;;  %v448_v54 = vld [vmem:[#allocation8 + $0x438] sm:$0xff] }
  0x97   :  { %2090 = vmatprep.mubr.f32.mxu0 %v7218_v0  ;;  %2161 = vmatprep.mubr.f32.mxu1 %v7218_v0  ;;  %v5035_v63 = vpack.c.bf16 %v448_v54, %v369_v53  ;;  %v5075_v54 = vpack.c.bf16 %v468_v50, %v389_v49  ;;  %v5953_v50 = vld [vmem:[%s7215_s4 + $0x20] sm:$0xff] }
  0x98   :  { %4994 = vmatprep.subr.bf16.mxu0 %v4993_v59  ;;  %4998 = vmatprep.subr.bf16.mxu1 %v4997_v60  ;;  %v374_v59 = vld [vmem:[#allocation8 + $0x1e8] sm:$0xff]  ;;  %v453_v60 = vld [vmem:[#allocation8 + $0x460] sm:$0xff] }
  0x99   :  { %4808 = vmatmul.mubr.msk.f32.vlgmr.msra.gmra.mrb[16].mxu0 %vm886_vm1, %v5656_v36  ;;  %4809 = vmatmul.mubr.msk.f32.vlgmr.msra.gmra.mrb[16].mxu1 %vm886_vm1, %v5656_v36  ;;  %v5041_v6 = vpack.c.bf16 %v453_v60, %v374_v59 }
  0x9a   :  { %4996 = vmatpush1.bf16.msra.mxu0 %v4995_v2  ;;  %5000 = vmatpush1.bf16.msra.mxu1 %v4999_v3  ;;  %v373_v2 = vld [vmem:[#allocation8 + $0x1e0] sm:$0xff]  ;;  %v452_v3 = vld [vmem:[#allocation8 + $0x458] sm:$0xff] }
  0x9b   :  { %2232 = vmatprep.mubr.f32.mxu0 %v7218_v0  ;;  %2303 = vmatprep.mubr.f32.mxu1 %v7218_v0  ;;  %v5043_v12 = vpack.c.bf16 %v452_v3, %v373_v2 }
  0x9c   :  { %5002 = vmatprep.subr.bf16.mxu0 %v5001_v8  ;;  %5006 = vmatprep.subr.bf16.mxu1 %v5005_v9  ;;  %v378_v8 = vld [vmem:[#allocation8 + $0x208] sm:$0xff]  ;;  %v457_v9 = vld [vmem:[#allocation8 + $0x480] sm:$0xff] }
  0x9d   :  { %4810 = vmatmul.mubr.msk.f32.vlgmr.msra.gmra.mrb[18].mxu0 %vm886_vm1, %v5656_v36  ;;  %4811 = vmatmul.mubr.msk.f32.vlgmr.msra.gmra.mrb[18].mxu1 %vm886_vm1, %v5656_v36  ;;  %v5049_v18 = vpack.c.bf16 %v457_v9, %v378_v8 }
  0x9e   :  { %5004 = vmatpush1.bf16.msra.mxu0 %v5003_v14  ;;  %5008 = vmatpush1.bf16.msra.mxu1 %v5007_v15  ;;  %v377_v14 = vld [vmem:[#allocation8 + $0x200] sm:$0xff]  ;;  %v456_v15 = vld [vmem:[#allocation8 + $0x478] sm:$0xff] }
  0x9f   :  { %2374 = vmatprep.mubr.f32.mxu0 %v7218_v0  ;;  %2445 = vmatprep.mubr.f32.mxu1 %v7218_v0  ;;  %v5051_v24 = vpack.c.bf16 %v456_v15, %v377_v14 }
  0xa0   :  { %5010 = vmatprep.subr.bf16.mxu0 %v5009_v20  ;;  %5014 = vmatprep.subr.bf16.mxu1 %v5013_v21  ;;  %v382_v20 = vld [vmem:[#allocation8 + $0x228] sm:$0xff]  ;;  %v461_v21 = vld [vmem:[#allocation8 + $0x4a0] sm:$0xff] }
  0xa1   :  { %4812 = vmatmul.mubr.msk.f32.vlgmr.msra.gmra.mrb[20].mxu0 %vm886_vm1, %v5656_v36  ;;  %4813 = vmatmul.mubr.msk.f32.vlgmr.msra.gmra.mrb[20].mxu1 %vm886_vm1, %v5656_v36  ;;  %v5057_v30 = vpack.c.bf16 %v461_v21, %v382_v20 }
  0xa2   :  { %5012 = vmatpush1.bf16.msra.mxu0 %v5011_v26  ;;  %5016 = vmatpush1.bf16.msra.mxu1 %v5015_v27  ;;  %v381_v26 = vld [vmem:[#allocation8 + $0x220] sm:$0xff]  ;;  %v460_v27 = vld [vmem:[#allocation8 + $0x498] sm:$0xff] }
  0xa3   :  { %2516 = vmatprep.mubr.f32.mxu0 %v7218_v0  ;;  %2587 = vmatprep.mubr.f32.mxu1 %v7218_v0  ;;  %v5059_v37 = vpack.c.bf16 %v460_v27, %v381_v26  ;;  %v492_v27 = vshrl.u32 %v7217_v22, 7 }
  0xa4   :  { %5018 = vmatprep.subr.bf16.mxu0 %v5017_v32  ;;  %5022 = vmatprep.subr.bf16.mxu1 %v5021_v33  ;;  %v386_v32 = vld [vmem:[#allocation8 + $0x248] sm:$0xff]  ;;  %v465_v33 = vld [vmem:[#allocation8 + $0x4c0] sm:$0xff] }
  0xa5   :  { %4814 = vmatmul.mubr.msk.f32.vlgmr.msra.gmra.mrb[22].mxu0 %vm886_vm1, %v5656_v36  ;;  %4815 = vmatmul.mubr.msk.f32.vlgmr.msra.gmra.mrb[22].mxu1 %vm886_vm1, %v5656_v36  ;;  %v5065_v43 = vpack.c.bf16 %v465_v33, %v386_v32  ;;  %v5855_v32 = vld [vmem:[%s7215_s4] sm:$0xff]  ;;  %v5857_v33 = vsub.s32 0, %v492_v27 }
  0xa6   :  { %5020 = vmatpush1.bf16.msra.mxu0 %v5019_v39  ;;  %5024 = vmatpush1.bf16.msra.mxu1 %v5023_v40  ;;  %v385_v39 = vld [vmem:[#allocation8 + $0x240] sm:$0xff]  ;;  %v464_v40 = vld [vmem:[#allocation8 + $0x4b8] sm:$0xff] }
  0xa7   :  { %2658 = vmatprep.mubr.f32.mxu0 %v7218_v0  ;;  %2729 = vmatprep.mubr.f32.mxu1 %v7218_v0  ;;  %v5067_v47 = vpack.c.bf16 %v464_v40, %v385_v39  ;;  %v5867_v39 = vsub.s32 3, %v492_v27  ;;  %v5869_v40 = vsub.s32 4, %v492_v27 }
  0xa8   :  { %5026 = vmatprep.subr.bf16.mxu0 %v5025_v45  ;;  %5030 = vmatprep.subr.bf16.mxu1 %v5029_v46  ;;  %v390_v45 = vld [vmem:[#allocation8 + $0x268] sm:$0xff]  ;;  %v469_v46 = vld [vmem:[#allocation8 + $0x4e0] sm:$0xff] }
  0xa9   :  { %4816 = vmatmul.mubr.msk.f32.vlgmr.msra.gmra.mrb[24].mxu0 %vm886_vm1, %v5656_v36  ;;  %4817 = vmatmul.mubr.msk.f32.vlgmr.msra.gmra.mrb[24].mxu1 %vm886_vm1, %v5656_v36  ;;  %v5073_v53 = vpack.c.bf16 %v469_v46, %v390_v45  ;;  %v5879_v45 = vsub.s32 7, %v492_v27  ;;  %v5884_v46 = vld [vmem:[%s7215_s4 + $0x8] sm:$0xff] }
  0xaa   :  { %5028 = vmatpush1.bf16.msra.mxu0 %v5027_v51  ;;  %5032 = vmatpush1.bf16.msra.mxu1 %v5031_v52  ;;  %v391_v51 = vld [vmem:[#allocation8 + $0x270] sm:$0xff]  ;;  %v470_v52 = vld [vmem:[#allocation8 + $0x4e8] sm:$0xff] }
  0xab   :  { %2800 = vmatprep.mubr.f32.mxu0 %v7218_v0  ;;  %2871 = vmatprep.mubr.f32.mxu1 %v7218_v0  ;;  %v5078_v55 = vpack.c.bf16 %v470_v52, %v391_v51 }
  0xac   :  { %5034 = vmatprep.subr.bf16.mxu0 %v5033_v57  ;;  %5038 = vmatprep.subr.bf16.mxu1 %v5037_v58  ;;  %v4222_v57 = vld [vmem:[%s7212_s1] sm:$0xff] }
  0xad   :  { %4818 = vmatmul.mubr.msk.f32.vlgmr.msra.gmra.mrb[26].mxu0 %vm886_vm1, %v5656_v36  ;;  %4819 = vmatmul.mubr.msk.f32.vlgmr.msra.gmra.mrb[26].mxu1 %vm886_vm1, %v5656_v36 }
  0xae   :  { %5036 = vmatpush1.bf16.msra.mxu0 %v5035_v63  ;;  %5040 = vmatpush1.bf16.msra.mxu1 %v5039_v1 }
  0xaf   :  { %2942 = vmatprep.mubr.f32.mxu0 %v7218_v0  ;;  %3013 = vmatprep.mubr.f32.mxu1 %v7218_v0 }
  0xb0   :  { %5042 = vmatprep.subr.bf16.mxu0 %v5041_v6  ;;  %5046 = vmatprep.subr.bf16.mxu1 %v5045_v7 }
  0xb1   :  { %4820 = vmatmul.mubr.msk.f32.vlgmr.msra.gmra.mrb[28].mxu0 %vm886_vm1, %v5656_v36  ;;  %4821 = vmatmul.mubr.msk.f32.vlgmr.msra.gmra.mrb[28].mxu1 %vm886_vm1, %v5656_v36 }
  0xb2   :  { %5044 = vmatpush1.bf16.msra.mxu0 %v5043_v12  ;;  %5048 = vmatpush1.bf16.msra.mxu1 %v5047_v13 }
  0xb3   :  { %3084 = vmatprep.mubr.f32.mxu0 %v7218_v0  ;;  %3155 = vmatprep.mubr.f32.mxu1 %v7218_v0 }
  0xb4   :  { %5050 = vmatprep.subr.bf16.mxu0 %v5049_v18  ;;  %5054 = vmatprep.subr.bf16.mxu1 %v5053_v19 }
  0xb5   :  { %4822 = vmatmul.mubr.msk.f32.vlgmr.msra.gmra.mrb[30].mxu0 %vm886_vm1, %v5656_v36  ;;  %4823 = vmatmul.mubr.msk.f32.vlgmr.msra.gmra.mrb[30].mxu1 %vm886_vm1, %v5656_v36 }
  0xb6   :  { %5052 = vmatpush1.bf16.msra.mxu0 %v5051_v24  ;;  %5056 = vmatpush1.bf16.msra.mxu1 %v5055_v25 }
  0xb7   :  { %3226 = vmatprep.mubr.f32.mxu0 %v7218_v0  ;;  %3297 = vmatprep.mubr.f32.mxu1 %v7218_v0 }
  0xb8   :  { %5058 = vmatprep.subr.bf16.mxu0 %v5057_v30  ;;  %5062 = vmatprep.subr.bf16.mxu1 %v5061_v31 }
  0xb9   :  { %4824 = vmatmul.mubr.msk.f32.vlgmr.msra.gmra.mrb[32].mxu0 %vm886_vm1, %v5656_v36  ;;  %4825 = vmatmul.mubr.msk.f32.vlgmr.msra.gmra.mrb[32].mxu1 %vm886_vm1, %v5656_v36 }
  0xba   :  { %5060 = vmatpush1.bf16.msra.mxu0 %v5059_v37  ;;  %5064 = vmatpush1.bf16.msra.mxu1 %v5063_v38  ;;  %v5863_v37 = vsub.s32 2, %v492_v27  ;;  %v5865_v38 = vsub.s32 1, %v492_v27 }
  0xbb   :  { %3368 = vmatprep.mubr.f32.mxu0 %v7218_v0  ;;  %3439 = vmatprep.mubr.f32.mxu1 %v7218_v0 }
  0xbc   :  { %5066 = vmatprep.subr.bf16.mxu0 %v5065_v43  ;;  %5070 = vmatprep.subr.bf16.mxu1 %v5069_v44  ;;  %v5875_v43 = vsub.s32 6, %v492_v27  ;;  %v5877_v44 = vsub.s32 5, %v492_v27  ;;  %v5928_v27 = vld [vmem:[%s7215_s4 + $0x18] sm:$0xff] }
  0xbd   :  { %4826 = vmatmul.mubr.msk.f32.vlgmr.msra.gmra.mrb[34].mxu0 %vm886_vm1, %v5656_v36  ;;  %4827 = vmatmul.mubr.msk.f32.vlgmr.msra.gmra.mrb[34].mxu1 %vm886_vm1, %v5656_v36 }
  0xbe   :  { %5068 = vmatpush1.bf16.msra.mxu0 %v5067_v47  ;;  %5072 = vmatpush1.bf16.msra.mxu1 %v5071_v48 }
  0xbf   :  { %3510 = vmatprep.mubr.f32.mxu0 %v7218_v0  ;;  %3581 = vmatprep.mubr.f32.mxu1 %v7218_v0 }
  0xc0   :  { %5074 = vmatprep.subr.bf16.mxu0 %v5073_v53  ;;  %5077 = vmatprep.subr.bf16.mxu1 %v5312_v56  ;;  %v5978_v53 = vld [vmem:[%s7215_s4 + $0x28] sm:$0xff] }
  0xc1   :  { %4828 = vmatmul.mubr.msk.f32.vlgmr.msra.gmra.mrb[36].mxu0 %vm886_vm1, %v5656_v36  ;;  %4829 = vmatmul.mubr.msk.f32.vlgmr.msra.gmra.mrb[36].mxu1 %vm886_vm1, %v5656_v36  ;;  %7354 = vst [vmem:[#allocation23_spill] sm:$0xff] %v5978_v53 }
  0xc2   :  { %5076 = vmatpush1.bf16.msra.mxu0 %v5075_v54  ;;  %5079 = vmatpush3.bf16.msra.mxu1 %v5078_v55  ;;  %v5903_v54 = vld [vmem:[%s7215_s4 + $0x10] sm:$0xff] }
  0xc3   :  { %3652 = vmatprep.mubr.f32.mxu0 %v7218_v0  ;;  %4918 = vmatprep.mubr.msk.f32.mxu1 %vm5313_vm2, %v7218_v0 }
  0xc4   :  { %4227 = vperm.xlu1 %5093, %v4222_v57  }
  0xc5   :  { %4830 = vmatmul.mubr.msk.f32.vlgmr.msra.gmra.mrb[38].mxu0 %vm886_vm1, %v5656_v36  ;;  %4919 = vmatmul.mubr.msk.f32.vlgmr.msra.gmra.mrb[38].mxu1 %vm886_vm1, %v5656_v36 }
 0x14c   :  { %v5779_v58 = vpop.f32.mrb[0].mxu0  ;;  %v5781_v59 = vpop.f32.mrb[0].mxu1 }
 0x14d   :  { %v5783_v60 = vpop.f32.mrb[1].mxu0  ;;  %v5785_v61 = vpop.f32.mrb[1].mxu1 }
 0x150   :  { %v5787_v62 = vpop.f32.mrb[2].mxu0  ;;  %v5789_v63 = vpop.f32.mrb[2].mxu1 }
 0x151   :  { %v5791_v1 = vpop.f32.mrb[3].mxu0  ;;  %v5793_v2 = vpop.f32.mrb[3].mxu1 }
 0x154   :  { %v5795_v3 = vpop.f32.mrb[4].mxu0  ;;  %v5797_v4 = vpop.f32.mrb[4].mxu1 }
 0x155   :  { %v5799_v36 = vpop.f32.mrb[5].mxu0  ;;  %v5801_v5 = vpop.f32.mrb[5].mxu1 }
 0x158   :  { %v5803_v6 = vpop.f32.mrb[6].mxu0  ;;  %v5805_v7 = vpop.f32.mrb[6].mxu1 }
 0x159   :  { %v5807_v8 = vpop.f32.mrb[7].mxu0  ;;  %v5809_v9 = vpop.f32.mrb[7].mxu1 }
 0x15c   :  { %v5811_v10 = vpop.f32.mrb[8].mxu0  ;;  %v5813_v11 = vpop.f32.mrb[8].mxu1 }
 0x15d   :  { %v5815_v12 = vpop.f32.mrb[9].mxu0  ;;  %v5817_v13 = vpop.f32.mrb[9].mxu1 }
 0x160   :  { %v5819_v14 = vpop.f32.mrb[10].mxu0  ;;  %v5821_v15 = vpop.f32.mrb[10].mxu1 }
 0x161   :  { %v5823_v16 = vpop.f32.mrb[11].mxu0  ;;  %v5825_v17 = vpop.f32.mrb[11].mxu1 }
 0x164   :  { %v5827_v18 = vpop.f32.mrb[12].mxu0  ;;  %v5829_v19 = vpop.f32.mrb[12].mxu1 }
 0x165   :  { %v5831_v20 = vpop.f32.mrb[13].mxu0  ;;  %v5833_v21 = vpop.f32.mrb[13].mxu1 }
 0x168   :  { %v5835_v23 = vpop.f32.mrb[14].mxu0  ;;  %v5837_v24 = vpop.f32.mrb[14].mxu1 }
 0x169   :  { %v5839_v25 = vpop.f32.mrb[15].mxu0  ;;  %v5841_v26 = vpop.f32.mrb[15].mxu1 }
 0x16c   :  { %v5844_v28 = vpop.f32.mrb[16].mxu0  ;;  %v5846_v29 = vpop.f32.mrb[16].mxu1 }
 0x16d   :  { %v5848_v30 = vpop.f32.mrb[17].mxu0  ;;  %v5850_v31 = vpop.f32.mrb[17].mxu1 }
 0x170   :  { %v5859_v34 = vpop.f32.mrb[18].mxu0  ;;  %v5861_v35 = vpop.f32.mrb[18].mxu1 }
 0x171   :  { %v5871_v41 = vpop.f32.mrb[19].mxu0  ;;  %v5873_v42 = vpop.f32.mrb[19].mxu1 }
 0x174   :  { %v5888_v48 = vpop.f32.mrb[20].mxu0  ;;  %v5890_v49 = vpop.f32.mrb[20].mxu1 }
 0x175   :  { %7346 = vst [vmem:[#allocation15_spill] sm:$0xff] %v5888_v48  ;;  %7347 = vst [vmem:[#allocation16_spill] sm:$0xff] %v5890_v49  ;;  %v5905_v55 = vpop.f32.mrb[21].mxu0  ;;  %v5907_v56 = vpop.f32.mrb[21].mxu1  ;;  %v7363_v48 = vrot.slane %v5855_v32, %v5869_v40  ;;  %v7380_v49 = vrot.slane %v5884_v46, %v5857_v33 }
 0x176   :  { %7348 = vst [vmem:[#allocation17_spill] sm:$0xff] %v5905_v55  ;;  %7349 = vst [vmem:[#allocation18_spill] sm:$0xff] %v5907_v56  ;;  %v6028_v55 = vld [vmem:[%s7215_s4 + $0x38] sm:$0xff] }
 0x178   :  { %v5938_v22 = vpop.f32.mrb[22].mxu0  ;;  %v5940_v47 = vpop.f32.mrb[22].mxu1 }
 0x179   :  { %7350 = vst [vmem:[#allocation19_spill] sm:$0xff] %v5938_v22  ;;  %7351 = vst [vmem:[#allocation20_spill] sm:$0xff] %v5940_v47  ;;  %v5955_v51 = vpop.f32.mrb[23].mxu0  ;;  %v5957_v47 = vpop.f32.mrb[23].mxu1 }
 0x17a   :  { %7352 = vst [vmem:[#allocation21_spill] sm:$0xff] %v5955_v51  ;;  %7353 = vst [vmem:[#allocation22_spill] sm:$0xff] %v5957_v47  ;;  %v6003_v47 = vld [vmem:[%s7215_s4 + $0x30] sm:$0xff] }
 0x17c   :  { %v5988_v0 = vpop.f32.mrb[24].mxu0  ;;  %v5990_v57 = vpop.f32.mrb[24].mxu1 }
 0x17d   :  { %7355 = vst [vmem:[#allocation24_spill] sm:$0xff] %v5988_v0  ;;  %7356 = vst [vmem:[#allocation25_spill] sm:$0xff] %v5990_v57  ;;  %v6005_v51 = vpop.f32.mrb[25].mxu0  ;;  %v6007_v57 = vpop.f32.mrb[25].mxu1  ;;  %v6065_v0 = vld [vmem:[%s7215_s4 + $0x40] sm:$0xff] }
 0x17e   :  { %7357 = vst [vmem:[#allocation26_spill] sm:$0xff] %v6005_v51  ;;  %7358 = vst [vmem:[#allocation27_spill] sm:$0xff] %v6007_v57 }
 0x180   :  { %v6038_v52 = vpop.f32.mrb[26].mxu0  ;;  %v6040_v56 = vpop.f32.mrb[26].mxu1 }
 0x181   :  { %7359 = vst [vmem:[#allocation28_spill] sm:$0xff] %v6038_v52  ;;  %7360 = vst [vmem:[#allocation29_spill] sm:$0xff] %v6040_v56  ;;  %v6050_v51 = vpop.f32.mrb[27].mxu0  ;;  %v6052_v53 = vpop.f32.mrb[27].mxu1 }
 0x182   :  { %7361 = vst [vmem:[#allocation30_spill] sm:$0xff] %v6050_v51  ;;  %7362 = vst [vmem:[#allocation31_spill] sm:$0xff] %v6052_v53  ;;  %v6079_v53 = vadd.f32 %v5787_v62, %v7363_v48  ;;  %v7365_v51 = vrot.slane %v5855_v32, %v5875_v43  ;;  %v7369_v62 = vrot.slane %v5855_v32, %v5877_v44 }
 0x184   :  { %7364 = vst [vmem:[#allocation32_spill] sm:$0xff] %v6079_v53  ;;  %v6085_v22 = vadd.f32 %v5789_v63, %v7365_v51  ;;  %v6087_v52 = vpop.f32.mrb[28].mxu0  ;;  %v6089_v57 = vpop.f32.mrb[28].mxu1  ;;  %v6099_v48 = vadd.f32 %v5791_v1, %v7369_v62  ;;  %v7371_v63 = vrot.slane %v5855_v32, %v5879_v45  ;;  %v7375_v1 = vrot.slane %v5855_v32, %v5857_v33 }
 0x185   :  { %7367 = vst [vmem:[#allocation34_spill] sm:$0xff] %v6087_v52  ;;  %7368 = vst [vmem:[#allocation35_spill] sm:$0xff] %v6089_v57  ;;  %v6107_v52 = vpop.f32.mrb[29].mxu0  ;;  %v6109_v57 = vpop.f32.mrb[29].mxu1 }
 0x186   :  { %7366 = vst [vmem:[#allocation33_spill] sm:$0xff] %v6085_v22  ;;  %7370 = vst [vmem:[#allocation36_spill] sm:$0xff] %v6099_v48  ;;  %v6105_v51 = vadd.f32 %v5793_v2, %v7371_v63  ;;  %v6119_v62 = vadd.f32 %v5779_v58, %v7375_v1  ;;  %v7376_v2 = vrot.slane %v5855_v32, %v5863_v37 }
 0x187   :  { %7373 = vst [vmem:[#allocation38_spill] sm:$0xff] %v6107_v52  ;;  %7374 = vst [vmem:[#allocation39_spill] sm:$0xff] %v6109_v57  ;;  %v7378_v57 = vrot.slane %v5855_v32, %v5865_v38  ;;  %v6137_v52 = vadd.f32 %v5795_v3, %v7380_v49  ;;  %v7381_v58 = vrot.slane %v5855_v32, %v5867_v39 }
 0x188   :  { %7372 = vst [vmem:[#allocation37_spill] sm:$0xff] %v6105_v51  ;;  %v6125_v63 = vadd.f32 %v5781_v59, %v7376_v2  ;;  %v7383_v59 = vrot.slane %v5884_v46, %v5863_v37  ;;  %v7385_v3 = vrot.slane %v5884_v46, %v5867_v39 }
 0x189   :  { %v6131_v56 = vadd.f32 %v5783_v60, %v7378_v57  ;;  %v6143_v1 = vadd.f32 %v5785_v61, %v7381_v58  ;;  %v7384_v60 = vrot.slane %v5884_v46, %v5865_v38  ;;  %v3730_v61 = vmax.f32 %v6119_v62, %v6079_v53 }
 0x18a   :  { %7377 = vst [vmem:[#allocation40_spill] sm:$0xff] %v6125_v63  ;;  %v6149_v2 = vadd.f32 %v5797_v4, %v7383_v59  ;;  %v6161_v32 = vadd.f32 %v5801_v5, %v7385_v3  ;;  %v3732_v49 = vmax.f32 %v6125_v63, %v6085_v22  ;;  %v7387_v4 = vrot.slane %v5884_v46, %v5869_v40  ;;  %v6175_v59 = vpop.f32.mrb[30].mxu1 }
 0x18b   :  { %7379 = vst [vmem:[#allocation41_spill] sm:$0xff] %v6131_v56  ;;  %7382 = vst [vmem:[#allocation42_spill] sm:$0xff] %v6143_v1  ;;  %v6155_v57 = vadd.f32 %v5799_v36, %v7384_v60  ;;  %v6173_v36 = vpop.f32.mrb[30].mxu0  ;;  %v3731_v60 = vmax.f32 %v6131_v56, %v6099_v48  ;;  %v3733_v3 = vmax.f32 %v6143_v1, %v6105_v51  ;;  %v6197_v5 = vpop.f32.mrb[31].mxu1 }
 0x18c   :  { %7386 = vst [vmem:[#allocation43_spill] sm:$0xff] %v6161_v32  ;;  %v6171_v58 = vadd.f32 %v5803_v6, %v7387_v4  ;;  %v7389_v22 = vrot.slane %v5884_v46, %v5875_v43  ;;  %v7391_v6 = vrot.slane %v5884_v46, %v5877_v44  ;;  %v6195_v63 = vpop.f32.mrb[31].mxu0  ;;  %v3734_v48 = vmax.f32 %v3730_v61, %v6137_v52 }
 0x18d   :  { %v7392_v51 = vrot.slane %v5884_v46, %v5879_v45  ;;  %v3735_v56 = vmax.f32 %v3731_v60, %v6155_v57  ;;  %v3737_v61 = vmax.f32 %v3733_v3, %v6161_v32  ;;  %v7394_v46 = vrot.slane %v5903_v54, %v5863_v37 }
 0x18e   :  { %7388 = vst [vmem:[#allocation44_spill] sm:$0xff] %v6171_v58  ;;  %v6187_v53 = vadd.f32 %v5805_v7, %v7389_v22  ;;  %v6193_v4 = vadd.f32 %v5807_v8, %v7391_v6  ;;  %v7393_v7 = vrot.slane %v5903_v54, %v5857_v33  ;;  %v3736_v6 = vmax.f32 %v3732_v49, %v6149_v2 }
 0x18f   :  { %v6204_v1 = vadd.f32 %v5809_v9, %v7392_v51  ;;  %v6221_v9 = vadd.f32 %v5813_v11, %v7394_v46  ;;  %v3738_v51 = vmax.f32 %v3734_v48, %v6171_v58  ;;  %v7397_v49 = vrot.slane %v5903_v54, %v5867_v39  ;;  %v6242_v46 = vpop.f32.mrb[32].mxu0  ;;  %v6244_v48 = vpop.f32.mrb[32].mxu1 }
 0x190   :  { %7390 = vst [vmem:[#allocation45_spill] sm:$0xff] %v6187_v53  ;;  %v6210_v22 = vadd.f32 %v5811_v10, %v7393_v7  ;;  %v7396_v10 = vrot.slane %v5903_v54, %v5865_v38  ;;  %v7398_v3 = vrot.slane %v5903_v54, %v5869_v40  ;;  %v3740_v8 = vmax.f32 %v3736_v6, %v6187_v53 }
 0x191   :  { %7395 = vst [vmem:[#allocation46_spill] sm:$0xff] %v6221_v9  ;;  %v6234_v60 = vadd.f32 %v5817_v13, %v7397_v49  ;;  %v6254_v49 = vpop.f32.mrb[33].mxu0  ;;  %v3741_v58 = vmax.f32 %v3737_v61, %v6204_v1  ;;  %v7406_v53 = vrot.slane %v5928_v27, %v5857_v33 }
 0x192   :  { %v6228_v7 = vadd.f32 %v5815_v12, %v7396_v10  ;;  %v6240_v11 = vadd.f32 %v5819_v14, %v7398_v3  ;;  %v3739_v12 = vmax.f32 %v3735_v56, %v6193_v4  ;;  %v7400_v10 = vrot.slane %v5903_v54, %v5875_v43  ;;  %v6258_v3 = vpop.f32.mrb[33].mxu1 }
 0x193   :  { %v3742_v32 = vmax.f32 %v3738_v51, %v6210_v22  ;;  %v7402_v56 = vrot.slane %v5903_v54, %v5877_v44  ;;  %v3744_v14 = vmax.f32 %v3740_v8, %v6221_v9  ;;  %v6279_v61 = vadd.f32 %v5827_v18, %v7406_v53  ;;  %v6298_v53 = vpop.f32.mrb[34].mxu0  ;;  %v6300_v9 = vpop.f32.mrb[34].mxu1 }
 0x194   :  { %7399 = vst [vmem:[#allocation47_spill] sm:$0xff] %v6240_v11  ;;  %v6252_v13 = vadd.f32 %v5821_v15, %v7400_v10  ;;  %v7404_v15 = vrot.slane %v5903_v54, %v5879_v45  ;;  %v7408_v51 = vrot.slane %v5928_v27, %v5863_v37  ;;  %v6321_v54 = vpop.f32.mrb[35].mxu0 }
 0x195   :  { %v6266_v6 = vadd.f32 %v5823_v16, %v7402_v56  ;;  %7407 = vst [vmem:[#allocation51_spill] sm:$0xff] %v6279_v61  ;;  %v3745_v56 = vmax.f32 %v3741_v58, %v6234_v60  ;;  %v3746_v8 = vmax.f32 %v3742_v32, %v6240_v11  ;;  %v7414_v32 = vrot.slane %v5928_v27, %v5869_v40 }
 0x196   :  { %7401 = vst [vmem:[#allocation48_spill] sm:$0xff] %v6252_v13  ;;  %v6272_v10 = vadd.f32 %v5825_v17, %v7404_v15  ;;  %v6285_v16 = vadd.f32 %v5829_v19, %v7408_v51  ;;  %v3743_v17 = vmax.f32 %v3739_v12, %v6228_v7  ;;  %v7410_v15 = vrot.slane %v5928_v27, %v5865_v38 }
 0x197   :  { %7403 = vst [vmem:[#allocation49_spill] sm:$0xff] %v6266_v6  ;;  %v3748_v19 = vmax.f32 %v3744_v14, %v6252_v13  ;;  %v7412_v51 = vrot.slane %v5928_v27, %v5867_v39  ;;  %v6313_v58 = vadd.f32 %v5835_v23, %v7414_v32  ;;  %v6323_v14 = vpop.f32.mrb[35].mxu1  ;;  %v7420_v11 = vrot.slane %v5928_v27, %v5879_v45 }
 0x198   :  { %7405 = vst [vmem:[#allocation50_spill] sm:$0xff] %v6272_v10  ;;  %7409 = vst [vmem:[#allocation52_spill] sm:$0xff] %v6285_v16  ;;  %v6296_v18 = vadd.f32 %v5831_v20, %v7410_v15  ;;  %v7416_v20 = vrot.slane %v5928_v27, %v5875_v43  ;;  %v3747_v13 = vmax.f32 %v3743_v17, %v6266_v6 }
 0x199   :  { %v6307_v12 = vadd.f32 %v5833_v21, %v7412_v51  ;;  %7415 = vst [vmem:[#allocation55_spill] sm:$0xff] %v6313_v58  ;;  %v3749_v21 = vmax.f32 %v3745_v56, %v6272_v10  ;;  %v7418_v51 = vrot.slane %v5928_v27, %v5877_v44  ;;  %v6341_v17 = vadd.f32 %v5841_v26, %v7420_v11 }
 0x19a   :  { %7411 = vst [vmem:[#allocation53_spill] sm:$0xff] %v6296_v18  ;;  %v6319_v15 = vadd.f32 %v5837_v24, %v7416_v20  ;;  %v3750_v24 = vmax.f32 %v3746_v8, %v6279_v61  ;;  %v3752_v20 = vmax.f32 %v3748_v19, %v6285_v16  ;;  %v7422_v56 = vrot.slane %v5953_v50, %v5857_v33  ;;  %v6364_v19 = vpop.f32.mrb[36].mxu0 }
 0x19b   :  { %7413 = vst [vmem:[#allocation54_spill] sm:$0xff] %v6307_v12  ;;  %v6331_v23 = vadd.f32 %v5839_v25, %v7418_v51  ;;  %7421 = vst [vmem:[#allocation58_spill] sm:$0xff] %v6341_v17  ;;  %v3751_v25 = vmax.f32 %v3747_v13, %v6296_v18  ;;  %v7424_v51 = vrot.slane %v5953_v50, %v5863_v37 }
 0x19c   :  { %7417 = vst [vmem:[#allocation56_spill] sm:$0xff] %v6319_v15  ;;  %v6347_v10 = vadd.f32 %v5844_v28, %v7422_v56  ;;  %v7426_v27 = vrot.slane %v5953_v50, %v5865_v38  ;;  %v6366_v28 = vpop.f32.mrb[36].mxu1  ;;  %v3753_v13 = vmax.f32 %v3749_v21, %v6307_v12  ;;  %v3754_v56 = vmax.f32 %v3750_v24, %v6313_v58  ;;  %v7440_v12 = vld [vmem:[#allocation15_spill] sm:$0xff] }
 0x19d   :  { %7419 = vst [vmem:[#allocation57_spill] sm:$0xff] %v6331_v23  ;;  %v6354_v8 = vadd.f32 %v5846_v29, %v7424_v51  ;;  %v3756_v29 = vmax.f32 %v3752_v20, %v6319_v15  ;;  %v7428_v51 = vrot.slane %v5953_v50, %v5867_v39  ;;  %v3755_v11 = vmax.f32 %v3751_v25, %v6331_v23  ;;  %v6403_v25 = vld [vmem:[%s7215_s4 + $0x48] sm:$0xff]  ;;  %v7438_v23 = vld [vmem:[#allocation23_spill] sm:$0xff] }
 0x19e   :  { %7423 = vst [vmem:[#allocation59_spill] sm:$0xff] %v6347_v10  ;;  %v6360_v26 = vadd.f32 %v5848_v30, %v7426_v27  ;;  %v6377_v30 = vpop.f32.mrb[37].mxu0  ;;  %v6379_v27 = vpop.f32.mrb[37].mxu1  ;;  %v7430_v16 = vrot.slane %v5953_v50, %v5869_v40  ;;  %v7432_v24 = vrot.slane %v5953_v50, %v5875_v43  ;;  %v7436_v15 = vrot.slane %v5953_v50, %v5879_v45 }
 0x19f   :  { %7425 = vst [vmem:[#allocation60_spill] sm:$0xff] %v6354_v8  ;;  %v6375_v32 = vadd.f32 %v5850_v31, %v7428_v51  ;;  %v7434_v31 = vrot.slane %v5953_v50, %v5877_v44  ;;  %v7439_v58 = vrot.slane %v7438_v23, %v5857_v33  ;;  %v7443_v50 = vld [vmem:[#allocation16_spill] sm:$0xff] }
 0x1a0   :  { %7427 = vst [vmem:[#allocation61_spill] sm:$0xff] %v6360_v26  ;;  %v6386_v21 = vadd.f32 %v5859_v34, %v7430_v16  ;;  %v6392_v20 = vadd.f32 %v5861_v35, %v7432_v24  ;;  %v3757_v34 = vmax.f32 %v3753_v13, %v6341_v17  ;;  %v3758_v16 = vmax.f32 %v3754_v56, %v6347_v10  ;;  %v7446_v24 = vld [vmem:[#allocation17_spill] sm:$0xff] }
 0x1a1   :  { %7429 = vst [vmem:[#allocation62_spill] sm:$0xff] %v6375_v32  ;;  %v6398_v51 = vadd.f32 %v5871_v41, %v7434_v31  ;;  %v6411_v35 = vadd.f32 %v5873_v42, %v7436_v15  ;;  %v3760_v41 = vmax.f32 %v3756_v29, %v6354_v8  ;;  %v3759_v31 = vmax.f32 %v3755_v11, %v6360_v26  ;;  %v6429_v42 = vpop.f32.mrb[38].mxu0  ;;  %v6431_v15 = vpop.f32.mrb[38].mxu1 }
 0x1a2   :  { %7431 = vst [vmem:[#allocation63_spill] sm:$0xff] %v6386_v21  ;;  %7433 = vst [vmem:[#allocation64_spill] sm:$0xff] %v6392_v20  ;;  %v6421_v13 = vadd.f32 %v7440_v12, %v7439_v58  ;;  %v7442_v56 = vrot.slane %v7438_v23, %v5863_v37  ;;  %v3761_v29 = vmax.f32 %v3757_v34, %v6375_v32  ;;  %v7449_v58 = vld [vmem:[#allocation18_spill] sm:$0xff]  ;;  %v4920_v17 = vpop.f32.mrb[39].mxu1 }
 0x1a3   :  { %7435 = vst [vmem:[#allocation65_spill] sm:$0xff] %v6398_v51  ;;  %7437 = vst [vmem:[#allocation66_spill] sm:$0xff] %v6411_v35  ;;  %v7445_v11 = vrot.slane %v7438_v23, %v5865_v38  ;;  %v7448_v12 = vrot.slane %v7438_v23, %v5867_v39  ;;  %v3762_v34 = vmax.f32 %v3758_v16, %v6386_v21  ;;  %v7458_v16 = vld [vmem:[#allocation21_spill] sm:$0xff] }
 0x1a4   :  { %7441 = vst [vmem:[#allocation23_spill] sm:$0xff] %v6421_v13  ;;  %v6427_v10 = vadd.f32 %v7443_v50, %v7442_v56  ;;  %v6448_v50 = vpop.f32.mrb[39].mxu0  ;;  %v3764_v32 = vmax.f32 %v3760_v41, %v6392_v20  ;;  %v3763_v18 = vmax.f32 %v3759_v31, %v6398_v51  ;;  %v7455_v56 = vld [vmem:[#allocation20_spill] sm:$0xff]  ;;  %v7457_v17 = vrot.slane %v7438_v23, %v5877_v44  ;;  %v7460_v20 = vld [vmem:[#allocation22_spill] sm:$0xff] }
 0x1a5   :  { %v6438_v8 = vadd.f32 %v7446_v24, %v7445_v11  ;;  %v6444_v26 = vadd.f32 %v7449_v58, %v7448_v12  ;;  %v7451_v24 = vrot.slane %v7438_v23, %v5869_v40  ;;  %v7452_v11 = vld [vmem:[#allocation19_spill] sm:$0xff]  ;;  %v3765_v12 = vmax.f32 %v3761_v29, %v6411_v35 }
 0x1a6   :  { %7444 = vst [vmem:[#allocation15_spill] sm:$0xff] %v6427_v10  ;;  %v7454_v58 = vrot.slane %v7438_v23, %v5875_v43  ;;  %v6470_v41 = vadd.f32 %v7458_v16, %v7457_v17  ;;  %v7459_v31 = vrot.slane %v7438_v23, %v5879_v45  ;;  %v3766_v29 = vmax.f32 %v3762_v34, %v6421_v13 }
 0x1a7   :  { %7447 = vst [vmem:[#allocation16_spill] sm:$0xff] %v6438_v8  ;;  %7450 = vst [vmem:[#allocation17_spill] sm:$0xff] %v6444_v26  ;;  %v6457_v61 = vadd.f32 %v7452_v11, %v7451_v24  ;;  %v3768_v11 = vmax.f32 %v3764_v32, %v6427_v10  ;;  %v790_v17 = vrot.slane %v6403_v25, %v5863_v37  ;;  %v7469_v10 = vld [vmem:[#allocation26_spill] sm:$0xff] }
 0x1a8   :  { %v6464_v6 = vadd.f32 %v7455_v56, %v7454_v58  ;;  %v6476_v24 = vadd.f32 %v7460_v20, %v7459_v31  ;;  %v7462_v56 = vrot.slane %v6003_v47, %v5857_v33  ;;  %v7463_v58 = vld [vmem:[#allocation24_spill] sm:$0xff]  ;;  %v3767_v16 = vmax.f32 %v3763_v18, %v6438_v8  ;;  %v7466_v31 = vld [vmem:[#allocation25_spill] sm:$0xff]  ;;  %v7472_v18 = vld [vmem:[#allocation27_spill] sm:$0xff] }
 0x1a9   :  { %7453 = vst [vmem:[#allocation18_spill] sm:$0xff] %v6457_v61  ;;  %v3769_v23 = vmax.f32 %v3765_v12, %v6444_v26  ;;  %v7465_v20 = vrot.slane %v6003_v47, %v5863_v37  ;;  %v7468_v32 = vrot.slane %v6003_v47, %v5865_v38  ;;  %v7473_v12 = vrot.slane %v6003_v47, %v5869_v40  ;;  %v7474_v26 = vld [vmem:[#allocation28_spill] sm:$0xff] }
 0x1aa   :  { %7456 = vst [vmem:[#allocation19_spill] sm:$0xff] %v6464_v6  ;;  %7461 = vst [vmem:[#allocation20_spill] sm:$0xff] %v6476_v24  ;;  %v6484_v35 = vadd.f32 %v7463_v58, %v7462_v56  ;;  %v3770_v56 = vmax.f32 %v3766_v29, %v6457_v61  ;;  %v7471_v58 = vrot.slane %v6003_v47, %v5867_v39 }
 0x1ab   :  { %v6494_v34 = vadd.f32 %v7466_v31, %v7465_v20  ;;  %v6500_v13 = vadd.f32 %v7469_v10, %v7468_v32  ;;  %v6513_v20 = vadd.f32 %v7474_v26, %v7473_v12  ;;  %v786_v31 = vrot.slane %v6403_v25, %v5865_v38  ;;  %v7479_v12 = vld [vmem:[#allocation30_spill] sm:$0xff] }
 0x1ac   :  { %7464 = vst [vmem:[#allocation21_spill] sm:$0xff] %v6484_v35  ;;  %v6507_v8 = vadd.f32 %v7472_v18, %v7471_v58  ;;  %v3772_v10 = vmax.f32 %v3768_v11, %v6464_v6  ;;  %v3771_v32 = vmax.f32 %v3767_v16, %v6470_v41  ;;  %v3773_v29 = vmax.f32 %v3769_v23, %v6476_v24  ;;  %v7476_v58 = vld [vmem:[#allocation29_spill] sm:$0xff]  ;;  %v7481_v16 = vld [vmem:[#allocation31_spill] sm:$0xff]  ;;  %v7483_v24 = vld [vmem:[#allocation34_spill] sm:$0xff] }
 0x1ad   :  { %7467 = vst [vmem:[#allocation22_spill] sm:$0xff] %v6494_v34  ;;  %7470 = vst [vmem:[#allocation24_spill] sm:$0xff] %v6500_v13  ;;  %v7475_v61 = vrot.slane %v6003_v47, %v5875_v43  ;;  %v3774_v51 = vmax.f32 %v3770_v56, %v6484_v35  ;;  %v7478_v26 = vrot.slane %v6003_v47, %v5877_v44 }
 0x1ae   :  { %v7480_v11 = vrot.slane %v6003_v47, %v5879_v45  ;;  %v7482_v23 = vrot.slane %v6028_v55, %v5857_v33  ;;  %v3776_v56 = vmax.f32 %v3772_v10, %v6494_v34  ;;  %v794_v47 = vrot.slane %v6403_v25, %v5867_v39  ;;  %v7489_v34 = vld [vmem:[#allocation39_spill] sm:$0xff] }
 0x1af   :  { %v6524_v18 = vadd.f32 %v7476_v58, %v7475_v61  ;;  %v6531_v21 = vadd.f32 %v7479_v12, %v7478_v26  ;;  %v3775_v58 = vmax.f32 %v3771_v32, %v6500_v13  ;;  %v7484_v26 = vrot.slane %v6028_v55, %v5863_v37  ;;  %v7485_v12 = vld [vmem:[#allocation35_spill] sm:$0xff] }
 0x1b0   :  { %v6537_v6 = vadd.f32 %v7481_v16, %v7480_v11  ;;  %v6543_v61 = vadd.f32 %v7483_v24, %v7482_v23  ;;  %v3777_v11 = vmax.f32 %v3773_v29, %v6507_v8  ;;  %v3778_v16 = vmax.f32 %v3774_v51, %v6513_v20  ;;  %v7487_v23 = vld [vmem:[#allocation38_spill] sm:$0xff] }
 0x1b1   :  { %7477 = vst [vmem:[#allocation25_spill] sm:$0xff] %v6524_v18  ;;  %v6551_v35 = vadd.f32 %v7485_v12, %v7484_v26  ;;  %v7486_v24 = vrot.slane %v6028_v55, %v5865_v38  ;;  %v7488_v32 = vrot.slane %v6028_v55, %v5867_v39  ;;  %v3780_v26 = vmax.f32 %v3776_v56, %v6524_v18 }
 0x1b2   :  { %v7490_v12 = vrot.slane %v6028_v55, %v5869_v40  ;;  %v7492_v51 = vrot.slane %v6028_v55, %v5875_v43  ;;  %v3782_v56 = vmax.f32 %v3778_v16, %v6543_v61  ;;  %v7494_v18 = vrot.slane %v6028_v55, %v5877_v44 }
 0x1b3   :  { %v6561_v10 = vadd.f32 %v7487_v23, %v7486_v24  ;;  %v6567_v13 = vadd.f32 %v7489_v34, %v7488_v32  ;;  %v798_v23 = vrot.slane %v6403_v25, %v5869_v40  ;;  %v3779_v34 = vmax.f32 %v3775_v58, %v6531_v21 }
 0x1b4   :  { %v6574_v29 = vadd.f32 %v6173_v36, %v7490_v12  ;;  %v6580_v24 = vadd.f32 %v6175_v59, %v7492_v51  ;;  %v3781_v32 = vmax.f32 %v3777_v11, %v6537_v6  ;;  %v6591_v36 = vadd.f32 %v6195_v63, %v7494_v18 }
 0x1b5   :  { %v3784_v12 = vmax.f32 %v3780_v26, %v6551_v35  ;;  %v7496_v59 = vrot.slane %v6028_v55, %v5879_v45  ;;  %v7498_v58 = vrot.slane %v6065_v0, %v5857_v33  ;;  %v7500_v16 = vrot.slane %v6065_v0, %v5863_v37 }
 0x1b6   :  { %7491 = vst [vmem:[#allocation26_spill] sm:$0xff] %v6574_v29  ;;  %7493 = vst [vmem:[#allocation27_spill] sm:$0xff] %v6580_v24  ;;  %v3783_v18 = vmax.f32 %v3779_v34, %v6561_v10  ;;  %v3785_v26 = vmax.f32 %v3781_v32, %v6567_v13  ;;  %v7502_v55 = vrot.slane %v6065_v0, %v5865_v38 }
 0x1b7   :  { %7495 = vst [vmem:[#allocation28_spill] sm:$0xff] %v6591_v36  ;;  %v6598_v51 = vadd.f32 %v6197_v5, %v7496_v59  ;;  %v6604_v11 = vadd.f32 %v6242_v46, %v7498_v58  ;;  %v6610_v63 = vadd.f32 %v6244_v48, %v7500_v16  ;;  %v806_v46 = vrot.slane %v6403_v25, %v5875_v43 }
 0x1b8   :  { %v6618_v5 = vadd.f32 %v6254_v49, %v7502_v55  ;;  %v3786_v59 = vmax.f32 %v3782_v56, %v6574_v29  ;;  %v3788_v37 = vmax.f32 %v3784_v12, %v6580_v24  ;;  %v7504_v48 = vrot.slane %v6065_v0, %v5867_v39 }
 0x1b9   :  { %7497 = vst [vmem:[#allocation29_spill] sm:$0xff] %v6598_v51  ;;  %7499 = vst [vmem:[#allocation30_spill] sm:$0xff] %v6604_v11  ;;  %v7506_v32 = vrot.slane %v6065_v0, %v5869_v40  ;;  %v3787_v49 = vmax.f32 %v3783_v18, %v6591_v36  ;;  %v7508_v58 = vrot.slane %v6065_v0, %v5875_v43 }
 0x1ba   :  { %7501 = vst [vmem:[#allocation31_spill] sm:$0xff] %v6610_v63  ;;  %7503 = vst [vmem:[#allocation34_spill] sm:$0xff] %v6618_v5  ;;  %v6628_v34 = vadd.f32 %v6258_v3, %v7504_v48  ;;  %v7510_v39 = vrot.slane %v6065_v0, %v5877_v44  ;;  %v802_v40 = vrot.slane %v6403_v25, %v5877_v44  ;;  %v5314_v48 = vmov -1e+30  }
 0x1bb   :  { %v6634_v38 = vadd.f32 %v6298_v53, %v7506_v32  ;;  %v6641_v56 = vadd.f32 %v6300_v9, %v7508_v58  ;;  %v3789_v53 = vmax.f32 %v3785_v26, %v6598_v51  ;;  %v3790_v12 = vmax.f32 %v3786_v59, %v6604_v11  ;;  %309 = vst.msk [vmem:[#allocation3] sm:$0xff] %vm308_vm3, %v5314_v48  ;;  %v7552_v51 = vld [vmem:[#allocation62_spill] sm:$0xff] }
 0x1bc   :  { %7505 = vst [vmem:[#allocation35_spill] sm:$0xff] %v6628_v34  ;;  %v6647_v3 = vadd.f32 %v6321_v54, %v7510_v39  ;;  %v3792_v16 = vmax.f32 %v3788_v37, %v6610_v63  ;;  %v7512_v43 = vrot.slane %v6403_v25, %v5857_v33  ;;  %v3791_v18 = vmax.f32 %v3787_v49, %v6618_v5 }
 0x1bd   :  { %7507 = vst [vmem:[#allocation38_spill] sm:$0xff] %v6634_v38  ;;  %7509 = vst [vmem:[#allocation39_spill] sm:$0xff] %v6641_v56  ;;  %v7514_v54 = vrot.slane %v6065_v0, %v5879_v45  ;;  %v6668_v44 = vadd.f32 %v6366_v28, %v790_v17  ;;  %v6671_v26 = vadd.f32 %v6377_v30, %v786_v31 }
 0x1be   :  { %7511 = vst [vmem:[#allocation67_spill] sm:$0xff] %v6647_v3  ;;  %v6658_v9 = vadd.f32 %v6364_v19, %v7512_v43  ;;  %v3793_v59 = vmax.f32 %v3789_v53, %v6628_v34  ;;  %v3794_v33 = vmax.f32 %v3790_v12, %v6634_v38  ;;  %v3796_v19 = vmax.f32 %v3792_v16, %v6641_v56  ;;  %v6716_v43 = vpop.permute.xlu1 %4227 }
 0x1bf   :  { %v6665_v55 = vadd.f32 %v6323_v14, %v7514_v54  ;;  %7516 = vst [vmem:[#allocation70_spill] sm:$0xff] %v6668_v44  ;;  %7517 = vst [vmem:[#allocation71_spill] sm:$0xff] %v6671_v26  ;;  %v3795_v25 = vmax.f32 %v3791_v18, %v6647_v3  ;;  %v6678_v37 = vadd.f32 %v6379_v27, %v794_v47  ;;  %v7525_v53 = vlaneseq }
 0x1c0   :  { %7513 = vst [vmem:[#allocation68_spill] sm:$0xff] %v6658_v9  ;;  %v6681_v0 = vadd.f32 %v6429_v42, %v798_v23  ;;  %v3798_v45 = vmax.f32 %v3794_v33, %v6658_v9  ;;  %v6685_v14 = vadd.f32 %v6431_v15, %v806_v46  ;;  %v6688_v28 = vadd.f32 %v6448_v50, %v802_v40 }
 0x1c1   :  { %7515 = vst [vmem:[#allocation69_spill] sm:$0xff] %v6665_v55  ;;  %7518 = vst [vmem:[#allocation72_spill] sm:$0xff] %v6678_v37  ;;  %v3797_v30 = vmax.f32 %v3793_v59, %v6665_v55  ;;  %v3800_v17 = vmax.f32 %v3796_v19, %v6668_v44  ;;  %v3799_v31 = vmax.f32 %v3795_v25, %v6671_v26  ;;  %v7522_v50 = vmov 0.0   ;;  %v7526_v19 = vld [vmem:[#allocation41_spill] sm:$0xff] }
 0x1c2   :  { %7519 = vst [vmem:[#allocation73_spill] sm:$0xff] %v6681_v0  ;;  %7520 = vst [vmem:[#allocation74_spill] sm:$0xff] %v6685_v14  ;;  %v3802_v27 = vmax.f32 %v3798_v45, %v6681_v0  ;;  %v6702_v49 = vld [vmem:[#allocation3] sm:$0xff]  ;;  %v6713_v12 = vand.u32 127, %v7525_v53 }
 0x1c3   :  { %7521 = vst [vmem:[#allocation75_spill] sm:$0xff] %v6688_v28  ;;  %v3801_v47 = vmax.f32 %v3797_v30, %v6678_v37  ;;  %v3803_v42 = vmax.f32 %v3799_v31, %v6688_v28  ;;  %v3804_v23 = vmax.f32 %v3800_v17, %v6685_v14  ;;  %310 = vst.msk [vmem:[#allocation4] sm:$0xff] %vm308_vm3, %v7522_v50 }
 0x1c4   :  { %311 = vst.msk [vmem:[#allocation5] sm:$0xff] %vm308_vm3, %v7522_v50  ;;  %7523 = vst [vmem:[#allocation76_spill] sm:$0xff] %v6702_v49  ;;  %v4144_v16 = vadd.s32 128, %v6713_v12  ;;  %vm4229_vm4 = vcmp.eq.s32.totalorder %v6713_v12, %v6716_v43  ;;  %v4145_v18 = vadd.s32 256, %v6713_v12  ;;  %v4146_v45 = vadd.s32 384, %v6713_v12 }
 0x1c5   :  { %v3805_v15 = vmax.f32 %v3802_v27, %v3803_v42  ;;  %v3806_v46 = vmax.f32 %v3804_v23, %v3801_v47  ;;  %v4832_v54 = vsel %vm4229_vm4, 1.0, %v7522_v50  ;;  %v4147_v31 = vadd.s32 512, %v6713_v12  ;;  %v7527_v27 = vld [vmem:[#allocation40_spill] sm:$0xff] }
 0x1c6   :  { %vm4230_vm5 = vcmp.eq.s32.totalorder %v4144_v16, %v6716_v43  ;;  %v4467_v33 = vmul.f32 %v4832_v54, %v6119_v62  ;;  %vm4231_vm6 = vcmp.eq.s32.totalorder %v4145_v18, %v6716_v43  ;;  %vm4232_vm7 = vcmp.eq.s32.totalorder %v4146_v45, %v6716_v43  ;;  %v7529_v16 = vld [vmem:[#allocation32_spill] sm:$0xff] }
 0x1c7   :  { %v3807_v32 = vmax.f32 %v3805_v15, %v3806_v46  ;;  %v4833_v59 = vsel %vm4230_vm5, 1.0, %v7522_v50  ;;  %v4834_v30 = vsel %vm4231_vm6, 1.0, %v7522_v50  ;;  %v4835_v42 = vsel %vm4232_vm7, 1.0, %v7522_v50  ;;  %v7528_v46 = vld [vmem:[#allocation42_spill] sm:$0xff] }
 0x1c8   :  { %v4468_v25 = vmul.f32 %v4833_v59, %v7526_v19  ;;  %v4469_v47 = vmul.f32 %v4834_v30, %v7527_v27  ;;  %vm4233_vm8 = vcmp.eq.s32.totalorder %v4147_v31, %v6716_v43  ;;  %v4148_v15 = vadd.s32 640, %v6713_v12 }
 0x1c9   :  { %3808 = vmax.xlane.f32.xlu0 %v3807_v32  ;;  %v4470_v48 = vmul.f32 %v4835_v42, %v7528_v46  ;;  %v4836_v32 = vsel %vm4233_vm8, 1.0, %v7522_v50  ;;  %v4149_v53 = vadd.s32 768, %v6713_v12  ;;  %v4151_v31 = vadd.s32 1024, %v6713_v12 }
 0x1ca   :  { %v4546_v17 = vadd.f32 %v4468_v25, %v4467_v33  ;;  %vm4234_vm9 = vcmp.eq.s32.totalorder %v4148_v15, %v6716_v43  ;;  %v4471_v18 = vmul.f32 %v4836_v32, %v7529_v16  ;;  %v4150_v33 = vadd.s32 896, %v6713_v12  ;;  %v7530_v25 = vld [vmem:[#allocation36_spill] sm:$0xff]  ;;  %v7532_v32 = vld [vmem:[#allocation37_spill] sm:$0xff] }
 0x1cb   :  { %v4837_v54 = vsel %vm4234_vm9, 1.0, %v7522_v50  ;;  %vm4235_vm10 = vcmp.eq.s32.totalorder %v4149_v53, %v6716_v43  ;;  %vm4237_vm12 = vcmp.eq.s32.totalorder %v4151_v31, %v6716_v43  ;;  %v4181_v36 = vadd.s32 4864, %v6713_v12 }
 0x1cc   :  { %v4547_v23 = vadd.f32 %v4546_v17, %v4469_v47  ;;  %v4472_v45 = vmul.f32 %v4837_v54, %v7530_v25  ;;  %v4838_v30 = vsel %vm4235_vm10, 1.0, %v7522_v50  ;;  %vm4236_vm11 = vcmp.eq.s32.totalorder %v4150_v33, %v6716_v43  ;;  %v7531_v47 = vld [vmem:[#allocation33_spill] sm:$0xff] }
 0x1cd   :  { %v4473_v42 = vmul.f32 %v4838_v30, %v7531_v47  ;;  %v4840_v53 = vsel %vm4237_vm12, 1.0, %v7522_v50  ;;  %v4153_v54 = vadd.s32 1280, %v6713_v12  ;;  %v4154_v30 = vadd.s32 1408, %v6713_v12 }
 0x1cf   :  { %vm4239_vm14 = vcmp.eq.s32.totalorder %v4153_v54, %v6716_v43  ;;  %vm4240_vm15 = vcmp.eq.s32.totalorder %v4154_v30, %v6716_v43  ;;  %v7534_v30 = vld [vmem:[#allocation44_spill] sm:$0xff] }
 0x1d0   :  { %v4842_v31 = vsel %vm4239_vm14, 1.0, %v7522_v50 }
 0x256   :  { %v3809_v58 = vpop.xlane.xlu0 %3808 }
 0x257   :  { %v6705_v39 = vmax.f32 %v6702_v49, %v3809_v58  ;;  %v4548_v58 = vadd.f32 %v4547_v23, %v4470_v48  ;;  %v4839_v23 = vsel %vm4236_vm11, 1.0, %v7522_v50  ;;  %v4152_v48 = vadd.s32 1152, %v6713_v12 }
 0x259   :  { %7524 = vst [vmem:[#allocation77_spill] sm:$0xff] %v6705_v39  ;;  %4141 = vst.msk [vmem:[#allocation3] sm:$0xff] %vm308_vm3, %v6705_v39  ;;  %3818 = vperm.xlu0 %5092, %v6705_v39   ;;  %v4549_v59 = vadd.f32 %v4548_v58, %v4471_v18  ;;  %v4474_v58 = vmul.f32 %v4839_v23, %v7532_v32  ;;  %vm4238_vm13 = vcmp.eq.s32.totalorder %v4152_v48, %v6716_v43 }
 0x25a   :  { %v4841_v33 = vsel %vm4238_vm13, 1.0, %v7522_v50  ;;  %v4155_v23 = vadd.s32 1536, %v6713_v12  ;;  %v4843_v48 = vsel %vm4240_vm15, 1.0, %v7522_v50 }
 0x25b   :  { %v4550_v17 = vadd.f32 %v4549_v59, %v4472_v45  ;;  %v4475_v59 = vmul.f32 %v4840_v53, %v6137_v52  ;;  %v4156_v53 = vadd.s32 1664, %v6713_v12 }
 0x25c   :  { %vm4241_vm0 = vcmp.eq.s32.totalorder %v4155_v23, %v6716_v43 }
 0x25d   :  { %v4551_v15 = vadd.f32 %v4550_v17, %v4473_v42  ;;  %v4476_v17 = vmul.f32 %v4841_v33, %v6155_v57  ;;  %vm4242_vm1 = vcmp.eq.s32.totalorder %v4156_v53, %v6716_v43 }
 0x25f   :  { %v4552_v18 = vadd.f32 %v4551_v15, %v4474_v58  ;;  %v4477_v15 = vmul.f32 %v4842_v31, %v6149_v2  ;;  %v4845_v31 = vsel %vm4242_vm1, 1.0, %v7522_v50 }
 0x260   :  { %v4480_v23 = vmul.f32 %v4845_v31, %v6193_v4 }
 0x261   :  { %v4553_v45 = vadd.f32 %v4552_v18, %v4475_v59  ;;  %v7533_v18 = vld [vmem:[#allocation43_spill] sm:$0xff]  ;;  %v4844_v59 = vsel %vm4241_vm0, 1.0, %v7522_v50 }
 0x262   :  { %v4478_v54 = vmul.f32 %v4843_v48, %v7533_v18 }
 0x263   :  { %v4554_v42 = vadd.f32 %v4553_v45, %v4476_v17  ;;  %v4157_v45 = vadd.s32 1792, %v6713_v12  ;;  %v4479_v17 = vmul.f32 %v4844_v59, %v7534_v30 }
 0x265   :  { %v4555_v58 = vadd.f32 %v4554_v42, %v4477_v15  ;;  %vm4243_vm2 = vcmp.eq.s32.totalorder %v4157_v45, %v6716_v43  ;;  %v4158_v42 = vadd.s32 1920, %v6713_v12 }
 0x266   :  { %v4846_v15 = vsel %vm4243_vm2, 1.0, %v7522_v50 }
 0x267   :  { %v4556_v33 = vadd.f32 %v4555_v58, %v4478_v54  ;;  %vm4244_vm4 = vcmp.eq.s32.totalorder %v4158_v42, %v6716_v43  ;;  %v4159_v58 = vadd.s32 2048, %v6713_v12  ;;  %v7535_v54 = vld [vmem:[#allocation45_spill] sm:$0xff] }
 0x268   :  { %v4481_v53 = vmul.f32 %v4846_v15, %v7535_v54  ;;  %v4847_v59 = vsel %vm4244_vm4, 1.0, %v7522_v50 }
 0x269   :  { %v4557_v40 = vadd.f32 %v4556_v33, %v4479_v17  ;;  %vm4245_vm5 = vcmp.eq.s32.totalorder %v4159_v58, %v6716_v43  ;;  %v4160_v33 = vadd.s32 2176, %v6713_v12  ;;  %v4482_v45 = vmul.f32 %v4847_v59, %v6204_v1 }
 0x26a   :  { %v4848_v17 = vsel %vm4245_vm5, 1.0, %v7522_v50 }
 0x26b   :  { %v4558_v48 = vadd.f32 %v4557_v40, %v4480_v23  ;;  %v4161_v40 = vadd.s32 2304, %v6713_v12  ;;  %vm4246_vm6 = vcmp.eq.s32.totalorder %v4160_v33, %v6716_v43  ;;  %v4483_v42 = vmul.f32 %v4848_v17, %v6210_v22 }
 0x26c   :  { %v4849_v23 = vsel %vm4246_vm6, 1.0, %v7522_v50 }
 0x26d   :  { %v4559_v39 = vadd.f32 %v4558_v48, %v4481_v53  ;;  %vm4247_vm7 = vcmp.eq.s32.totalorder %v4161_v40, %v6716_v43  ;;  %v4162_v48 = vadd.s32 2432, %v6713_v12  ;;  %v4484_v58 = vmul.f32 %v4849_v23, %v6228_v7 }
 0x26e   :  { %v4850_v53 = vsel %vm4247_vm7, 1.0, %v7522_v50 }
 0x26f   :  { %v4560_v31 = vadd.f32 %v4559_v39, %v4482_v45  ;;  %vm4248_vm8 = vcmp.eq.s32.totalorder %v4162_v48, %v6716_v43  ;;  %v4163_v39 = vadd.s32 2560, %v6713_v12  ;;  %v7536_v45 = vld [vmem:[#allocation46_spill] sm:$0xff]  ;;  %v7537_v48 = vld [vmem:[#allocation47_spill] sm:$0xff] }
 0x270   :  { %v4485_v33 = vmul.f32 %v4850_v53, %v7536_v45  ;;  %v4851_v17 = vsel %vm4248_vm8, 1.0, %v7522_v50 }
 0x271   :  { %v4561_v15 = vadd.f32 %v4560_v31, %v4483_v42  ;;  %vm4249_vm9 = vcmp.eq.s32.totalorder %v4163_v39, %v6716_v43  ;;  %v4164_v31 = vadd.s32 2688, %v6713_v12  ;;  %v4486_v40 = vmul.f32 %v4851_v17, %v6234_v60  ;;  %v7538_v39 = vld [vmem:[#allocation49_spill] sm:$0xff] }
 0x272   :  { %v4852_v42 = vsel %vm4249_vm9, 1.0, %v7522_v50 }
 0x273   :  { %v4562_v59 = vadd.f32 %v4561_v15, %v4484_v58  ;;  %v4165_v15 = vadd.s32 2816, %v6713_v12  ;;  %vm4250_vm10 = vcmp.eq.s32.totalorder %v4164_v31, %v6716_v43  ;;  %v4487_v58 = vmul.f32 %v4852_v42, %v7537_v48 }
 0x274   :  { %v4853_v53 = vsel %vm4250_vm10, 1.0, %v7522_v50 }
 0x275   :  { %v4563_v49 = vadd.f32 %v4562_v59, %v4485_v33  ;;  %vm4251_vm11 = vcmp.eq.s32.totalorder %v4165_v15, %v6716_v43  ;;  %v4166_v59 = vadd.s32 2944, %v6713_v12  ;;  %v4488_v33 = vmul.f32 %v4853_v53, %v7538_v39  ;;  %v7540_v15 = vld [vmem:[#allocation50_spill] sm:$0xff] }
 0x276   :  { %v4854_v17 = vsel %vm4251_vm11, 1.0, %v7522_v50 }
 0x277   :  { %v4564_v23 = vadd.f32 %v4563_v49, %v4486_v40  ;;  %vm4252_vm12 = vcmp.eq.s32.totalorder %v4166_v59, %v6716_v43  ;;  %v4167_v49 = vadd.s32 3072, %v6713_v12  ;;  %v7539_v40 = vld [vmem:[#allocation48_spill] sm:$0xff]  ;;  %v7541_v59 = vld [vmem:[#allocation51_spill] sm:$0xff] }
 0x278   :  { %v4489_v31 = vmul.f32 %v4854_v17, %v7539_v40  ;;  %v4855_v42 = vsel %vm4252_vm12, 1.0, %v7522_v50  ;;  %vm4267_vm12 = vcmp.eq.s32.totalorder %v4181_v36, %v6716_v43  ;;  %v4183_v36 = vadd.s32 5120, %v6713_v12 }
 0x279   :  { %v4565_v14 = vadd.f32 %v4564_v23, %v4487_v58  ;;  %vm4253_vm13 = vcmp.eq.s32.totalorder %v4167_v49, %v6716_v43  ;;  %v4168_v23 = vadd.s32 3200, %v6713_v12  ;;  %v4490_v58 = vmul.f32 %v4855_v42, %v7540_v15  ;;  %v7542_v49 = vld [vmem:[#allocation53_spill] sm:$0xff] }
 0x27a   :  { %v4856_v53 = vsel %vm4253_vm13, 1.0, %v7522_v50 }
 0x27b   :  { %v4566_v28 = vadd.f32 %v4565_v14, %v4488_v33  ;;  %v4169_v14 = vadd.s32 3328, %v6713_v12  ;;  %vm4254_vm14 = vcmp.eq.s32.totalorder %v4168_v23, %v6716_v43  ;;  %v4491_v33 = vmul.f32 %v4856_v53, %v7541_v59 }
 0x27c   :  { %v4857_v17 = vsel %vm4254_vm14, 1.0, %v7522_v50  ;;  %vm4269_vm14 = vcmp.eq.s32.totalorder %v4183_v36, %v6716_v43 }
 0x27d   :  { %v4567_v0 = vadd.f32 %v4566_v28, %v4489_v31  ;;  %vm4255_vm15 = vcmp.eq.s32.totalorder %v4169_v14, %v6716_v43  ;;  %v4170_v28 = vadd.s32 3456, %v6713_v12  ;;  %v4492_v31 = vmul.f32 %v4857_v17, %v7542_v49  ;;  %v7544_v14 = vld [vmem:[#allocation54_spill] sm:$0xff] }
 0x27e   :  { %v4858_v42 = vsel %vm4255_vm15, 1.0, %v7522_v50  ;;  %v4872_v29 = vsel %vm4269_vm14, 1.0, %v7522_v50 }
 0x27f   :  { %v4568_v37 = vadd.f32 %v4567_v0, %v4490_v58  ;;  %vm4256_vm0 = vcmp.eq.s32.totalorder %v4170_v28, %v6716_v43  ;;  %v4171_v0 = vadd.s32 3584, %v6713_v12  ;;  %v7543_v58 = vld [vmem:[#allocation52_spill] sm:$0xff]  ;;  %v7545_v28 = vld [vmem:[#allocation55_spill] sm:$0xff] }
 0x280   :  { %v4493_v23 = vmul.f32 %v4858_v42, %v7543_v58  ;;  %v4859_v53 = vsel %vm4256_vm0, 1.0, %v7522_v50 }
 0x281   :  { %v4569_v44 = vadd.f32 %v4568_v37, %v4491_v33  ;;  %vm4257_vm1 = vcmp.eq.s32.totalorder %v4171_v0, %v6716_v43  ;;  %v4172_v37 = vadd.s32 3712, %v6713_v12  ;;  %v4494_v33 = vmul.f32 %v4859_v53, %v7544_v14  ;;  %v7546_v0 = vld [vmem:[#allocation57_spill] sm:$0xff] }
 0x282   :  { %v4860_v17 = vsel %vm4257_vm1, 1.0, %v7522_v50 }
 0x283   :  { %v4570_v26 = vadd.f32 %v4569_v44, %v4492_v31  ;;  %v4173_v44 = vadd.s32 3840, %v6713_v12  ;;  %vm4258_vm2 = vcmp.eq.s32.totalorder %v4172_v37, %v6716_v43  ;;  %v4495_v31 = vmul.f32 %v4860_v17, %v7545_v28 }
 0x284   :  { %v4861_v42 = vsel %vm4258_vm2, 1.0, %v7522_v50 }
 0x285   :  { %v4571_v9 = vadd.f32 %v4570_v26, %v4493_v23  ;;  %vm4259_vm4 = vcmp.eq.s32.totalorder %v4173_v44, %v6716_v43  ;;  %v4174_v26 = vadd.s32 3968, %v6713_v12  ;;  %v4496_v23 = vmul.f32 %v4861_v42, %v7546_v0  ;;  %v7548_v44 = vld [vmem:[#allocation58_spill] sm:$0xff] }
 0x286   :  { %v4862_v53 = vsel %vm4259_vm4, 1.0, %v7522_v50 }
 0x287   :  { %v4572_v55 = vadd.f32 %v4571_v9, %v4494_v33  ;;  %vm4260_vm5 = vcmp.eq.s32.totalorder %v4174_v26, %v6716_v43  ;;  %v4175_v9 = vadd.s32 4096, %v6713_v12  ;;  %v7547_v33 = vld [vmem:[#allocation56_spill] sm:$0xff]  ;;  %v7549_v26 = vld [vmem:[#allocation59_spill] sm:$0xff] }
 0x288   :  { %v4497_v37 = vmul.f32 %v4862_v53, %v7547_v33  ;;  %v4863_v17 = vsel %vm4260_vm5, 1.0, %v7522_v50 }
 0x289   :  { %v4573_v56 = vadd.f32 %v4572_v55, %v4495_v31  ;;  %vm4261_vm6 = vcmp.eq.s32.totalorder %v4175_v9, %v6716_v43  ;;  %v4176_v55 = vadd.s32 4224, %v6713_v12  ;;  %v4498_v31 = vmul.f32 %v4863_v17, %v7548_v44 }
 0x28a   :  { %v4864_v42 = vsel %vm4261_vm6, 1.0, %v7522_v50 }
 0x28b   :  { %v4574_v3 = vadd.f32 %v4573_v56, %v4496_v23  ;;  %v4177_v56 = vadd.s32 4352, %v6713_v12  ;;  %vm4262_vm7 = vcmp.eq.s32.totalorder %v4176_v55, %v6716_v43  ;;  %v4499_v23 = vmul.f32 %v4864_v42, %v7549_v26  ;;  %v7551_v42 = vld [vmem:[#allocation60_spill] sm:$0xff] }
 0x28c   :  { %v4865_v53 = vsel %vm4262_vm7, 1.0, %v7522_v50  ;;  %v4179_v55 = vadd.s32 4608, %v6713_v12 }
 0x28d   :  { %v4575_v38 = vadd.f32 %v4574_v3, %v4497_v37  ;;  %vm4263_vm8 = vcmp.eq.s32.totalorder %v4177_v56, %v6716_v43  ;;  %v4178_v3 = vadd.s32 4480, %v6713_v12  ;;  %v7550_v37 = vld [vmem:[#allocation61_spill] sm:$0xff] }
 0x28e   :  { %v4500_v17 = vmul.f32 %v4865_v53, %v7550_v37  ;;  %v4866_v5 = vsel %vm4263_vm8, 1.0, %v7522_v50  ;;  %vm4265_vm10 = vcmp.eq.s32.totalorder %v4179_v55, %v6716_v43  ;;  %v4180_v53 = vadd.s32 4736, %v6713_v12 }
 0x28f   :  { %v4576_v34 = vadd.f32 %v4575_v38, %v4498_v31  ;;  %vm4264_vm9 = vcmp.eq.s32.totalorder %v4178_v3, %v6716_v43  ;;  %v4501_v56 = vmul.f32 %v4866_v5, %v7551_v42 }
 0x290   :  { %vm4266_vm11 = vcmp.eq.s32.totalorder %v4180_v53, %v6716_v43  ;;  %v7554_v53 = vld [vmem:[#allocation65_spill] sm:$0xff] }
 0x291   :  { %v4577_v63 = vadd.f32 %v4576_v34, %v4499_v23  ;;  %v4867_v23 = vsel %vm4264_vm9, 1.0, %v7522_v50 }
 0x292   :  { %v4502_v24 = vmul.f32 %v4867_v23, %v7552_v51 }
 0x293   :  { %v4578_v38 = vadd.f32 %v4577_v63, %v4500_v17 }
 0x295   :  { %v4579_v11 = vadd.f32 %v4578_v38, %v4501_v56 }
 0x297   :  { %v4580_v5 = vadd.f32 %v4579_v11, %v4502_v24  ;;  %v4182_v24 = vadd.s32 4992, %v6713_v12 }
 0x299   :  { %vm4268_vm13 = vcmp.eq.s32.totalorder %v4182_v24, %v6716_v43 }
 0x2d8   :  { %v6855_v9 = vpop.permute.xlu0 %3818 }
 0x2d9   :  { %v3821_v31 = vsub.f32 %v6119_v62, %v6855_v9  ;;  %v3822_v34 = vsub.f32 %v7526_v19, %v6855_v9  ;;  %v3823_v3 = vsub.f32 %v7527_v27, %v6855_v9  ;;  %v4868_v62 = vsel %vm4265_vm10, 1.0, %v7522_v50  ;;  %v7553_v27 = vld [vmem:[#allocation63_spill] sm:$0xff] }
 0x2da   :  { %v3824_v19 = vsub.f32 %v7528_v46, %v6855_v9  ;;  %v3825_v38 = vsub.f32 %v7529_v16, %v6855_v9  ;;  %v3826_v56 = vsub.f32 %v7530_v25, %v6855_v9  ;;  %v3827_v11 = vsub.f32 %v7531_v47, %v6855_v9 }
 0x2db   :  { %v3900_v63 = vmul.f32 1.442695, %v3821_v31  ;;  %v3902_v17 = vmul.f32 1.442695, %v3822_v34  ;;  %v3904_v55 = vmul.f32 1.442695, %v3823_v3  ;;  %v4503_v31 = vmul.f32 %v4868_v62, %v7553_v27 }
 0x2dc   :  { %v4869_v34 = vsel %vm4266_vm11, 1.0, %v7522_v50  ;;  %v3906_v23 = vmul.f32 1.442695, %v3824_v19  ;;  %v3908_v16 = vmul.f32 1.442695, %v3825_v38  ;;  %v4870_v3 = vsel %vm4267_vm12, 1.0, %v7522_v50 }
 0x2dd   :  { %5094 = vpow2.f32 %v3900_v63  ;;  %v4581_v46 = vadd.f32 %v4580_v5, %v4503_v31  ;;  %v4504_v63 = vmul.f32 %v4869_v34, %v7554_v53  ;;  %v3910_v25 = vmul.f32 1.442695, %v3826_v56  ;;  %v7555_v38 = vld [vmem:[#allocation64_spill] sm:$0xff] }
 0x2de   :  { %5096 = vpow2.f32 %v3902_v17  ;;  %v3828_v17 = vsub.f32 %v7532_v32, %v6855_v9  ;;  %v3829_v19 = vsub.f32 %v6137_v52, %v6855_v9  ;;  %v3912_v47 = vmul.f32 1.442695, %v3827_v11  ;;  %v7556_v11 = vld [vmem:[#allocation66_spill] sm:$0xff] }
 0x2df   :  { %5098 = vpow2.f32 %v3904_v55  ;;  %v4582_v62 = vadd.f32 %v4581_v46, %v4504_v63  ;;  %v4505_v55 = vmul.f32 %v4870_v3, %v7555_v38  ;;  %v4871_v34 = vsel %vm4268_vm13, 1.0, %v7522_v50 }
 0x2e0   :  { %5100 = vpow2.f32 %v3906_v23  ;;  %v3830_v32 = vsub.f32 %v6155_v57, %v6855_v9  ;;  %v3914_v56 = vmul.f32 1.442695, %v3828_v17  ;;  %v4184_v46 = vadd.s32 5248, %v6713_v12 }
 0x2e1   :  { %5102 = vpow2.f32 %v3908_v16  ;;  %v4583_v23 = vadd.f32 %v4582_v62, %v4505_v55  ;;  %v3831_v52 = vsub.f32 %v6149_v2, %v6855_v9  ;;  %v3916_v24 = vmul.f32 1.442695, %v3829_v19 }
 0x2e2   :  { %5104 = vpow2.f32 %v3910_v25  ;;  %v4506_v16 = vmul.f32 %v4871_v34, %v7556_v11  ;;  %v3832_v57 = vsub.f32 %v7533_v18, %v6855_v9  ;;  %v3918_v17 = vmul.f32 1.442695, %v3830_v32 }
 0x2e3   :  { %5106 = vpow2.f32 %v3912_v47  ;;  %v4185_v62 = vadd.s32 5376, %v6713_v12  ;;  %vm4270_vm15 = vcmp.eq.s32.totalorder %v4184_v46, %v6716_v43  ;;  %v3833_v19 = vsub.f32 %v7534_v30, %v6855_v9 }
 0x2e4   :  { %5108 = vpow2.f32 %v3914_v56  ;;  %v4584_v25 = vadd.f32 %v4583_v23, %v4506_v16  ;;  %v3920_v47 = vmul.f32 1.442695, %v3831_v52  ;;  %v4873_v18 = vsel %vm4270_vm15, 1.0, %v7522_v50 }
 0x2e5   :  { %5110 = vpow2.f32 %v3916_v24  ;;  %v3834_v32 = vsub.f32 %v6193_v4, %v6855_v9  ;;  %v3922_v56 = vmul.f32 1.442695, %v3832_v57  ;;  %vm4271_vm0 = vcmp.eq.s32.totalorder %v4185_v62, %v6716_v43  ;;  %v7558_v24 = vld [vmem:[#allocation16_spill] sm:$0xff] }
 0x2e6   :  { %5112 = vpow2.f32 %v3918_v17  ;;  %v4186_v46 = vadd.s32 5504, %v6713_v12  ;;  %v3835_v52 = vsub.f32 %v7535_v54, %v6855_v9  ;;  %v4874_v4 = vsel %vm4271_vm0, 1.0, %v7522_v50 }
 0x2e7   :  { %v5095_v5 = vpop.eup %5094  ;;  %5114 = vpow2.f32 %v3920_v47  ;;  %v3836_v57 = vsub.f32 %v6204_v1, %v6855_v9  ;;  %v3926_v17 = vmul.f32 1.442695, %v3834_v32  ;;  %v4187_v62 = vadd.s32 5632, %v6713_v12 }
 0x2e8   :  { %v5097_v31 = vpop.eup %5096  ;;  %5116 = vpow2.f32 %v3922_v56  ;;  %vm4272_vm1 = vcmp.eq.s32.totalorder %v4186_v46, %v6716_v43  ;;  %v3928_v47 = vmul.f32 1.442695, %v3835_v52  ;;  %v3838_v32 = vsub.f32 %v6228_v7, %v6855_v9 }
 0x2e9   :  { %v4058_v63 = vadd.f32 %v5097_v31, %v5095_v5  ;;  %v5099_v3 = vpop.eup %5098  ;;  %v7557_v5 = vld [vmem:[#allocation23_spill] sm:$0xff]  ;;  %v4875_v1 = vsel %vm4272_vm1, 1.0, %v7522_v50  ;;  %v3930_v56 = vmul.f32 1.442695, %v3836_v57  ;;  %vm4273_vm2 = vcmp.eq.s32.totalorder %v4187_v62, %v6716_v43 }
 0x2ea   :  { %v5101_v2 = vpop.eup %5100  ;;  %v4507_v55 = vmul.f32 %v4872_v29, %v7557_v5  ;;  %v3924_v29 = vmul.f32 1.442695, %v3833_v19  ;;  %v3837_v19 = vsub.f32 %v6210_v22, %v6855_v9  ;;  %v4188_v46 = vadd.s32 5760, %v6713_v12 }
 0x2eb   :  { %v4059_v36 = vadd.f32 %v5099_v3, %v4058_v63  ;;  %v5103_v34 = vpop.eup %5102  ;;  %v4508_v63 = vmul.f32 %v4873_v18, %v7558_v24  ;;  %v4876_v7 = vsel %vm4273_vm2, 1.0, %v7522_v50  ;;  %v3934_v57 = vmul.f32 1.442695, %v3838_v32 }
 0x2ec   :  { %v4585_v23 = vadd.f32 %v4584_v25, %v4507_v55  ;;  %v5105_v30 = vpop.eup %5104  ;;  %5118 = vpow2.f32 %v3924_v29  ;;  %v7559_v55 = vld [vmem:[#allocation15_spill] sm:$0xff]  ;;  %v3932_v52 = vmul.f32 1.442695, %v3837_v19  ;;  %v7560_v29 = vld [vmem:[#allocation17_spill] sm:$0xff]  ;;  %vm4274_vm4 = vcmp.eq.s32.totalorder %v4188_v46, %v6716_v43  ;;  %v7561_v19 = vld [vmem:[#allocation18_spill] sm:$0xff] }
 0x2ed   :  { %v4060_v31 = vadd.f32 %v5101_v2, %v4059_v36  ;;  %v5107_v36 = vpop.eup %5106  ;;  %5120 = vpow2.f32 %v3926_v17  ;;  %v3843_v46 = vsub.f32 %v7539_v40, %v6855_v9 }
 0x2ee   :  { %v4586_v25 = vadd.f32 %v4585_v23, %v4508_v63  ;;  %v5109_v54 = vpop.eup %5108  ;;  %5122 = vpow2.f32 %v3928_v47  ;;  %v4510_v63 = vmul.f32 %v4875_v1, %v7560_v29  ;;  %v4511_v47 = vmul.f32 %v4876_v7, %v7561_v19 }
 0x2ef   :  { %v4061_v16 = vadd.f32 %v5103_v34, %v4060_v31  ;;  %v4509_v31 = vmul.f32 %v4874_v4, %v7559_v55  ;;  %v5111_v18 = vpop.eup %5110  ;;  %v3840_v4 = vsub.f32 %v6234_v60, %v6855_v9  ;;  %5124 = vpow2.f32 %v3930_v56 }
 0x2f0   :  { %v5113_v22 = vpop.eup %5112  ;;  %5126 = vpow2.f32 %v3932_v52  ;;  %v4877_v60 = vsel %vm4274_vm4, 1.0, %v7522_v50  ;;  %v4190_v56 = vadd.s32 6016, %v6713_v12  ;;  %v4191_v7 = vadd.s32 6144, %v6713_v12 }
 0x2f1   :  { %v4062_v3 = vadd.f32 %v5105_v30, %v4061_v16  ;;  %v4587_v23 = vadd.f32 %v4586_v25, %v4509_v31  ;;  %v3839_v30 = vsub.f32 %v7536_v45, %v6855_v9  ;;  %v4189_v25 = vadd.s32 5888, %v6713_v12 }
 0x2f2   :  { %5128 = vpow2.f32 %v3934_v57  ;;  %v3938_v1 = vmul.f32 1.442695, %v3840_v4  ;;  %vm4276_vm6 = vcmp.eq.s32.totalorder %v4190_v56, %v6716_v43  ;;  %v3845_v57 = vsub.f32 %v7541_v59, %v6855_v9 }
 0x2f3   :  { %v4063_v2 = vadd.f32 %v5107_v36, %v4062_v3  ;;  %v5115_v36 = vpop.eup %5114  ;;  %v4588_v17 = vadd.f32 %v4587_v23, %v4510_v63  ;;  %vm4275_vm5 = vcmp.eq.s32.totalorder %v4189_v25, %v6716_v43  ;;  %v3844_v63 = vsub.f32 %v7540_v15, %v6855_v9  ;;  %v7562_v25 = vld [vmem:[#allocation19_spill] sm:$0xff] }
 0x2f4   :  { %v5117_v45 = vpop.eup %5116  ;;  %v4879_v15 = vsel %vm4276_vm6, 1.0, %v7522_v50  ;;  %vm4277_vm7 = vcmp.eq.s32.totalorder %v4191_v7, %v6716_v43 }
 0x2f5   :  { %v4064_v34 = vadd.f32 %v5109_v54, %v4063_v2  ;;  %v3841_v2 = vsub.f32 %v7537_v48, %v6855_v9  ;;  %v3936_v54 = vmul.f32 1.442695, %v3839_v30  ;;  %v4589_v32 = vadd.f32 %v4588_v17, %v4511_v47 }
 0x2f6   :  { %v3944_v17 = vmul.f32 1.442695, %v3843_v46  ;;  %v3946_v47 = vmul.f32 1.442695, %v3844_v63  ;;  %v3848_v46 = vsub.f32 %v7544_v14, %v6855_v9 }
 0x2f7   :  { %v4065_v16 = vadd.f32 %v5111_v18, %v4064_v34  ;;  %v5119_v34 = vpop.eup %5118  ;;  %v3842_v18 = vsub.f32 %v7538_v39, %v6855_v9  ;;  %5130 = vpow2.f32 %v3936_v54  ;;  %v4878_v39 = vsel %vm4275_vm5, 1.0, %v7522_v50 }
 0x2f8   :  { %v5121_v48 = vpop.eup %5120  ;;  %5132 = vpow2.f32 %v3938_v1  ;;  %v3846_v54 = vsub.f32 %v7542_v49, %v6855_v9  ;;  %v3948_v1 = vmul.f32 1.442695, %v3845_v57  ;;  %v4880_v49 = vsel %vm4277_vm7, 1.0, %v7522_v50 }
 0x2f9   :  { %v4066_v3 = vadd.f32 %v5113_v22, %v4065_v16  ;;  %v3940_v16 = vmul.f32 1.442695, %v3841_v2  ;;  %v4512_v22 = vmul.f32 %v4877_v60, %v6470_v41  ;;  %v5123_v52 = vpop.eup %5122  ;;  %v3954_v57 = vmul.f32 1.442695, %v3848_v46 }
 0x2fa   :  { %v5125_v40 = vpop.eup %5124 }
 0x2fb   :  { %v4067_v62 = vadd.f32 %v5115_v36, %v4066_v3  ;;  %v3942_v3 = vmul.f32 1.442695, %v3842_v18  ;;  %v4590_v36 = vadd.f32 %v4589_v32, %v4512_v22  ;;  %5134 = vpow2.f32 %v3940_v16  ;;  %v5127_v2 = vpop.eup %5126  ;;  %v7563_v32 = vld [vmem:[#allocation20_spill] sm:$0xff] }
 0x2fc   :  { %v5129_v59 = vpop.eup %5128  ;;  %v3847_v18 = vsub.f32 %v7543_v58, %v6855_v9  ;;  %v4514_v56 = vmul.f32 %v4879_v15, %v7563_v32  ;;  %v3950_v16 = vmul.f32 1.442695, %v3846_v54  ;;  %v7565_v54 = vld [vmem:[#allocation24_spill] sm:$0xff] }
 0x2fd   :  { %v4068_v31 = vadd.f32 %v5117_v45, %v4067_v62  ;;  %v4513_v62 = vmul.f32 %v4878_v39, %v7562_v25  ;;  %5136 = vpow2.f32 %v3942_v3  ;;  %v3849_v39 = vsub.f32 %v7545_v28, %v6855_v9  ;;  %v7564_v3 = vld [vmem:[#allocation21_spill] sm:$0xff] }
 0x2fe   :  { %5138 = vpow2.f32 %v3944_v17  ;;  %v3952_v63 = vmul.f32 1.442695, %v3847_v18 }
 0x2ff   :  { %v4069_v23 = vadd.f32 %v5119_v34, %v4068_v31  ;;  %v4591_v31 = vadd.f32 %v4590_v36, %v4513_v62  ;;  %v4192_v34 = vadd.s32 6272, %v6713_v12  ;;  %5140 = vpow2.f32 %v3946_v47 }
 0x300   :  { %5142 = vpow2.f32 %v3948_v1  ;;  %v4515_v36 = vmul.f32 %v4880_v49, %v7564_v3  ;;  %v4194_v62 = vadd.s32 6528, %v6713_v12  ;;  %v3956_v15 = vmul.f32 1.442695, %v3849_v39  ;;  %v7566_v49 = vld [vmem:[#allocation22_spill] sm:$0xff] }
 0x301   :  { %v4070_v30 = vadd.f32 %v5121_v48, %v4069_v23  ;;  %v5131_v48 = vpop.eup %5130  ;;  %v4592_v22 = vadd.f32 %v4591_v31, %v4514_v56  ;;  %vm4278_vm8 = vcmp.eq.s32.totalorder %v4192_v34, %v6716_v43  ;;  %5144 = vpow2.f32 %v3950_v16 }
 0x302   :  { %v5133_v58 = vpop.eup %5132  ;;  %v4881_v14 = vsel %vm4278_vm8, 1.0, %v7522_v50  ;;  %5146 = vpow2.f32 %v3952_v63  ;;  %vm4280_vm10 = vcmp.eq.s32.totalorder %v4194_v62, %v6716_v43  ;;  %v4195_v1 = vadd.s32 6656, %v6713_v12 }
 0x303   :  { %v4071_v4 = vadd.f32 %v5123_v52, %v4070_v30  ;;  %v4193_v30 = vadd.s32 6400, %v6713_v12  ;;  %v4593_v17 = vadd.f32 %v4592_v22, %v4515_v36  ;;  %v4516_v47 = vmul.f32 %v4881_v14, %v7565_v54 }
 0x304   :  { %5148 = vpow2.f32 %v3954_v57  ;;  %vm4281_vm11 = vcmp.eq.s32.totalorder %v4195_v1, %v6716_v43  ;;  %v4196_v39 = vadd.s32 6784, %v6713_v12  ;;  %v3855_v36 = vsub.f32 %v7551_v42, %v6855_v9 }
 0x305   :  { %v4072_v45 = vadd.f32 %v5125_v40, %v4071_v4  ;;  %v5135_v4 = vpop.eup %5134  ;;  %v3850_v40 = vsub.f32 %v7546_v0, %v6855_v9  ;;  %vm4279_vm9 = vcmp.eq.s32.totalorder %v4193_v30, %v6716_v43  ;;  %v4594_v18 = vadd.f32 %v4593_v17, %v4516_v47 }
 0x306   :  { %v4882_v0 = vsel %vm4279_vm9, 1.0, %v7522_v50  ;;  %5150 = vpow2.f32 %v3956_v15  ;;  %v3854_v30 = vsub.f32 %v7550_v37, %v6855_v9  ;;  %v4884_v37 = vsel %vm4281_vm11, 1.0, %v7522_v50 }
 0x307   :  { %v4073_v60 = vadd.f32 %v5127_v2, %v4072_v45  ;;  %v5137_v28 = vpop.eup %5136  ;;  %v3851_v2 = vsub.f32 %v7547_v33, %v6855_v9  ;;  %v4517_v46 = vmul.f32 %v4882_v0, %v7566_v49  ;;  %v3856_v57 = vsub.f32 %v7552_v51, %v6855_v9 }
 0x308   :  { %v5139_v34 = vpop.eup %5138  ;;  %v3966_v17 = vmul.f32 1.442695, %v3854_v30  ;;  %vm4282_vm12 = vcmp.eq.s32.totalorder %v4196_v39, %v6716_v43  ;;  %v3968_v15 = vmul.f32 1.442695, %v3855_v36  ;;  %v4519_v47 = vmul.f32 %v4884_v37, %v6513_v20 }
 0x309   :  { %v4074_v23 = vadd.f32 %v5129_v59, %v4073_v60  ;;  %v3852_v60 = vsub.f32 %v7548_v44, %v6855_v9  ;;  %v3958_v59 = vmul.f32 1.442695, %v3850_v40  ;;  %v5141_v33 = vpop.eup %5140  ;;  %v4883_v44 = vsel %vm4280_vm10, 1.0, %v7522_v50 }
 0x30a   :  { %v5143_v22 = vpop.eup %5142  ;;  %v4885_v51 = vsel %vm4282_vm12, 1.0, %v7522_v50  ;;  %v3858_v0 = vsub.f32 %v7554_v53, %v6855_v9  ;;  %v4199_v30 = vadd.s32 7168, %v6713_v12  ;;  %v4200_v37 = vadd.s32 7296, %v6713_v12 }
 0x30b   :  { %v4075_v52 = vadd.f32 %v5131_v48, %v4074_v23  ;;  %v3853_v23 = vsub.f32 %v7549_v26, %v6855_v9  ;;  %v3960_v48 = vmul.f32 1.442695, %v3851_v2  ;;  %5152 = vpow2.f32 %v3958_v59  ;;  %v5145_v26 = vpop.eup %5144 }
 0x30c   :  { %v5147_v40 = vpop.eup %5146  ;;  %v3857_v2 = vsub.f32 %v7553_v27, %v6855_v9  ;;  %vm4285_vm15 = vcmp.eq.s32.totalorder %v4199_v30, %v6716_v43  ;;  %vm4286_vm0 = vcmp.eq.s32.totalorder %v4200_v37, %v6716_v43  ;;  %v4204_v37 = vadd.s32 7808, %v6713_v12 }
 0x30d   :  { %v4076_v7 = vadd.f32 %v5133_v58, %v4075_v52  ;;  %v3962_v52 = vmul.f32 1.442695, %v3852_v60  ;;  %v4595_v58 = vadd.f32 %v4594_v18, %v4517_v46  ;;  %5154 = vpow2.f32 %v3960_v48 }
 0x30e   :  { %v5149_v42 = vpop.eup %5148  ;;  %v3970_v60 = vmul.f32 1.442695, %v3856_v57  ;;  %v4198_v18 = vadd.s32 7040, %v6713_v12  ;;  %vm4290_vm5 = vcmp.eq.s32.totalorder %v4204_v37, %v6716_v43 }
 0x30f   :  { %v4077_v45 = vadd.f32 %v5135_v4, %v4076_v7  ;;  %v3964_v7 = vmul.f32 1.442695, %v3853_v23  ;;  %v4518_v4 = vmul.f32 %v4883_v44, %v6507_v8  ;;  %5156 = vpow2.f32 %v3962_v52 }
 0x310   :  { %v4520_v23 = vmul.f32 %v4885_v51, %v6531_v21  ;;  %vm4284_vm14 = vcmp.eq.s32.totalorder %v4198_v18, %v6716_v43  ;;  %v3865_v51 = vsub.f32 %v7561_v19, %v6855_v9 }
 0x311   :  { %v4078_v31 = vadd.f32 %v5137_v28, %v4077_v45  ;;  %v4596_v62 = vadd.f32 %v4595_v58, %v4518_v4  ;;  %v4197_v45 = vadd.s32 6912, %v6713_v12  ;;  %5158 = vpow2.f32 %v3964_v7 }
 0x312   :  { %5160 = vpow2.f32 %v3966_v17  ;;  %v3861_v58 = vsub.f32 %v7557_v5, %v6855_v9  ;;  %v3862_v4 = vsub.f32 %v7558_v24, %v6855_v9  ;;  %v3863_v17 = vsub.f32 %v7559_v55, %v6855_v9 }
 0x313   :  { %v4079_v56 = vadd.f32 %v5139_v34, %v4078_v31  ;;  %v5151_v34 = vpop.eup %5150  ;;  %v4597_v59 = vadd.f32 %v4596_v62, %v4519_v47  ;;  %vm4283_vm13 = vcmp.eq.s32.totalorder %v4197_v45, %v6716_v43  ;;  %5162 = vpow2.f32 %v3968_v15 }
 0x314   :  { %v4886_v53 = vsel %vm4283_vm13, 1.0, %v7522_v50  ;;  %5164 = vpow2.f32 %v3970_v60  ;;  %v3980_v62 = vmul.f32 1.442695, %v3861_v58  ;;  %v4888_v24 = vsel %vm4285_vm15, 1.0, %v7522_v50 }
 0x315   :  { %v4080_v16 = vadd.f32 %v5141_v33, %v4079_v56  ;;  %v5153_v27 = vpop.eup %5152  ;;  %v3859_v56 = vsub.f32 %v7555_v38, %v6855_v9  ;;  %v3972_v33 = vmul.f32 1.442695, %v3857_v2  ;;  %v4598_v44 = vadd.f32 %v4597_v59, %v4520_v23 }
 0x316   :  { %v3864_v2 = vsub.f32 %v7560_v29, %v6855_v9  ;;  %v3982_v15 = vmul.f32 1.442695, %v3862_v4  ;;  %v4523_v60 = vmul.f32 %v4888_v24, %v6543_v61  ;;  %v4889_v29 = vsel %vm4286_vm0, 1.0, %v7522_v50 }
 0x317   :  { %v4081_v63 = vadd.f32 %v5143_v22, %v4080_v16  ;;  %v5155_v46 = vpop.eup %5154  ;;  %v3860_v16 = vsub.f32 %v7556_v11, %v6855_v9  ;;  %v3974_v22 = vmul.f32 1.442695, %v3858_v0  ;;  %5166 = vpow2.f32 %v3972_v33 }
 0x318   :  { %v3976_v39 = vmul.f32 1.442695, %v3859_v56  ;;  %v4887_v11 = vsel %vm4284_vm14, 1.0, %v7522_v50  ;;  %v3984_v0 = vmul.f32 1.442695, %v3863_v17  ;;  %v4202_v33 = vadd.s32 7552, %v6713_v12 }
 0x319   :  { %v4082_v14 = vadd.f32 %v5145_v26, %v4081_v63  ;;  %v5157_v38 = vpop.eup %5156  ;;  %v7567_v63 = vld [vmem:[#allocation25_spill] sm:$0xff]  ;;  %5168 = vpow2.f32 %v3974_v22  ;;  %v4522_v45 = vmul.f32 %v4887_v11, %v6537_v6  ;;  %v3870_v4 = vsub.f32 %v7565_v54, %v6855_v9 }
 0x31a   :  { %v4521_v26 = vmul.f32 %v4886_v53, %v7567_v63  ;;  %5170 = vpow2.f32 %v3976_v39  ;;  %v4524_v53 = vmul.f32 %v4889_v29, %v6561_v10  ;;  %vm4288_vm2 = vcmp.eq.s32.totalorder %v4202_v33, %v6716_v43 }
 0x31b   :  { %v4083_v28 = vadd.f32 %v5147_v40, %v4082_v14  ;;  %v5159_v7 = vpop.eup %5158  ;;  %v3978_v14 = vmul.f32 1.442695, %v3860_v16  ;;  %v3869_v39 = vsub.f32 %v7564_v3, %v6855_v9  ;;  %v3998_v24 = vmul.f32 1.442695, %v3870_v4 }
 0x31c   :  { %v4599_v40 = vadd.f32 %v4598_v44, %v4521_v26  ;;  %v5161_v5 = vpop.eup %5160  ;;  %v3868_v44 = vsub.f32 %v7563_v32, %v6855_v9  ;;  %v4891_v32 = vsel %vm4288_vm2, 1.0, %v7522_v50  ;;  %v3879_v4 = vsub.f32 %v6551_v35, %v6855_v9 }
 0x31d   :  { %v4084_v31 = vadd.f32 %v5149_v42, %v4083_v28  ;;  %v5163_v42 = vpop.eup %5162  ;;  %5172 = vpow2.f32 %v3978_v14  ;;  %v3996_v17 = vmul.f32 1.442695, %v3869_v39 }
 0x31e   :  { %v4600_v47 = vadd.f32 %v4599_v40, %v4522_v45  ;;  %v5165_v55 = vpop.eup %5164  ;;  %5174 = vpow2.f32 %v3980_v62  ;;  %v3994_v14 = vmul.f32 1.442695, %v3868_v44  ;;  %v4526_v62 = vmul.f32 %v4891_v32, %v6567_v13 }
 0x31f   :  { %v4085_v1 = vadd.f32 %v5151_v34, %v4084_v31  ;;  %v4201_v31 = vadd.s32 7424, %v6713_v12  ;;  %5176 = vpow2.f32 %v3982_v15  ;;  %v4205_v15 = vadd.s32 7936, %v6713_v12 }
 0x320   :  { %v4601_v56 = vadd.f32 %v4600_v47, %v4523_v60  ;;  %5178 = vpow2.f32 %v3984_v0 }
 0x321   :  { %v4086_v48 = vadd.f32 %v5153_v27, %v4085_v1  ;;  %v5167_v18 = vpop.eup %5166  ;;  %v3866_v1 = vsub.f32 %v6470_v41, %v6855_v9  ;;  %v3986_v27 = vmul.f32 1.442695, %v3864_v2  ;;  %vm4287_vm1 = vcmp.eq.s32.totalorder %v4201_v31, %v6716_v43 }
 0x322   :  { %v4890_v41 = vsel %vm4287_vm1, 1.0, %v7522_v50  ;;  %v3873_v31 = vsub.f32 %v6513_v20, %v6855_v9  ;;  %vm4291_vm6 = vcmp.eq.s32.totalorder %v4205_v15, %v6716_v43 }
 0x323   :  { %v4087_v52 = vadd.f32 %v5155_v46, %v4086_v48  ;;  %v5169_v19 = vpop.eup %5168  ;;  %v3867_v48 = vsub.f32 %v7562_v25, %v6855_v9  ;;  %v3988_v46 = vmul.f32 1.442695, %v3865_v51  ;;  %5180 = vpow2.f32 %v3986_v27 }
 0x324   :  { %v5171_v22 = vpop.eup %5170  ;;  %v3990_v30 = vmul.f32 1.442695, %v3866_v1  ;;  %v4206_v1 = vadd.s32 8064, %v6713_v12  ;;  %v4004_v33 = vmul.f32 1.442695, %v3873_v31 }
 0x325   :  { %v4088_v36 = vadd.f32 %v5157_v38, %v4087_v52  ;;  %v4602_v52 = vadd.f32 %v4601_v56, %v4524_v53  ;;  %v4203_v38 = vadd.s32 7680, %v6713_v12  ;;  %5182 = vpow2.f32 %v3988_v46 }
 0x326   :  { %v3992_v26 = vmul.f32 1.442695, %v3867_v48  ;;  %5184 = vpow2.f32 %v3990_v30  ;;  %v3875_v56 = vsub.f32 %v7567_v63, %v6855_v9  ;;  %v3876_v53 = vsub.f32 %v6537_v6, %v6855_v9 }
 0x327   :  { %v4089_v57 = vadd.f32 %v5159_v7, %v4088_v36  ;;  %v5173_v25 = vpop.eup %5172  ;;  %v4525_v36 = vmul.f32 %v4890_v41, %v6551_v35  ;;  %vm4289_vm4 = vcmp.eq.s32.totalorder %v4203_v38, %v6716_v43  ;;  %vm4292_vm7 = vcmp.eq.s32.totalorder %v4206_v1, %v6716_v43  ;;  %v7570_v38 = vld [vmem:[#allocation27_spill] sm:$0xff] }
 0x328   :  { %v5175_v11 = vpop.eup %5174  ;;  %5186 = vpow2.f32 %v3992_v26  ;;  %v4892_v54 = vsel %vm4289_vm4, 1.0, %v7522_v50  ;;  %v4207_v41 = vadd.s32 8192, %v6713_v12  ;;  %v3877_v30 = vsub.f32 %v6543_v61, %v6855_v9 }
 0x329   :  { %v4090_v28 = vadd.f32 %v5161_v5, %v4089_v57  ;;  %v4603_v40 = vadd.f32 %v4602_v52, %v4525_v36  ;;  %v5177_v3 = vpop.eup %5176  ;;  %v3871_v5 = vsub.f32 %v7566_v49, %v6855_v9  ;;  %5188 = vpow2.f32 %v3994_v14 }
 0x32a   :  { %5190 = vpow2.f32 %v3996_v17  ;;  %v4008_v52 = vmul.f32 1.442695, %v3875_v56  ;;  %v4895_v6 = vsel %vm4292_vm7, 1.0, %v7522_v50  ;;  %v3878_v26 = vsub.f32 %v6561_v10, %v6855_v9 }
 0x32b   :  { %v4091_v34 = vadd.f32 %v5163_v42, %v4090_v28  ;;  %v5179_v28 = vpop.eup %5178  ;;  %v3872_v42 = vsub.f32 %v6507_v8, %v6855_v9  ;;  %v4604_v2 = vadd.f32 %v4603_v40, %v4526_v62  ;;  %v4893_v8 = vsel %vm4290_vm5, 1.0, %v7522_v50  ;;  %v7571_v40 = vld [vmem:[#allocation29_spill] sm:$0xff] }
 0x32c   :  { %5192 = vpow2.f32 %v3998_v24  ;;  %v4010_v36 = vmul.f32 1.442695, %v3876_v53  ;;  %vm4293_vm8 = vcmp.eq.s32.totalorder %v4207_v41, %v6716_v43  ;;  %v4012_v14 = vmul.f32 1.442695, %v3877_v30  ;;  %v7572_v24 = vld [vmem:[#allocation30_spill] sm:$0xff]  ;;  %v7574_v53 = vld [vmem:[#allocation31_spill] sm:$0xff] }
 0x32d   :  { %v4092_v59 = vadd.f32 %v5165_v55, %v4091_v34  ;;  %v5181_v49 = vpop.eup %5180  ;;  %v4000_v34 = vmul.f32 1.442695, %v3871_v5  ;;  %v7568_v55 = vld [vmem:[#allocation26_spill] sm:$0xff]  ;;  %v4530_v37 = vmul.f32 %v4895_v6, %v7571_v40  ;;  %v4896_v10 = vsel %vm4293_vm8, 1.0, %v7522_v50 }
 0x32e   :  { %v4527_v51 = vmul.f32 %v4892_v54, %v7568_v55  ;;  %v3880_v5 = vsub.f32 %v6567_v13, %v6855_v9  ;;  %v4014_v17 = vmul.f32 1.442695, %v3878_v26  ;;  %v3881_v54 = vsub.f32 %v7568_v55, %v6855_v9  ;;  %v7575_v26 = vld [vmem:[#allocation35_spill] sm:$0xff] }
 0x32f   :  { %v4093_v23 = vadd.f32 %v5167_v18, %v4092_v59  ;;  %v5183_v60 = vpop.eup %5182  ;;  %v3874_v59 = vsub.f32 %v6531_v21, %v6855_v9  ;;  %v4002_v18 = vmul.f32 1.442695, %v3872_v42  ;;  %5194 = vpow2.f32 %v4000_v34 }
 0x330   :  { %v4605_v29 = vadd.f32 %v4604_v2, %v4527_v51  ;;  %v5185_v20 = vpop.eup %5184  ;;  %v4894_v21 = vsel %vm4291_vm6, 1.0, %v7522_v50  ;;  %v4016_v42 = vmul.f32 1.442695, %v3879_v4  ;;  %v4531_v2 = vmul.f32 %v4896_v10, %v7572_v24 }
 0x331   :  { %v4094_v16 = vadd.f32 %v5169_v19, %v4093_v23  ;;  %v7569_v23 = vld [vmem:[#allocation28_spill] sm:$0xff]  ;;  %5196 = vpow2.f32 %v4002_v18  ;;  %v4018_v31 = vmul.f32 1.442695, %v3880_v5  ;;  %v4210_v51 = vadd.s32 8576, %v6713_v12 }
 0x332   :  { %v4528_v19 = vmul.f32 %v4893_v8, %v7569_v23  ;;  %v5187_v46 = vpop.eup %5186  ;;  %5198 = vpow2.f32 %v4004_v33  ;;  %v4020_v8 = vmul.f32 1.442695, %v3881_v54 }
 0x333   :  { %v4095_v58 = vadd.f32 %v5171_v22, %v4094_v16  ;;  %v4006_v16 = vmul.f32 1.442695, %v3874_v59  ;;  %v5189_v63 = vpop.eup %5188  ;;  %v7573_v59 = vld [vmem:[#allocation34_spill] sm:$0xff]  ;;  %vm4296_vm11 = vcmp.eq.s32.totalorder %v4210_v51, %v6716_v43 }
 0x334   :  { %v4606_v22 = vadd.f32 %v4605_v29, %v4528_v19  ;;  %v5191_v39 = vpop.eup %5190 }
 0x335   :  { %v4096_v7 = vadd.f32 %v5173_v25, %v4095_v58  ;;  %v4529_v58 = vmul.f32 %v4894_v21, %v7570_v38  ;;  %5200 = vpow2.f32 %v4006_v16 }
 0x336   :  { %v5193_v61 = vpop.eup %5192  ;;  %5202 = vpow2.f32 %v4008_v52 }
 0x337   :  { %v4097_v57 = vadd.f32 %v5175_v11, %v4096_v7  ;;  %v4607_v7 = vadd.f32 %v4606_v22, %v4529_v58  ;;  %v4208_v11 = vadd.s32 8320, %v6713_v12  ;;  %5204 = vpow2.f32 %v4010_v36 }
 0x338   :  { %5206 = vpow2.f32 %v4012_v14 }
 0x339   :  { %v4098_v45 = vadd.f32 %v5177_v3, %v4097_v57  ;;  %v5195_v3 = vpop.eup %5194  ;;  %v4608_v62 = vadd.f32 %v4607_v7, %v4530_v37  ;;  %vm4294_vm9 = vcmp.eq.s32.totalorder %v4208_v11, %v6716_v43  ;;  %5208 = vpow2.f32 %v4014_v17 }
 0x33a   :  { %v4897_v13 = vsel %vm4294_vm9, 1.0, %v7522_v50  ;;  %5210 = vpow2.f32 %v4016_v42 }
 0x33b   :  { %v4099_v47 = vadd.f32 %v5179_v28, %v4098_v45  ;;  %v4209_v45 = vadd.s32 8448, %v6713_v12  ;;  %v5197_v35 = vpop.eup %5196  ;;  %v4609_v34 = vadd.f32 %v4608_v62, %v4531_v2  ;;  %v4532_v18 = vmul.f32 %v4897_v13, %v7573_v59  ;;  %v7578_v13 = vld [vmem:[#allocation39_spill] sm:$0xff] }
 0x33c   :  { %5212 = vpow2.f32 %v4018_v31  ;;  %v4214_v2 = vadd.s32 9088, %v6713_v12 }
 0x33d   :  { %v4100_v0 = vadd.f32 %v5181_v49, %v4099_v47  ;;  %v5199_v47 = vpop.eup %5198  ;;  %v3882_v49 = vsub.f32 %v7569_v23, %v6855_v9  ;;  %vm4295_vm10 = vcmp.eq.s32.totalorder %v4209_v45, %v6716_v43  ;;  %v4610_v33 = vadd.f32 %v4609_v34, %v4532_v18 }
 0x33e   :  { %v4211_v23 = vadd.s32 8704, %v6713_v12  ;;  %5214 = vpow2.f32 %v4020_v8  ;;  %vm4300_vm15 = vcmp.eq.s32.totalorder %v4214_v2, %v6716_v43 }
 0x33f   :  { %v4101_v27 = vadd.f32 %v5183_v60, %v4100_v0  ;;  %v5201_v55 = vpop.eup %5200  ;;  %v3883_v60 = vsub.f32 %v7570_v38, %v6855_v9  ;;  %v4022_v56 = vmul.f32 1.442695, %v3882_v49  ;;  %v4212_v38 = vadd.s32 8832, %v6713_v12 }
 0x340   :  { %v5203_v1 = vpop.eup %5202  ;;  %vm4297_vm12 = vcmp.eq.s32.totalorder %v4211_v23, %v6716_v43  ;;  %v3891_v49 = vsub.f32 %v7578_v13, %v6855_v9 }
 0x341   :  { %v4102_v48 = vadd.f32 %v5185_v20, %v4101_v27  ;;  %v4898_v27 = vsel %vm4295_vm10, 1.0, %v7522_v50  ;;  %v3884_v20 = vsub.f32 %v7571_v40, %v6855_v9  ;;  %v4024_v21 = vmul.f32 1.442695, %v3883_v60  ;;  %v7579_v60 = vld [vmem:[#allocation69_spill] sm:$0xff] }
 0x342   :  { %v4533_v16 = vmul.f32 %v4898_v27, %v7574_v53  ;;  %5216 = vpow2.f32 %v4022_v56  ;;  %v4213_v40 = vadd.s32 8960, %v6713_v12  ;;  %vm4298_vm13 = vcmp.eq.s32.totalorder %v4212_v38, %v6716_v43 }
 0x343   :  { %v4103_v44 = vadd.f32 %v5187_v46, %v4102_v48  ;;  %v5205_v48 = vpop.eup %5204  ;;  %v3885_v46 = vsub.f32 %v7572_v24, %v6855_v9  ;;  %v4026_v30 = vmul.f32 1.442695, %v3884_v20  ;;  %5218 = vpow2.f32 %v4024_v21  ;;  %v7580_v20 = vld [vmem:[#allocation68_spill] sm:$0xff]  ;;  %v7581_v21 = vld [vmem:[#allocation71_spill] sm:$0xff] }
 0x344   :  { %v5207_v41 = vpop.eup %5206  ;;  %v4611_v52 = vadd.f32 %v4610_v33, %v4533_v16  ;;  %vm4299_vm14 = vcmp.eq.s32.totalorder %v4213_v40, %v6716_v43  ;;  %v3892_v8 = vsub.f32 %v7579_v60, %v6855_v9  ;;  %v3893_v56 = vsub.f32 %v7580_v20, %v6855_v9 }
 0x345   :  { %v4104_v25 = vadd.f32 %v5189_v63, %v4103_v44  ;;  %v4899_v44 = vsel %vm4296_vm11, 1.0, %v7522_v50  ;;  %v3886_v63 = vsub.f32 %v7573_v59, %v6855_v9  ;;  %v4028_v6 = vmul.f32 1.442695, %v3885_v46 }
 0x346   :  { %v4534_v36 = vmul.f32 %v4899_v44, %v7575_v26  ;;  %5220 = vpow2.f32 %v4026_v30  ;;  %v4040_v33 = vmul.f32 1.442695, %v3891_v49  ;;  %v4903_v46 = vsel %vm4300_vm15, 1.0, %v7522_v50  ;;  %v7582_v30 = vld [vmem:[#allocation70_spill] sm:$0xff] }
 0x347   :  { %v4105_v32 = vadd.f32 %v5191_v39, %v4104_v25  ;;  %v5209_v25 = vpop.eup %5208  ;;  %v3887_v39 = vsub.f32 %v7574_v53, %v6855_v9  ;;  %v4030_v4 = vmul.f32 1.442695, %v3886_v63  ;;  %5222 = vpow2.f32 %v4028_v6 }
 0x348   :  { %v5211_v11 = vpop.eup %5210  ;;  %v4612_v14 = vadd.f32 %v4611_v52, %v4534_v36  ;;  %v3894_v53 = vsub.f32 %v7581_v21, %v6855_v9  ;;  %v4042_v16 = vmul.f32 1.442695, %v3892_v8  ;;  %v3895_v52 = vsub.f32 %v7582_v30, %v6855_v9 }
 0x349   :  { %v4106_v57 = vadd.f32 %v5193_v61, %v4105_v32  ;;  %v4900_v32 = vsel %vm4297_vm12, 1.0, %v7522_v50  ;;  %v3888_v61 = vsub.f32 %v7575_v26, %v6855_v9  ;;  %v4032_v5 = vmul.f32 1.442695, %v3887_v39  ;;  %v7583_v26 = vld [vmem:[#allocation72_spill] sm:$0xff] }
 0x34a   :  { %5224 = vpow2.f32 %v4030_v4  ;;  %v4044_v38 = vmul.f32 1.442695, %v3893_v56  ;;  %v3896_v36 = vsub.f32 %v7583_v26, %v6855_v9 }
 0x34b   :  { %v4107_v28 = vadd.f32 %v5195_v3, %v4106_v57  ;;  %v5213_v57 = vpop.eup %5212  ;;  %v7576_v3 = vld [vmem:[#allocation38_spill] sm:$0xff]  ;;  %v4034_v42 = vmul.f32 1.442695, %v3888_v61  ;;  %5226 = vpow2.f32 %v4032_v5 }
 0x34c   :  { %v3889_v10 = vsub.f32 %v7576_v3, %v6855_v9  ;;  %v4535_v17 = vmul.f32 %v4900_v32, %v7576_v3  ;;  %v5215_v45 = vpop.eup %5214  ;;  %v4217_v32 = vadd.s32 9472, %v6713_v12 }
 0x34d   :  { %v4108_v15 = vadd.f32 %v5197_v35, %v4107_v28  ;;  %v4901_v28 = vsel %vm4298_vm13, 1.0, %v7522_v50  ;;  %v7577_v35 = vld [vmem:[#allocation67_spill] sm:$0xff]  ;;  %5228 = vpow2.f32 %v4034_v42 }
 0x34e   :  { %v3890_v54 = vsub.f32 %v7577_v35, %v6855_v9  ;;  %v4613_v24 = vadd.f32 %v4612_v14, %v4535_v17  ;;  %v4036_v31 = vmul.f32 1.442695, %v3889_v10  ;;  %v4536_v34 = vmul.f32 %v4901_v28, %v7577_v35  ;;  %v7584_v14 = vld [vmem:[#allocation73_spill] sm:$0xff]  ;;  %v7585_v17 = vld [vmem:[#allocation75_spill] sm:$0xff] }
 0x34f   :  { %v4109_v0 = vadd.f32 %v5199_v47, %v4108_v15  ;;  %v5217_v47 = vpop.eup %5216  ;;  %v3897_v40 = vsub.f32 %v7584_v14, %v6855_v9  ;;  %vm4303_vm2 = vcmp.eq.s32.totalorder %v4217_v32, %v6716_v43  ;;  %v4218_v35 = vadd.s32 9600, %v6713_v12  ;;  %v7588_v32 = vld [vmem:[#allocation77_spill] sm:$0xff] }
 0x350   :  { %v4038_v59 = vmul.f32 1.442695, %v3890_v54  ;;  %v4614_v18 = vadd.f32 %v4613_v24, %v4536_v34  ;;  %5230 = vpow2.f32 %v4036_v31  ;;  %v7586_v24 = vld [vmem:[#allocation74_spill] sm:$0xff]  ;;  %v4906_v31 = vsel %vm4303_vm2, 1.0, %v7522_v50 }
 0x351   :  { %v4110_v29 = vadd.f32 %v5201_v55, %v4109_v0  ;;  %v5219_v0 = vpop.eup %5218  ;;  %v4902_v55 = vsel %vm4299_vm14, 1.0, %v7522_v50  ;;  %v3899_v2 = vsub.f32 %v7586_v24, %v6855_v9  ;;  %vm4304_vm4 = vcmp.eq.s32.totalorder %v4218_v35, %v6716_v43 }
 0x352   :  { %v5221_v27 = vpop.eup %5220  ;;  %v4537_v23 = vmul.f32 %v4902_v55, %v7578_v13  ;;  %5232 = vpow2.f32 %v4038_v59 }
 0x353   :  { %v4111_v19 = vadd.f32 %v5203_v1, %v4110_v29  ;;  %v4215_v29 = vadd.s32 9216, %v6713_v12  ;;  %5234 = vpow2.f32 %v4040_v33  ;;  %v4056_v8 = vmul.f32 1.442695, %v3899_v2 }
 0x354   :  { %5236 = vpow2.f32 %v4042_v16 }
 0x355   :  { %v4112_v22 = vadd.f32 %v5205_v48, %v4111_v19  ;;  %v5223_v48 = vpop.eup %5222  ;;  %vm4301_vm0 = vcmp.eq.s32.totalorder %v4215_v29, %v6716_v43  ;;  %5238 = vpow2.f32 %v4044_v38  ;;  %v4907_v29 = vsel %vm4304_vm4, 1.0, %v7522_v50 }
 0x356   :  { %v5225_v63 = vpop.eup %5224  ;;  %v4904_v6 = vsel %vm4301_vm0, 1.0, %v7522_v50  ;;  %v4542_v33 = vmul.f32 %v4907_v29, %v7583_v26 }
 0x357   :  { %v4113_v58 = vadd.f32 %v5207_v41, %v4112_v22  ;;  %v4615_v22 = vadd.f32 %v4614_v18, %v4537_v23  ;;  %v4216_v41 = vadd.s32 9344, %v6713_v12  ;;  %v5227_v39 = vpop.eup %5226 }
 0x358   :  { %v5229_v4 = vpop.eup %5228 }
 0x359   :  { %v4114_v7 = vadd.f32 %v5209_v25, %v4113_v58  ;;  %v4538_v58 = vmul.f32 %v4903_v46, %v7579_v60  ;;  %vm4302_vm1 = vcmp.eq.s32.totalorder %v4216_v41, %v6716_v43 }
 0x35a   :  { %v5231_v10 = vpop.eup %5230  ;;  %v4905_v5 = vsel %vm4302_vm1, 1.0, %v7522_v50 }
 0x35b   :  { %v4115_v37 = vadd.f32 %v5211_v11, %v4114_v7  ;;  %v4046_v7 = vmul.f32 1.442695, %v3894_v53  ;;  %v4616_v11 = vadd.f32 %v4615_v22, %v4538_v58  ;;  %v4221_v53 = vadd.s32 9984, %v6713_v12 }
 0x35c   :  { %v5233_v42 = vpop.eup %5232 }
 0x35d   :  { %v4116_v62 = vadd.f32 %v5213_v57, %v4115_v37  ;;  %v4048_v37 = vmul.f32 1.442695, %v3895_v52  ;;  %v4539_v57 = vmul.f32 %v4904_v6, %v7580_v20  ;;  %5240 = vpow2.f32 %v4046_v7  ;;  %v5235_v49 = vpop.eup %5234 }
 0x35e   :  { %v5237_v60 = vpop.eup %5236  ;;  %vm4307_vm7 = vcmp.eq.s32.totalorder %v4221_v53, %v6716_v43 }
 0x35f   :  { %v4117_v15 = vadd.f32 %v5215_v45, %v4116_v62  ;;  %v3898_v62 = vsub.f32 %v7585_v17, %v6855_v9  ;;  %v4050_v45 = vmul.f32 1.442695, %v3896_v36  ;;  %v4617_v28 = vadd.f32 %v4616_v11, %v4539_v57  ;;  %v5239_v18 = vpop.eup %5238  ;;  %v7587_v11 = vld [vmem:[#allocation76_spill] sm:$0xff] }
 0x360   :  { %5242 = vpow2.f32 %v4048_v37  ;;  %v4541_v9 = vmul.f32 %v4906_v31, %v7582_v30  ;;  %v4910_v6 = vsel %vm4307_vm7, 1.0, %v7522_v50 }
 0x361   :  { %v4118_v51 = vadd.f32 %v5217_v47, %v4117_v15  ;;  %v4052_v15 = vmul.f32 1.442695, %v3897_v40  ;;  %v4540_v47 = vmul.f32 %v4905_v5, %v7581_v21  ;;  %5244 = vpow2.f32 %v4050_v45  ;;  %v4631_v45 = vld [vmem:[#allocation3] sm:$0xff] }
 0x362   :  { %v4054_v34 = vmul.f32 1.442695, %v3898_v62  ;;  %v4545_v36 = vmul.f32 %v4910_v6, %v7586_v24 }
 0x363   :  { %v4119_v1 = vadd.f32 %v5219_v0, %v4118_v51  ;;  %v4618_v51 = vadd.f32 %v4617_v28, %v4540_v47  ;;  %v4219_v0 = vadd.s32 9728, %v6713_v12  ;;  %5246 = vpow2.f32 %v4052_v15 }
 0x364   :  { %5248 = vpow2.f32 %v4054_v34 }
 0x365   :  { %v4120_v19 = vadd.f32 %v5221_v27, %v4119_v1  ;;  %v4619_v1 = vadd.f32 %v4618_v51, %v4541_v9  ;;  %vm4305_vm5 = vcmp.eq.s32.totalorder %v4219_v0, %v6716_v43  ;;  %v4220_v27 = vadd.s32 9856, %v6713_v12 }
 0x366   :  { %5250 = vpow2.f32 %v4056_v8 }
 0x367   :  { %v4121_v44 = vadd.f32 %v5223_v48, %v4120_v19  ;;  %v5241_v56 = vpop.eup %5240  ;;  %v4908_v48 = vsel %vm4305_vm5, 1.0, %v7522_v50  ;;  %v4620_v46 = vadd.f32 %v4619_v1, %v4542_v33  ;;  %vm4306_vm6 = vcmp.eq.s32.totalorder %v4220_v27, %v6716_v43 }
 0x368   :  { %v4543_v22 = vmul.f32 %v4908_v48, %v7584_v14  ;;  %v3814_v14 = vld [vmem:[#allocation4] sm:$0xff] }
 0x369   :  { %v4122_v25 = vadd.f32 %v5225_v63, %v4121_v44  ;;  %v4909_v63 = vsel %vm4306_vm6, 1.0, %v7522_v50 }
 0x36a   :  { %v5243_v19 = vpop.eup %5242  ;;  %v4621_v52 = vadd.f32 %v4620_v46, %v4543_v22  ;;  %v4544_v58 = vmul.f32 %v4909_v63, %v7585_v17 }
 0x36b   :  { %v4123_v61 = vadd.f32 %v5227_v39, %v4122_v25  ;;  %v5245_v16 = vpop.eup %5244 }
 0x36c   :  { %v4622_v12 = vadd.f32 %v4621_v52, %v4544_v58 }
 0x36d   :  { %v4124_v3 = vadd.f32 %v5229_v4, %v4123_v61  ;;  %v5247_v44 = vpop.eup %5246  ;;  %v7589_v61 = vsub.f32 %v7587_v11, %v7588_v32 }
 0x36e   :  { %v5249_v38 = vpop.eup %5248  ;;  %v4623_v7 = vadd.f32 %v4622_v12, %v4545_v36 }
 0x36f   :  { %v4125_v54 = vadd.f32 %v5231_v10, %v4124_v3  ;;  %v3812_v4 = vmul.f32 1.442695, %v7589_v61  ;;  %v4466_v3 = vld [vmem:[#allocation5] sm:$0xff] }
 0x370   :  { %v5251_v39 = vpop.eup %5250 }
 0x371   :  { %v4126_v13 = vadd.f32 %v5233_v42, %v4125_v54  ;;  %5252 = vpow2.f32 %v3812_v4 }
 0x373   :  { %v4127_v55 = vadd.f32 %v5235_v49, %v4126_v13 }
 0x375   :  { %v4128_v59 = vadd.f32 %v5237_v60, %v4127_v55 }
 0x377   :  { %v4129_v20 = vadd.f32 %v5239_v18, %v4128_v59 }
 0x379   :  { %v4130_v23 = vadd.f32 %v5241_v56, %v4129_v20 }
 0x37b   :  { %v4131_v21 = vadd.f32 %v5243_v19, %v4130_v23  ;;  %v5253_v43 = vpop.eup %5252 }
 0x37c   :  { %v3815_v40 = vmul.f32 %v5253_v43, %v3814_v14 }
 0x37d   :  { %v4132_v41 = vadd.f32 %v5245_v16, %v4131_v21 }
 0x37f   :  { %v4133_v30 = vadd.f32 %v5247_v44, %v4132_v41 }
 0x381   :  { %v4134_v25 = vadd.f32 %v5249_v38, %v4133_v30 }
 0x383   :  { %v4135_v26 = vadd.f32 %v5251_v39, %v4134_v25 }
 0x385   :  { %4136 = vadd.xlane.f32.xlu1 %v4135_v26 }
 0x389   :  { %4624 = vadd.xlane.f32.xlu1 %v4623_v7 }
 0x412   :  { %v4137_v37 = vpop.xlane.xlu1 %4136 }
 0x413   :  { %v4138_v57 = vadd.f32 %v4137_v37, %v3815_v40 }
 0x415   :  { %4140 = vst.msk [vmem:[#allocation4] sm:$0xff] %vm308_vm3, %v4138_v57 }
 0x416   :  { %v4625_v50 = vpop.xlane.xlu1 %4624 }
 0x417   :  { %v4626_v10 = vadd.f32 %v4625_v50, %v4466_v3 }
 0x419   :  { %4627 = vst.msk [vmem:[#allocation5] sm:$0xff] %vm308_vm3, %v4626_v10 }
 0x41c   :  { %v4632_v5 = vld [vmem:[#allocation4] sm:$0xff] }
 0x41d   :  { %5254 = vlog2.f32 %v4632_v5 }
 0x420   :  { %v4636_v35 = vld [vmem:[#allocation5] sm:$0xff] }
 0x427   :  { %v5255_v17 = vpop.eup %5254 }
 0x428   :  { %v4634_v62 = vmul.f32 0.6931472, %v5255_v17 }
 0x42a   :  { %v4635_v28 = vadd.f32 %v4634_v62, %v4631_v45 }
 0x42c   :  { %v4637_v54 = vsub.f32 %v4635_v28, %v4636_v35 }
 0x42e   :  { %v4638_v42 = vsel %vm308_vm3, %v4637_v54, 0.0 }
 0x42f   :  { %4639 = vadd.xlane.f32.xlu1 %v4638_v42 }
 0x4bc   :  { %v4640_v24 = vpop.xlane.xlu1 %4639 }
 0x4bd   :  { %v4641_v2 = vrot.slane %v4640_v24, 4 }
 0x4bf   :  { %v4642_v15 = vadd.f32 %v4641_v2, %v4640_v24 }
 0x4c1   :  { %v4643_v47 = vrot.slane %v4642_v15, 2 }
 0x4c3   :  { %v4644_v13 = vadd.f32 %v4643_v47, %v4642_v15 }
 0x4c5   :  { %v4645_v49 = vrot.slane %v4644_v13, 1 }
 0x4c7   :  { %v4646_v31 = vadd.f32 %v4645_v49, %v4644_v13 }
 0x4c9   :  { %5080 = vpush %v4646_v31 }
 0x4fa   :  { %s5081_s4 = spop %5080 }
 0x4fb   :  { %s4648_s11 = smul.f32 0.125, %s5081_s4 }
 0x4fd   :  { %4650 = sst [smem:[#allocation11]] %s4648_s11 }
 0x4fe   :  { %5299 = shalt.err (!%p5296_p1)
}
 0x4ff   :  { %s5315_s19 = smov [#allocation11]  }
 0x500   :  { %4658 = dma.smem_to_hbm %s5315_s19, 16, %s7216_s5, [#allocation10]  }
 0x501   :  { %5304 = dma.done.wait [#allocation10], 16  }
 0x502   :  { %5305 = vsyncadd [#allocation10], 4294967280 }
 0x503   :  { %4662 = sfence }
 0x504   :  { %4663 = vsyncpa [#allocation9], 1 }
 0x505   :  { %4664 = vsyncpa [#allocation10], 1 }

</bundles_post_ra>
